<compile_context>
chip_gen: v6e
topology: v6e:2x2x1
jax: 0.10.0
libtpu: 0.0.40
codegen_flags: <defaults>
</compile_context>

<pallas_src>
import functools
import math

import numpy as np
import jax
import jax.numpy as jnp
from jax.experimental import pallas as pl
from jax.experimental.pallas import tpu as pltpu


# ----------------------------------------------------------------------------
# Fused kernel
# ----------------------------------------------------------------------------

def _fused_kernel(*refs, num_layers, num_heads, bp):
    # ref layout:
    #   [0] xcol      (3*T_out*BP, 7*Cin)   im2col'd input, rows ordered (pool tap j, time t, batch b)
    #   [1] w_conv    (7*Cin, 3H)           fused conv weights for k=3/5/7, BN folded
    #   [2] b_conv    (1, 3H)
    #   [3 .. 3+3L)   per LSTM layer: w_ih^T (Din,4H), w_hh^T (H,4H), b_ih+b_hh (1,4H)  [gates i,f,o,g]
    #   attention:    in_w^T (H,3H) [Q pre-scaled], in_b (1,3H), out_w^T (H,H), out_b (1,H)
    #   constants:    smask (n,n) additive batch-match mask, gsum (n,T_out), perm (B*T_pad, n)
    #   fc head:      w1^T (H,H) [BN folded], b1, w2^T (H,H//2), b2, w3^T (H//2,1), b3
    #   outputs:      logits (B,1), attn_weights (B,T_out,T_out)
    xcol_ref, wc_ref, bc_ref = refs[0:3]
    lstm_refs = refs[3:3 + 3 * num_layers]
    a0 = 3 + 3 * num_layers
    (ain_w_ref, ain_b_ref, aout_w_ref, aout_b_ref,
     smask_ref, gsum_ref, perm_ref,
     w1_ref, b1_ref, w2_ref, b2_ref, w3_ref, b3_ref,
     logits_ref, attn_ref) = refs[a0:a0 + 15]

    B = logits_ref.shape[0]
    T_out = attn_ref.shape[1]
    H = aout_w_ref.shape[0]
    hd = H // num_heads
    n = T_out * bp
    t_pad = perm_ref.shape[0] // B

    # ---- fused Conv1d(k=3,5,7) + folded BatchNorm + ReLU, evaluated at all pooling taps ----
    y = jnp.dot(xcol_ref[...], wc_ref[...], preferred_element_type=jnp.float32) + bc_ref[...]
    y = jnp.maximum(y, 0.0)                                               # (3*n, 3H)
    # MaxPool1d(kernel=3, stride=2): the three pool taps are contiguous, tile-aligned row blocks
    seq = jnp.maximum(jnp.maximum(y[0:n, :], y[n:2 * n, :]), y[2 * n:3 * n, :])   # (n, 3H), row = t*bp + b

    # ---- LSTM stack: hoisted input projection, unrolled time loop, 8-aligned slices ----
    for layer in range(num_layers):
        wih_ref, whh_ref, bias_ref = lstm_refs[3 * layer:3 * layer + 3]
        gx = jnp.dot(seq, wih_ref[...], preferred_element_type=jnp.float32) + bias_ref[...]  # (n, 4H)
        whh = whh_ref[...]
        h = jnp.zeros((bp, H), jnp.float32)
        c = jnp.zeros((bp, H), jnp.float32)
        hs = []
        # TODO(synk): for long sequences switch to lax.fori_loop(unroll=2-4) + aligned VMEM scratch.
        for t in range(T_out):
            g = gx[t * bp:(t + 1) * bp, :] + jnp.dot(h, whh, preferred_element_type=jnp.float32)
            sig = jax.nn.sigmoid(g[:, :3 * H])     # gates pre-ordered (i, f, o | g) on the host
            gg = jnp.tanh(g[:, 3 * H:])
            i_g = sig[:, 0:H]
            f_g = sig[:, H:2 * H]
            o_g = sig[:, 2 * H:3 * H]
            c = f_g * c + i_g * gg
            h = o_g * jnp.tanh(c)
            hs.append(h)
        seq = jnp.concatenate(hs, axis=0)          # (n, H): T_out tile-aligned (bp, H) pieces

    # ---- multi-head self-attention, batched over (head, batch, time) ----
    # qkv in one matmul over the whole time-major slab; 1/sqrt(head_dim) folded into Q columns.
    qkv = jnp.dot(seq, ain_w_ref[...], preferred_element_type=jnp.float32) + ain_b_ref[...]   # (n, 3H)
    s_heads = []
    for hh in range(num_heads):
        q = qkv[:, hh * hd:(hh + 1) * hd]
        k = qkv[:, H + hh * hd:H + (hh + 1) * hd]
        # scores for all (t,b)x(t',b') pairs; cross-batch pairs are masked out below (MXU is idle anyway)
        s_heads.append(jax.lax.dot_general(q, k, (((1,), (1,)), ((), ())),
                                           preferred_element_type=jnp.float32))   # (n, n)
    s = jnp.stack(s_heads, axis=0) + smask_ref[...]            # (heads, n, n), b != b' -> -1e30
    s = s - jnp.max(s, axis=-1, keepdims=True)
    e = jnp.exp(s)
    p = e / jnp.sum(e, axis=-1, keepdims=True)                 # ONE softmax; exact division (rows sum to 1)

    # attn_weights: mean over heads, fold the masked key-batch dim, reorder to batch-major, ONE store.
    p_mean = p[0]
    for hh in range(1, num_heads):
        p_mean = p_mean + p[hh]
    p_mean = p_mean * (1.0 / num_heads)                                             # (n, n)
    attn_tm = jnp.dot(p_mean, gsum_ref[...], preferred_element_type=jnp.float32)    # (n, T_out)
    attn_bm = jnp.dot(perm_ref[...], attn_tm, preferred_element_type=jnp.float32)   # (B*t_pad, T_out)
    attn_ref[...] = attn_bm.reshape(B, t_pad, T_out)[:, :T_out, :]

    # context: only the last query row is consumed downstream (context = attn_out[:, -1, :])
    last = (T_out - 1) * bp
    ctx_heads = []
    for hh in range(num_heads):
        v = qkv[:, 2 * H + hh * hd:2 * H + (hh + 1) * hd]
        ctx_heads.append(jnp.dot(p[hh, last:last + bp, :], v,
                                 preferred_element_type=jnp.float32))               # (bp, hd)
    ctx = jnp.concatenate(ctx_heads, axis=-1)                                        # (bp, H)
    ctx = jnp.dot(ctx, aout_w_ref[...], preferred_element_type=jnp.float32) + aout_b_ref[...]

    # ---- FC head: (BatchNorm folded into w1) -> Linear -> ReLU -> Linear -> ReLU -> Linear ----
    h1 = jnp.maximum(jnp.dot(ctx, w1_ref[...], preferred_element_type=jnp.float32) + b1_ref[...], 0.0)
    h2 = jnp.maximum(jnp.dot(h1, w2_ref[...], preferred_element_type=jnp.float32) + b2_ref[...], 0.0)
    out = jnp.dot(h2, w3_ref[...], preferred_element_type=jnp.float32) + b3_ref[...]
    logits_ref[...] = out[:B, :]


# ----------------------------------------------------------------------------
# Host wrapper: parameter folding, im2col, single pallas_call
# ----------------------------------------------------------------------------

def _vmem_spec():
    return pl.BlockSpec(memory_space=pltpu.MemorySpace.VMEM)


def enhanced_lstm_classifier(x, params, num_heads):
    # x: (B, T, input_size)
    x = x.astype(jnp.float32)
    B, T, Cin = x.shape
    H = params["attn"]["out_w"].shape[0]
    hd = H // num_heads
    T_out = (T - 3) // 2 + 1                 # MaxPool1d(kernel=3, stride=2) on length-T 'same' conv output
    KMAX = 7
    BP = ((B + 7) // 8) * 8                  # batch padded to a full sublane tile
    TP = ((T_out + 7) // 8) * 8
    n = T_out * BP

    # --- fold Conv1d + BatchNorm1d into one (7*Cin, 3H) weight matrix (branches k=3,5,7) ---
    w_blocks, b_blocks = [], []
    for cp, k in zip(params["conv"], (3, 5, 7)):
        scale = cp["gamma"] / jnp.sqrt(cp["var"] + 1e-5)
        wf = cp["w"] * scale[:, None, None]                    # (H, Cin, k)
        bf = (cp["b"] - cp["mean"]) * scale + cp["beta"]       # (H,)
        w_full = jnp.zeros((KMAX, Cin, H), jnp.float32)
        off = (KMAX - k) // 2                                  # center the k-tap filter in the 7-tap window
        w_full = w_full.at[off:off + k].set(jnp.transpose(wf, (2, 1, 0)))
        w_blocks.append(w_full)
        b_blocks.append(bf)
    w_conv = jnp.concatenate(w_blocks, axis=-1).reshape(KMAX * Cin, 3 * H)
    b_conv = jnp.concatenate(b_blocks).reshape(1, 3 * H)

    # --- im2col: batch zero-padded to BP, rows ordered (pool tap j, time t, batch b) ---
    x_p = jnp.pad(x, ((0, BP - B), (0, 0), (0, 0)))                            # (BP, T, Cin)
    x_pad = jnp.pad(x_p, ((0, 0), (KMAX // 2, KMAX // 2), (0, 0)))             # (BP, T+6, Cin)
    pos = (np.arange(3)[:, None] + 2 * np.arange(T_out)[None, :]).reshape(-1)  # (3*T_out,)
    tidx = pos[:, None] + np.arange(KMAX)[None, :]                             # (3*T_out, 7)
    xw = x_pad[:, tidx, :]                                                     # (BP, 3*T_out, 7, Cin)
    xcol = jnp.transpose(xw, (1, 0, 2, 3)).reshape(3 * n, KMAX * Cin)

    # --- LSTM params: reorder gates (i,f,g,o) -> (i,f,o,g), transpose, combine biases ---
    gate_perm = np.concatenate([np.arange(0, 2 * H), np.arange(3 * H, 4 * H), np.arange(2 * H, 3 * H)])
    lstm_args = []
    for lw in params["lstm"]:
        lstm_args += [lw["w_ih"][gate_perm].T, lw["w_hh"][gate_perm].T,
                      (lw["b_ih"] + lw["b_hh"])[gate_perm].reshape(1, -1)]

    # --- attention: fold 1/sqrt(head_dim) into the Q rows of in_proj ---
    ap = params["attn"]
    col_scale = jnp.concatenate([jnp.full((H,), 1.0 / math.sqrt(hd), jnp.float32),
                                 jnp.ones((2 * H,), jnp.float32)])
    ain_w = (ap["in_w"] * col_scale[:, None]).T                                # (H, 3H)
    ain_b = (ap["in_b"] * col_scale).reshape(1, -1)

    # --- host-built attention constants (all tiny) ---
    rb = np.arange(n) % BP
    smask = np.where(rb[:, None] == rb[None, :], 0.0, -1e30).astype(np.float32)            # (n, n)
    g_sum = (np.arange(n)[:, None] // BP == np.arange(T_out)[None, :]).astype(np.float32)  # (n, T_out)
    perm_bm = np.zeros((B * TP, n), np.float32)                                            # time-major -> batch-major
    for b in range(B):
        for t in range(T_out):
            perm_bm[b * TP + t, t * BP + b] = 1.0

    # --- fold the fc BatchNorm1d into the first Linear ---
    fp = params["fc"]
    s_bn = fp["gamma"] / jnp.sqrt(fp["var"] + 1e-5)
    t_shift = fp["beta"] - fp["mean"] * s_bn
    w1_eff = fp["w1"].T * s_bn[:, None]                                        # (H, H)
    b1_eff = fp["b1"] + jnp.dot(fp["w1"], t_shift)                             # (H,)

    args = [xcol, w_conv, b_conv] + lstm_args + [
        ain_w, ain_b, ap["out_w"].T, ap["out_b"].reshape(1, -1),
        jnp.asarray(smask), jnp.asarray(g_sum), jnp.asarray(perm_bm),
        w1_eff, b1_eff.reshape(1, -1),
        fp["w2"].T, fp["b2"].reshape(1, -1),
        fp["w3"].T, fp["b3"].reshape(1, -1),
    ]

    kernel = functools.partial(_fused_kernel, num_layers=len(params["lstm"]),
                               num_heads=num_heads, bp=BP)
    out_shapes = (jax.ShapeDtypeStruct((B, 1), jnp.float32),
                  jax.ShapeDtypeStruct((B, T_out, T_out), jnp.float32))
    logits, attn_w = pl.pallas_call(
        kernel,
        out_shape=out_shapes,
        in_specs=[_vmem_spec() for _ in args],
        out_specs=(_vmem_spec(), _vmem_spec()),
    )(*args)
    return logits[:, 0], attn_w


# ----------------------------------------------------------------------------
# Deterministic parameter initialization (shapes match the PyTorch module)
# ----------------------------------------------------------------------------

def init_params(key, input_size, hidden_size, num_layers):
    keys = iter(jax.random.split(key, 64))

    def nrm(shape, scale=0.1):
        return scale * jax.random.normal(next(keys), shape, dtype=jnp.float32)

    params = {"conv": [], "lstm": []}
    for k in (3, 5, 7):
        params["conv"].append(dict(
            w=nrm((hidden_size, input_size, k)),
            b=nrm((hidden_size,)),
            gamma=1.0 + nrm((hidden_size,), 0.05),
            beta=nrm((hidden_size,), 0.05),
            mean=nrm((hidden_size,), 0.05),
            var=1.0 + jnp.abs(nrm((hidden_size,), 0.05)),
        ))
    din = hidden_size * 3
    for _ in range(num_layers):
        params["lstm"].append(dict(
            w_ih=nrm((4 * hidden_size, din)),
            w_hh=nrm((4 * hidden_size, hidden_size)),
            b_ih=nrm((4 * hidden_size,)),
            b_hh=nrm((4 * hidden_size,)),
        ))
        din = hidden_size
    params["attn"] = dict(
        in_w=nrm((3 * hidden_size, hidden_size)),
        in_b=nrm((3 * hidden_size,)),
        out_w=nrm((hidden_size, hidden_size)),
        out_b=nrm((hidden_size,)),
    )
    params["fc"] = dict(
        gamma=1.0 + nrm((hidden_size,), 0.05),
        beta=nrm((hidden_size,), 0.05),
        mean=nrm((hidden_size,), 0.05),
        var=1.0 + jnp.abs(nrm((hidden_size,), 0.05)),
        w1=nrm((hidden_size, hidden_size)),
        b1=nrm((hidden_size,)),
        w2=nrm((hidden_size // 2, hidden_size)),
        b2=nrm((hidden_size // 2,)),
        w3=nrm((1, hidden_size // 2)),
        b3=nrm((1,)),
    )
    return params


if __name__ == "__main__":
    INPUT_SIZE, HIDDEN, NUM_LAYERS, NUM_HEADS = 8, 32, 2, 4
    B, T = 2, 16

    key = jax.random.PRNGKey(0)
    pkey, xkey = jax.random.split(key)
    params = init_params(pkey, INPUT_SIZE, HIDDEN, NUM_LAYERS)
    x = jax.random.normal(xkey, (B, T, INPUT_SIZE), dtype=jnp.float32)

    out, attn_w = enhanced_lstm_classifier(x, params, num_heads=NUM_HEADS)
    jax.block_until_ready((out, attn_w))

    T_out = (T - 3) // 2 + 1
    assert out.shape == (B,), out.shape
    assert attn_w.shape == (B, T_out, T_out), attn_w.shape
    assert bool(jnp.all(jnp.isfinite(out))) and bool(jnp.all(jnp.isfinite(attn_w)))
    # attention rows should now sum to ~1 exactly (exact division in softmax)
    assert bool(jnp.all(jnp.abs(jnp.sum(attn_w, axis=-1) - 1.0) < 1e-4))
    print("KERNEL_OK")
</pallas_src>

<mosaic_0001>
module attributes {stable_mosaic.version = 11 : i64} {
  func.func @_fused_kernel(%arg0: memref<168x56xf32, #tpu.memory_space<vmem>>, %arg1: memref<56x96xf32, #tpu.memory_space<vmem>>, %arg2: memref<1x96xf32, #tpu.memory_space<vmem>>, %arg3: memref<96x128xf32, #tpu.memory_space<vmem>>, %arg4: memref<32x128xf32, #tpu.memory_space<vmem>>, %arg5: memref<1x128xf32, #tpu.memory_space<vmem>>, %arg6: memref<32x128xf32, #tpu.memory_space<vmem>>, %arg7: memref<32x128xf32, #tpu.memory_space<vmem>>, %arg8: memref<1x128xf32, #tpu.memory_space<vmem>>, %arg9: memref<32x96xf32, #tpu.memory_space<vmem>>, %arg10: memref<1x96xf32, #tpu.memory_space<vmem>>, %arg11: memref<32x32xf32, #tpu.memory_space<vmem>>, %arg12: memref<1x32xf32, #tpu.memory_space<vmem>>, %arg13: memref<56x56xf32, #tpu.memory_space<vmem>>, %arg14: memref<56x7xf32, #tpu.memory_space<vmem>>, %arg15: memref<16x56xf32, #tpu.memory_space<vmem>>, %arg16: memref<32x32xf32, #tpu.memory_space<vmem>>, %arg17: memref<1x32xf32, #tpu.memory_space<vmem>>, %arg18: memref<32x16xf32, #tpu.memory_space<vmem>>, %arg19: memref<1x16xf32, #tpu.memory_space<vmem>>, %arg20: memref<16x1xf32, #tpu.memory_space<vmem>>, %arg21: memref<1x1xf32, #tpu.memory_space<vmem>>, %arg22: memref<2x1xf32, #tpu.memory_space<vmem>>, %arg23: memref<2x7x7xf32, #tpu.memory_space<vmem>>) attributes {dimension_semantics = [], scalar_prefetch = 0 : i64, scratch_operands = 0 : i64, tpu.core_type = #tpu.core_type<tc>} {
    %c0 = arith.constant 0 : index
    %c0_0 = arith.constant 0 : index
    %0 = vector.load %arg0[%c0, %c0_0] : memref<168x56xf32, #tpu.memory_space<vmem>>, vector<168x56xf32>
    %c0_1 = arith.constant 0 : index
    %c0_2 = arith.constant 0 : index
    %1 = vector.load %arg1[%c0_1, %c0_2] : memref<56x96xf32, #tpu.memory_space<vmem>>, vector<56x96xf32>
    %cst = arith.constant dense<0.000000e+00> : vector<168x96xf32>
    %2 = tpu.matmul %0, %1, %cst {dimension_numbers = #tpu.dot_dimension_numbers<[1], [0], [0], [1], [0, 0, 1, 1], [], []>} : vector<168x56xf32>, vector<56x96xf32>, vector<168x96xf32> -> vector<168x96xf32>
    %c0_3 = arith.constant 0 : index
    %c0_4 = arith.constant 0 : index
    %3 = vector.load %arg2[%c0_3, %c0_4] : memref<1x96xf32, #tpu.memory_space<vmem>>, vector<1x96xf32>
    %4 = vector.broadcast %3 : vector<1x96xf32> to vector<168x96xf32>
    %5 = arith.addf %2, %4 : vector<168x96xf32>
    %cst_5 = arith.constant 0.000000e+00 : f32
    %6 = vector.broadcast %cst_5 : f32 to vector<168x96xf32>
    %7 = arith.maximumf %5, %6 : vector<168x96xf32>
    %8 = vector.extract_strided_slice %7 {offsets = [0, 0], sizes = [56, 96], strides = [1, 1]} : vector<168x96xf32> to vector<56x96xf32>
    %9 = vector.extract_strided_slice %7 {offsets = [56, 0], sizes = [56, 96], strides = [1, 1]} : vector<168x96xf32> to vector<56x96xf32>
    %10 = arith.maximumf %8, %9 : vector<56x96xf32>
    %11 = vector.extract_strided_slice %7 {offsets = [112, 0], sizes = [56, 96], strides = [1, 1]} : vector<168x96xf32> to vector<56x96xf32>
    %12 = arith.maximumf %10, %11 : vector<56x96xf32>
    %c0_6 = arith.constant 0 : index
    %c0_7 = arith.constant 0 : index
    %13 = vector.load %arg3[%c0_6, %c0_7] : memref<96x128xf32, #tpu.memory_space<vmem>>, vector<96x128xf32>
    %cst_8 = arith.constant dense<0.000000e+00> : vector<56x128xf32>
    %14 = tpu.matmul %12, %13, %cst_8 {dimension_numbers = #tpu.dot_dimension_numbers<[1], [0], [0], [1], [0, 0, 1, 1], [], []>} : vector<56x96xf32>, vector<96x128xf32>, vector<56x128xf32> -> vector<56x128xf32>
    %c0_9 = arith.constant 0 : index
    %c0_10 = arith.constant 0 : index
    %15 = vector.load %arg5[%c0_9, %c0_10] : memref<1x128xf32, #tpu.memory_space<vmem>>, vector<1x128xf32>
    %16 = vector.broadcast %15 : vector<1x128xf32> to vector<56x128xf32>
    %17 = arith.addf %14, %16 : vector<56x128xf32>
    %c0_11 = arith.constant 0 : index
    %c0_12 = arith.constant 0 : index
    %18 = vector.load %arg4[%c0_11, %c0_12] : memref<32x128xf32, #tpu.memory_space<vmem>>, vector<32x128xf32>
    %cst_13 = arith.constant 0.000000e+00 : f32
    %19 = vector.broadcast %cst_13 : f32 to vector<8x32xf32>
    %cst_14 = arith.constant 0.000000e+00 : f32
    %20 = vector.broadcast %cst_14 : f32 to vector<8x32xf32>
    %21 = vector.extract_strided_slice %17 {offsets = [0, 0], sizes = [8, 128], strides = [1, 1]} : vector<56x128xf32> to vector<8x128xf32>
    %cst_15 = arith.constant dense<0.000000e+00> : vector<8x128xf32>
    %22 = tpu.matmul %19, %18, %cst_15 {dimension_numbers = #tpu.dot_dimension_numbers<[1], [0], [0], [1], [0, 0, 1, 1], [], []>} : vector<8x32xf32>, vector<32x128xf32>, vector<8x128xf32> -> vector<8x128xf32>
    %23 = arith.addf %21, %22 : vector<8x128xf32>
    %24 = vector.extract_strided_slice %23 {offsets = [0, 0], sizes = [8, 96], strides = [1, 1]} : vector<8x128xf32> to vector<8x96xf32>
    %25 = arith.negf %24 : vector<8x96xf32>
    %26 = math.exp %25 : vector<8x96xf32>
    %cst_16 = arith.constant 1.000000e+00 : f32
    %27 = vector.broadcast %cst_16 : f32 to vector<8x96xf32>
    %28 = arith.addf %27, %26 : vector<8x96xf32>
    %29 = arith.divf %27, %28 : vector<8x96xf32>
    %30 = vector.extract_strided_slice %23 {offsets = [0, 96], sizes = [8, 32], strides = [1, 1]} : vector<8x128xf32> to vector<8x32xf32>
    %31 = math.tanh %30 : vector<8x32xf32>
    %32 = vector.extract_strided_slice %29 {offsets = [0, 0], sizes = [8, 32], strides = [1, 1]} : vector<8x96xf32> to vector<8x32xf32>
    %33 = vector.extract_strided_slice %29 {offsets = [0, 32], sizes = [8, 32], strides = [1, 1]} : vector<8x96xf32> to vector<8x32xf32>
    %34 = vector.extract_strided_slice %29 {offsets = [0, 64], sizes = [8, 32], strides = [1, 1]} : vector<8x96xf32> to vector<8x32xf32>
    %35 = arith.mulf %33, %20 : vector<8x32xf32>
    %36 = arith.mulf %32, %31 : vector<8x32xf32>
    %37 = arith.addf %35, %36 : vector<8x32xf32>
    %38 = math.tanh %37 : vector<8x32xf32>
    %39 = arith.mulf %34, %38 : vector<8x32xf32>
    %40 = vector.extract_strided_slice %17 {offsets = [8, 0], sizes = [8, 128], strides = [1, 1]} : vector<56x128xf32> to vector<8x128xf32>
    %cst_17 = arith.constant dense<0.000000e+00> : vector<8x128xf32>
    %41 = tpu.matmul %39, %18, %cst_17 {dimension_numbers = #tpu.dot_dimension_numbers<[1], [0], [0], [1], [0, 0, 1, 1], [], []>} : vector<8x32xf32>, vector<32x128xf32>, vector<8x128xf32> -> vector<8x128xf32>
    %42 = arith.addf %40, %41 : vector<8x128xf32>
    %43 = vector.extract_strided_slice %42 {offsets = [0, 0], sizes = [8, 96], strides = [1, 1]} : vector<8x128xf32> to vector<8x96xf32>
    %44 = arith.negf %43 : vector<8x96xf32>
    %45 = math.exp %44 : vector<8x96xf32>
    %cst_18 = arith.constant 1.000000e+00 : f32
    %46 = vector.broadcast %cst_18 : f32 to vector<8x96xf32>
    %47 = arith.addf %46, %45 : vector<8x96xf32>
    %48 = arith.divf %46, %47 : vector<8x96xf32>
    %49 = vector.extract_strided_slice %42 {offsets = [0, 96], sizes = [8, 32], strides = [1, 1]} : vector<8x128xf32> to vector<8x32xf32>
    %50 = math.tanh %49 : vector<8x32xf32>
    %51 = vector.extract_strided_slice %48 {offsets = [0, 0], sizes = [8, 32], strides = [1, 1]} : vector<8x96xf32> to vector<8x32xf32>
    %52 = vector.extract_strided_slice %48 {offsets = [0, 32], sizes = [8, 32], strides = [1, 1]} : vector<8x96xf32> to vector<8x32xf32>
    %53 = vector.extract_strided_slice %48 {offsets = [0, 64], sizes = [8, 32], strides = [1, 1]} : vector<8x96xf32> to vector<8x32xf32>
    %54 = arith.mulf %52, %37 : vector<8x32xf32>
    %55 = arith.mulf %51, %50 : vector<8x32xf32>
    %56 = arith.addf %54, %55 : vector<8x32xf32>
    %57 = math.tanh %56 : vector<8x32xf32>
    %58 = arith.mulf %53, %57 : vector<8x32xf32>
    %59 = vector.extract_strided_slice %17 {offsets = [16, 0], sizes = [8, 128], strides = [1, 1]} : vector<56x128xf32> to vector<8x128xf32>
    %cst_19 = arith.constant dense<0.000000e+00> : vector<8x128xf32>
    %60 = tpu.matmul %58, %18, %cst_19 {dimension_numbers = #tpu.dot_dimension_numbers<[1], [0], [0], [1], [0, 0, 1, 1], [], []>} : vector<8x32xf32>, vector<32x128xf32>, vector<8x128xf32> -> vector<8x128xf32>
    %61 = arith.addf %59, %60 : vector<8x128xf32>
    %62 = vector.extract_strided_slice %61 {offsets = [0, 0], sizes = [8, 96], strides = [1, 1]} : vector<8x128xf32> to vector<8x96xf32>
    %63 = arith.negf %62 : vector<8x96xf32>
    %64 = math.exp %63 : vector<8x96xf32>
    %cst_20 = arith.constant 1.000000e+00 : f32
    %65 = vector.broadcast %cst_20 : f32 to vector<8x96xf32>
    %66 = arith.addf %65, %64 : vector<8x96xf32>
    %67 = arith.divf %65, %66 : vector<8x96xf32>
    %68 = vector.extract_strided_slice %61 {offsets = [0, 96], sizes = [8, 32], strides = [1, 1]} : vector<8x128xf32> to vector<8x32xf32>
    %69 = math.tanh %68 : vector<8x32xf32>
    %70 = vector.extract_strided_slice %67 {offsets = [0, 0], sizes = [8, 32], strides = [1, 1]} : vector<8x96xf32> to vector<8x32xf32>
    %71 = vector.extract_strided_slice %67 {offsets = [0, 32], sizes = [8, 32], strides = [1, 1]} : vector<8x96xf32> to vector<8x32xf32>
    %72 = vector.extract_strided_slice %67 {offsets = [0, 64], sizes = [8, 32], strides = [1, 1]} : vector<8x96xf32> to vector<8x32xf32>
    %73 = arith.mulf %71, %56 : vector<8x32xf32>
    %74 = arith.mulf %70, %69 : vector<8x32xf32>
    %75 = arith.addf %73, %74 : vector<8x32xf32>
    %76 = math.tanh %75 : vector<8x32xf32>
    %77 = arith.mulf %72, %76 : vector<8x32xf32>
    %78 = vector.extract_strided_slice %17 {offsets = [24, 0], sizes = [8, 128], strides = [1, 1]} : vector<56x128xf32> to vector<8x128xf32>
    %cst_21 = arith.constant dense<0.000000e+00> : vector<8x128xf32>
    %79 = tpu.matmul %77, %18, %cst_21 {dimension_numbers = #tpu.dot_dimension_numbers<[1], [0], [0], [1], [0, 0, 1, 1], [], []>} : vector<8x32xf32>, vector<32x128xf32>, vector<8x128xf32> -> vector<8x128xf32>
    %80 = arith.addf %78, %79 : vector<8x128xf32>
    %81 = vector.extract_strided_slice %80 {offsets = [0, 0], sizes = [8, 96], strides = [1, 1]} : vector<8x128xf32> to vector<8x96xf32>
    %82 = arith.negf %81 : vector<8x96xf32>
    %83 = math.exp %82 : vector<8x96xf32>
    %cst_22 = arith.constant 1.000000e+00 : f32
    %84 = vector.broadcast %cst_22 : f32 to vector<8x96xf32>
    %85 = arith.addf %84, %83 : vector<8x96xf32>
    %86 = arith.divf %84, %85 : vector<8x96xf32>
    %87 = vector.extract_strided_slice %80 {offsets = [0, 96], sizes = [8, 32], strides = [1, 1]} : vector<8x128xf32> to vector<8x32xf32>
    %88 = math.tanh %87 : vector<8x32xf32>
    %89 = vector.extract_strided_slice %86 {offsets = [0, 0], sizes = [8, 32], strides = [1, 1]} : vector<8x96xf32> to vector<8x32xf32>
    %90 = vector.extract_strided_slice %86 {offsets = [0, 32], sizes = [8, 32], strides = [1, 1]} : vector<8x96xf32> to vector<8x32xf32>
    %91 = vector.extract_strided_slice %86 {offsets = [0, 64], sizes = [8, 32], strides = [1, 1]} : vector<8x96xf32> to vector<8x32xf32>
    %92 = arith.mulf %90, %75 : vector<8x32xf32>
    %93 = arith.mulf %89, %88 : vector<8x32xf32>
    %94 = arith.addf %92, %93 : vector<8x32xf32>
    %95 = math.tanh %94 : vector<8x32xf32>
    %96 = arith.mulf %91, %95 : vector<8x32xf32>
    %97 = vector.extract_strided_slice %17 {offsets = [32, 0], sizes = [8, 128], strides = [1, 1]} : vector<56x128xf32> to vector<8x128xf32>
    %cst_23 = arith.constant dense<0.000000e+00> : vector<8x128xf32>
    %98 = tpu.matmul %96, %18, %cst_23 {dimension_numbers = #tpu.dot_dimension_numbers<[1], [0], [0], [1], [0, 0, 1, 1], [], []>} : vector<8x32xf32>, vector<32x128xf32>, vector<8x128xf32> -> vector<8x128xf32>
    %99 = arith.addf %97, %98 : vector<8x128xf32>
    %100 = vector.extract_strided_slice %99 {offsets = [0, 0], sizes = [8, 96], strides = [1, 1]} : vector<8x128xf32> to vector<8x96xf32>
    %101 = arith.negf %100 : vector<8x96xf32>
    %102 = math.exp %101 : vector<8x96xf32>
    %cst_24 = arith.constant 1.000000e+00 : f32
    %103 = vector.broadcast %cst_24 : f32 to vector<8x96xf32>
    %104 = arith.addf %103, %102 : vector<8x96xf32>
    %105 = arith.divf %103, %104 : vector<8x96xf32>
    %106 = vector.extract_strided_slice %99 {offsets = [0, 96], sizes = [8, 32], strides = [1, 1]} : vector<8x128xf32> to vector<8x32xf32>
    %107 = math.tanh %106 : vector<8x32xf32>
    %108 = vector.extract_strided_slice %105 {offsets = [0, 0], sizes = [8, 32], strides = [1, 1]} : vector<8x96xf32> to vector<8x32xf32>
    %109 = vector.extract_strided_slice %105 {offsets = [0, 32], sizes = [8, 32], strides = [1, 1]} : vector<8x96xf32> to vector<8x32xf32>
    %110 = vector.extract_strided_slice %105 {offsets = [0, 64], sizes = [8, 32], strides = [1, 1]} : vector<8x96xf32> to vector<8x32xf32>
    %111 = arith.mulf %109, %94 : vector<8x32xf32>
    %112 = arith.mulf %108, %107 : vector<8x32xf32>
    %113 = arith.addf %111, %112 : vector<8x32xf32>
    %114 = math.tanh %113 : vector<8x32xf32>
    %115 = arith.mulf %110, %114 : vector<8x32xf32>
    %116 = vector.extract_strided_slice %17 {offsets = [40, 0], sizes = [8, 128], strides = [1, 1]} : vector<56x128xf32> to vector<8x128xf32>
    %cst_25 = arith.constant dense<0.000000e+00> : vector<8x128xf32>
    %117 = tpu.matmul %115, %18, %cst_25 {dimension_numbers = #tpu.dot_dimension_numbers<[1], [0], [0], [1], [0, 0, 1, 1], [], []>} : vector<8x32xf32>, vector<32x128xf32>, vector<8x128xf32> -> vector<8x128xf32>
    %118 = arith.addf %116, %117 : vector<8x128xf32>
    %119 = vector.extract_strided_slice %118 {offsets = [0, 0], sizes = [8, 96], strides = [1, 1]} : vector<8x128xf32> to vector<8x96xf32>
    %120 = arith.negf %119 : vector<8x96xf32>
    %121 = math.exp %120 : vector<8x96xf32>
    %cst_26 = arith.constant 1.000000e+00 : f32
    %122 = vector.broadcast %cst_26 : f32 to vector<8x96xf32>
    %123 = arith.addf %122, %121 : vector<8x96xf32>
    %124 = arith.divf %122, %123 : vector<8x96xf32>
    %125 = vector.extract_strided_slice %118 {offsets = [0, 96], sizes = [8, 32], strides = [1, 1]} : vector<8x128xf32> to vector<8x32xf32>
    %126 = math.tanh %125 : vector<8x32xf32>
    %127 = vector.extract_strided_slice %124 {offsets = [0, 0], sizes = [8, 32], strides = [1, 1]} : vector<8x96xf32> to vector<8x32xf32>
    %128 = vector.extract_strided_slice %124 {offsets = [0, 32], sizes = [8, 32], strides = [1, 1]} : vector<8x96xf32> to vector<8x32xf32>
    %129 = vector.extract_strided_slice %124 {offsets = [0, 64], sizes = [8, 32], strides = [1, 1]} : vector<8x96xf32> to vector<8x32xf32>
    %130 = arith.mulf %128, %113 : vector<8x32xf32>
    %131 = arith.mulf %127, %126 : vector<8x32xf32>
    %132 = arith.addf %130, %131 : vector<8x32xf32>
    %133 = math.tanh %132 : vector<8x32xf32>
    %134 = arith.mulf %129, %133 : vector<8x32xf32>
    %135 = vector.extract_strided_slice %17 {offsets = [48, 0], sizes = [8, 128], strides = [1, 1]} : vector<56x128xf32> to vector<8x128xf32>
    %cst_27 = arith.constant dense<0.000000e+00> : vector<8x128xf32>
    %136 = tpu.matmul %134, %18, %cst_27 {dimension_numbers = #tpu.dot_dimension_numbers<[1], [0], [0], [1], [0, 0, 1, 1], [], []>} : vector<8x32xf32>, vector<32x128xf32>, vector<8x128xf32> -> vector<8x128xf32>
    %137 = arith.addf %135, %136 : vector<8x128xf32>
    %138 = vector.extract_strided_slice %137 {offsets = [0, 0], sizes = [8, 96], strides = [1, 1]} : vector<8x128xf32> to vector<8x96xf32>
    %139 = arith.negf %138 : vector<8x96xf32>
    %140 = math.exp %139 : vector<8x96xf32>
    %cst_28 = arith.constant 1.000000e+00 : f32
    %141 = vector.broadcast %cst_28 : f32 to vector<8x96xf32>
    %142 = arith.addf %141, %140 : vector<8x96xf32>
    %143 = arith.divf %141, %142 : vector<8x96xf32>
    %144 = vector.extract_strided_slice %137 {offsets = [0, 96], sizes = [8, 32], strides = [1, 1]} : vector<8x128xf32> to vector<8x32xf32>
    %145 = math.tanh %144 : vector<8x32xf32>
    %146 = vector.extract_strided_slice %143 {offsets = [0, 0], sizes = [8, 32], strides = [1, 1]} : vector<8x96xf32> to vector<8x32xf32>
    %147 = vector.extract_strided_slice %143 {offsets = [0, 32], sizes = [8, 32], strides = [1, 1]} : vector<8x96xf32> to vector<8x32xf32>
    %148 = vector.extract_strided_slice %143 {offsets = [0, 64], sizes = [8, 32], strides = [1, 1]} : vector<8x96xf32> to vector<8x32xf32>
    %149 = arith.mulf %147, %132 : vector<8x32xf32>
    %150 = arith.mulf %146, %145 : vector<8x32xf32>
    %151 = arith.addf %149, %150 : vector<8x32xf32>
    %152 = math.tanh %151 : vector<8x32xf32>
    %153 = arith.mulf %148, %152 : vector<8x32xf32>
    %154 = tpu.concatenate %39, %58, %77, %96, %115, %134, %153 in 0 : vector<8x32xf32>, vector<8x32xf32>, vector<8x32xf32>, vector<8x32xf32>, vector<8x32xf32>, vector<8x32xf32>, vector<8x32xf32> -> vector<56x32xf32>
    %c0_29 = arith.constant 0 : index
    %c0_30 = arith.constant 0 : index
    %155 = vector.load %arg6[%c0_29, %c0_30] : memref<32x128xf32, #tpu.memory_space<vmem>>, vector<32x128xf32>
    %cst_31 = arith.constant dense<0.000000e+00> : vector<56x128xf32>
    %156 = tpu.matmul %154, %155, %cst_31 {dimension_numbers = #tpu.dot_dimension_numbers<[1], [0], [0], [1], [0, 0, 1, 1], [], []>} : vector<56x32xf32>, vector<32x128xf32>, vector<56x128xf32> -> vector<56x128xf32>
    %c0_32 = arith.constant 0 : index
    %c0_33 = arith.constant 0 : index
    %157 = vector.load %arg8[%c0_32, %c0_33] : memref<1x128xf32, #tpu.memory_space<vmem>>, vector<1x128xf32>
    %158 = vector.broadcast %157 : vector<1x128xf32> to vector<56x128xf32>
    %159 = arith.addf %156, %158 : vector<56x128xf32>
    %c0_34 = arith.constant 0 : index
    %c0_35 = arith.constant 0 : index
    %160 = vector.load %arg7[%c0_34, %c0_35] : memref<32x128xf32, #tpu.memory_space<vmem>>, vector<32x128xf32>
    %cst_36 = arith.constant 0.000000e+00 : f32
    %161 = vector.broadcast %cst_36 : f32 to vector<8x32xf32>
    %cst_37 = arith.constant 0.000000e+00 : f32
    %162 = vector.broadcast %cst_37 : f32 to vector<8x32xf32>
    %163 = vector.extract_strided_slice %159 {offsets = [0, 0], sizes = [8, 128], strides = [1, 1]} : vector<56x128xf32> to vector<8x128xf32>
    %cst_38 = arith.constant dense<0.000000e+00> : vector<8x128xf32>
    %164 = tpu.matmul %161, %160, %cst_38 {dimension_numbers = #tpu.dot_dimension_numbers<[1], [0], [0], [1], [0, 0, 1, 1], [], []>} : vector<8x32xf32>, vector<32x128xf32>, vector<8x128xf32> -> vector<8x128xf32>
    %165 = arith.addf %163, %164 : vector<8x128xf32>
    %166 = vector.extract_strided_slice %165 {offsets = [0, 0], sizes = [8, 96], strides = [1, 1]} : vector<8x128xf32> to vector<8x96xf32>
    %167 = arith.negf %166 : vector<8x96xf32>
    %168 = math.exp %167 : vector<8x96xf32>
    %cst_39 = arith.constant 1.000000e+00 : f32
    %169 = vector.broadcast %cst_39 : f32 to vector<8x96xf32>
    %170 = arith.addf %169, %168 : vector<8x96xf32>
    %171 = arith.divf %169, %170 : vector<8x96xf32>
    %172 = vector.extract_strided_slice %165 {offsets = [0, 96], sizes = [8, 32], strides = [1, 1]} : vector<8x128xf32> to vector<8x32xf32>
    %173 = math.tanh %172 : vector<8x32xf32>
    %174 = vector.extract_strided_slice %171 {offsets = [0, 0], sizes = [8, 32], strides = [1, 1]} : vector<8x96xf32> to vector<8x32xf32>
    %175 = vector.extract_strided_slice %171 {offsets = [0, 32], sizes = [8, 32], strides = [1, 1]} : vector<8x96xf32> to vector<8x32xf32>
    %176 = vector.extract_strided_slice %171 {offsets = [0, 64], sizes = [8, 32], strides = [1, 1]} : vector<8x96xf32> to vector<8x32xf32>
    %177 = arith.mulf %175, %162 : vector<8x32xf32>
    %178 = arith.mulf %174, %173 : vector<8x32xf32>
    %179 = arith.addf %177, %178 : vector<8x32xf32>
    %180 = math.tanh %179 : vector<8x32xf32>
    %181 = arith.mulf %176, %180 : vector<8x32xf32>
    %182 = vector.extract_strided_slice %159 {offsets = [8, 0], sizes = [8, 128], strides = [1, 1]} : vector<56x128xf32> to vector<8x128xf32>
    %cst_40 = arith.constant dense<0.000000e+00> : vector<8x128xf32>
    %183 = tpu.matmul %181, %160, %cst_40 {dimension_numbers = #tpu.dot_dimension_numbers<[1], [0], [0], [1], [0, 0, 1, 1], [], []>} : vector<8x32xf32>, vector<32x128xf32>, vector<8x128xf32> -> vector<8x128xf32>
    %184 = arith.addf %182, %183 : vector<8x128xf32>
    %185 = vector.extract_strided_slice %184 {offsets = [0, 0], sizes = [8, 96], strides = [1, 1]} : vector<8x128xf32> to vector<8x96xf32>
    %186 = arith.negf %185 : vector<8x96xf32>
    %187 = math.exp %186 : vector<8x96xf32>
    %cst_41 = arith.constant 1.000000e+00 : f32
    %188 = vector.broadcast %cst_41 : f32 to vector<8x96xf32>
    %189 = arith.addf %188, %187 : vector<8x96xf32>
    %190 = arith.divf %188, %189 : vector<8x96xf32>
    %191 = vector.extract_strided_slice %184 {offsets = [0, 96], sizes = [8, 32], strides = [1, 1]} : vector<8x128xf32> to vector<8x32xf32>
    %192 = math.tanh %191 : vector<8x32xf32>
    %193 = vector.extract_strided_slice %190 {offsets = [0, 0], sizes = [8, 32], strides = [1, 1]} : vector<8x96xf32> to vector<8x32xf32>
    %194 = vector.extract_strided_slice %190 {offsets = [0, 32], sizes = [8, 32], strides = [1, 1]} : vector<8x96xf32> to vector<8x32xf32>
    %195 = vector.extract_strided_slice %190 {offsets = [0, 64], sizes = [8, 32], strides = [1, 1]} : vector<8x96xf32> to vector<8x32xf32>
    %196 = arith.mulf %194, %179 : vector<8x32xf32>
    %197 = arith.mulf %193, %192 : vector<8x32xf32>
    %198 = arith.addf %196, %197 : vector<8x32xf32>
    %199 = math.tanh %198 : vector<8x32xf32>
    %200 = arith.mulf %195, %199 : vector<8x32xf32>
    %201 = vector.extract_strided_slice %159 {offsets = [16, 0], sizes = [8, 128], strides = [1, 1]} : vector<56x128xf32> to vector<8x128xf32>
    %cst_42 = arith.constant dense<0.000000e+00> : vector<8x128xf32>
    %202 = tpu.matmul %200, %160, %cst_42 {dimension_numbers = #tpu.dot_dimension_numbers<[1], [0], [0], [1], [0, 0, 1, 1], [], []>} : vector<8x32xf32>, vector<32x128xf32>, vector<8x128xf32> -> vector<8x128xf32>
    %203 = arith.addf %201, %202 : vector<8x128xf32>
    %204 = vector.extract_strided_slice %203 {offsets = [0, 0], sizes = [8, 96], strides = [1, 1]} : vector<8x128xf32> to vector<8x96xf32>
    %205 = arith.negf %204 : vector<8x96xf32>
    %206 = math.exp %205 : vector<8x96xf32>
    %cst_43 = arith.constant 1.000000e+00 : f32
    %207 = vector.broadcast %cst_43 : f32 to vector<8x96xf32>
    %208 = arith.addf %207, %206 : vector<8x96xf32>
    %209 = arith.divf %207, %208 : vector<8x96xf32>
    %210 = vector.extract_strided_slice %203 {offsets = [0, 96], sizes = [8, 32], strides = [1, 1]} : vector<8x128xf32> to vector<8x32xf32>
    %211 = math.tanh %210 : vector<8x32xf32>
    %212 = vector.extract_strided_slice %209 {offsets = [0, 0], sizes = [8, 32], strides = [1, 1]} : vector<8x96xf32> to vector<8x32xf32>
    %213 = vector.extract_strided_slice %209 {offsets = [0, 32], sizes = [8, 32], strides = [1, 1]} : vector<8x96xf32> to vector<8x32xf32>
    %214 = vector.extract_strided_slice %209 {offsets = [0, 64], sizes = [8, 32], strides = [1, 1]} : vector<8x96xf32> to vector<8x32xf32>
    %215 = arith.mulf %213, %198 : vector<8x32xf32>
    %216 = arith.mulf %212, %211 : vector<8x32xf32>
    %217 = arith.addf %215, %216 : vector<8x32xf32>
    %218 = math.tanh %217 : vector<8x32xf32>
    %219 = arith.mulf %214, %218 : vector<8x32xf32>
    %220 = vector.extract_strided_slice %159 {offsets = [24, 0], sizes = [8, 128], strides = [1, 1]} : vector<56x128xf32> to vector<8x128xf32>
    %cst_44 = arith.constant dense<0.000000e+00> : vector<8x128xf32>
    %221 = tpu.matmul %219, %160, %cst_44 {dimension_numbers = #tpu.dot_dimension_numbers<[1], [0], [0], [1], [0, 0, 1, 1], [], []>} : vector<8x32xf32>, vector<32x128xf32>, vector<8x128xf32> -> vector<8x128xf32>
    %222 = arith.addf %220, %221 : vector<8x128xf32>
    %223 = vector.extract_strided_slice %222 {offsets = [0, 0], sizes = [8, 96], strides = [1, 1]} : vector<8x128xf32> to vector<8x96xf32>
    %224 = arith.negf %223 : vector<8x96xf32>
    %225 = math.exp %224 : vector<8x96xf32>
    %cst_45 = arith.constant 1.000000e+00 : f32
    %226 = vector.broadcast %cst_45 : f32 to vector<8x96xf32>
    %227 = arith.addf %226, %225 : vector<8x96xf32>
    %228 = arith.divf %226, %227 : vector<8x96xf32>
    %229 = vector.extract_strided_slice %222 {offsets = [0, 96], sizes = [8, 32], strides = [1, 1]} : vector<8x128xf32> to vector<8x32xf32>
    %230 = math.tanh %229 : vector<8x32xf32>
    %231 = vector.extract_strided_slice %228 {offsets = [0, 0], sizes = [8, 32], strides = [1, 1]} : vector<8x96xf32> to vector<8x32xf32>
    %232 = vector.extract_strided_slice %228 {offsets = [0, 32], sizes = [8, 32], strides = [1, 1]} : vector<8x96xf32> to vector<8x32xf32>
    %233 = vector.extract_strided_slice %228 {offsets = [0, 64], sizes = [8, 32], strides = [1, 1]} : vector<8x96xf32> to vector<8x32xf32>
    %234 = arith.mulf %232, %217 : vector<8x32xf32>
    %235 = arith.mulf %231, %230 : vector<8x32xf32>
    %236 = arith.addf %234, %235 : vector<8x32xf32>
    %237 = math.tanh %236 : vector<8x32xf32>
    %238 = arith.mulf %233, %237 : vector<8x32xf32>
    %239 = vector.extract_strided_slice %159 {offsets = [32, 0], sizes = [8, 128], strides = [1, 1]} : vector<56x128xf32> to vector<8x128xf32>
    %cst_46 = arith.constant dense<0.000000e+00> : vector<8x128xf32>
    %240 = tpu.matmul %238, %160, %cst_46 {dimension_numbers = #tpu.dot_dimension_numbers<[1], [0], [0], [1], [0, 0, 1, 1], [], []>} : vector<8x32xf32>, vector<32x128xf32>, vector<8x128xf32> -> vector<8x128xf32>
    %241 = arith.addf %239, %240 : vector<8x128xf32>
    %242 = vector.extract_strided_slice %241 {offsets = [0, 0], sizes = [8, 96], strides = [1, 1]} : vector<8x128xf32> to vector<8x96xf32>
    %243 = arith.negf %242 : vector<8x96xf32>
    %244 = math.exp %243 : vector<8x96xf32>
    %cst_47 = arith.constant 1.000000e+00 : f32
    %245 = vector.broadcast %cst_47 : f32 to vector<8x96xf32>
    %246 = arith.addf %245, %244 : vector<8x96xf32>
    %247 = arith.divf %245, %246 : vector<8x96xf32>
    %248 = vector.extract_strided_slice %241 {offsets = [0, 96], sizes = [8, 32], strides = [1, 1]} : vector<8x128xf32> to vector<8x32xf32>
    %249 = math.tanh %248 : vector<8x32xf32>
    %250 = vector.extract_strided_slice %247 {offsets = [0, 0], sizes = [8, 32], strides = [1, 1]} : vector<8x96xf32> to vector<8x32xf32>
    %251 = vector.extract_strided_slice %247 {offsets = [0, 32], sizes = [8, 32], strides = [1, 1]} : vector<8x96xf32> to vector<8x32xf32>
    %252 = vector.extract_strided_slice %247 {offsets = [0, 64], sizes = [8, 32], strides = [1, 1]} : vector<8x96xf32> to vector<8x32xf32>
    %253 = arith.mulf %251, %236 : vector<8x32xf32>
    %254 = arith.mulf %250, %249 : vector<8x32xf32>
    %255 = arith.addf %253, %254 : vector<8x32xf32>
    %256 = math.tanh %255 : vector<8x32xf32>
    %257 = arith.mulf %252, %256 : vector<8x32xf32>
    %258 = vector.extract_strided_slice %159 {offsets = [40, 0], sizes = [8, 128], strides = [1, 1]} : vector<56x128xf32> to vector<8x128xf32>
    %cst_48 = arith.constant dense<0.000000e+00> : vector<8x128xf32>
    %259 = tpu.matmul %257, %160, %cst_48 {dimension_numbers = #tpu.dot_dimension_numbers<[1], [0], [0], [1], [0, 0, 1, 1], [], []>} : vector<8x32xf32>, vector<32x128xf32>, vector<8x128xf32> -> vector<8x128xf32>
    %260 = arith.addf %258, %259 : vector<8x128xf32>
    %261 = vector.extract_strided_slice %260 {offsets = [0, 0], sizes = [8, 96], strides = [1, 1]} : vector<8x128xf32> to vector<8x96xf32>
    %262 = arith.negf %261 : vector<8x96xf32>
    %263 = math.exp %262 : vector<8x96xf32>
    %cst_49 = arith.constant 1.000000e+00 : f32
    %264 = vector.broadcast %cst_49 : f32 to vector<8x96xf32>
    %265 = arith.addf %264, %263 : vector<8x96xf32>
    %266 = arith.divf %264, %265 : vector<8x96xf32>
    %267 = vector.extract_strided_slice %260 {offsets = [0, 96], sizes = [8, 32], strides = [1, 1]} : vector<8x128xf32> to vector<8x32xf32>
    %268 = math.tanh %267 : vector<8x32xf32>
    %269 = vector.extract_strided_slice %266 {offsets = [0, 0], sizes = [8, 32], strides = [1, 1]} : vector<8x96xf32> to vector<8x32xf32>
    %270 = vector.extract_strided_slice %266 {offsets = [0, 32], sizes = [8, 32], strides = [1, 1]} : vector<8x96xf32> to vector<8x32xf32>
    %271 = vector.extract_strided_slice %266 {offsets = [0, 64], sizes = [8, 32], strides = [1, 1]} : vector<8x96xf32> to vector<8x32xf32>
    %272 = arith.mulf %270, %255 : vector<8x32xf32>
    %273 = arith.mulf %269, %268 : vector<8x32xf32>
    %274 = arith.addf %272, %273 : vector<8x32xf32>
    %275 = math.tanh %274 : vector<8x32xf32>
    %276 = arith.mulf %271, %275 : vector<8x32xf32>
    %277 = vector.extract_strided_slice %159 {offsets = [48, 0], sizes = [8, 128], strides = [1, 1]} : vector<56x128xf32> to vector<8x128xf32>
    %cst_50 = arith.constant dense<0.000000e+00> : vector<8x128xf32>
    %278 = tpu.matmul %276, %160, %cst_50 {dimension_numbers = #tpu.dot_dimension_numbers<[1], [0], [0], [1], [0, 0, 1, 1], [], []>} : vector<8x32xf32>, vector<32x128xf32>, vector<8x128xf32> -> vector<8x128xf32>
    %279 = arith.addf %277, %278 : vector<8x128xf32>
    %280 = vector.extract_strided_slice %279 {offsets = [0, 0], sizes = [8, 96], strides = [1, 1]} : vector<8x128xf32> to vector<8x96xf32>
    %281 = arith.negf %280 : vector<8x96xf32>
    %282 = math.exp %281 : vector<8x96xf32>
    %cst_51 = arith.constant 1.000000e+00 : f32
    %283 = vector.broadcast %cst_51 : f32 to vector<8x96xf32>
    %284 = arith.addf %283, %282 : vector<8x96xf32>
    %285 = arith.divf %283, %284 : vector<8x96xf32>
    %286 = vector.extract_strided_slice %279 {offsets = [0, 96], sizes = [8, 32], strides = [1, 1]} : vector<8x128xf32> to vector<8x32xf32>
    %287 = math.tanh %286 : vector<8x32xf32>
    %288 = vector.extract_strided_slice %285 {offsets = [0, 0], sizes = [8, 32], strides = [1, 1]} : vector<8x96xf32> to vector<8x32xf32>
    %289 = vector.extract_strided_slice %285 {offsets = [0, 32], sizes = [8, 32], strides = [1, 1]} : vector<8x96xf32> to vector<8x32xf32>
    %290 = vector.extract_strided_slice %285 {offsets = [0, 64], sizes = [8, 32], strides = [1, 1]} : vector<8x96xf32> to vector<8x32xf32>
    %291 = arith.mulf %289, %274 : vector<8x32xf32>
    %292 = arith.mulf %288, %287 : vector<8x32xf32>
    %293 = arith.addf %291, %292 : vector<8x32xf32>
    %294 = math.tanh %293 : vector<8x32xf32>
    %295 = arith.mulf %290, %294 : vector<8x32xf32>
    %296 = tpu.concatenate %181, %200, %219, %238, %257, %276, %295 in 0 : vector<8x32xf32>, vector<8x32xf32>, vector<8x32xf32>, vector<8x32xf32>, vector<8x32xf32>, vector<8x32xf32>, vector<8x32xf32> -> vector<56x32xf32>
    %c0_52 = arith.constant 0 : index
    %c0_53 = arith.constant 0 : index
    %297 = vector.load %arg9[%c0_52, %c0_53] : memref<32x96xf32, #tpu.memory_space<vmem>>, vector<32x96xf32>
    %cst_54 = arith.constant dense<0.000000e+00> : vector<56x96xf32>
    %298 = tpu.matmul %296, %297, %cst_54 {dimension_numbers = #tpu.dot_dimension_numbers<[1], [0], [0], [1], [0, 0, 1, 1], [], []>} : vector<56x32xf32>, vector<32x96xf32>, vector<56x96xf32> -> vector<56x96xf32>
    %c0_55 = arith.constant 0 : index
    %c0_56 = arith.constant 0 : index
    %299 = vector.load %arg10[%c0_55, %c0_56] : memref<1x96xf32, #tpu.memory_space<vmem>>, vector<1x96xf32>
    %300 = vector.broadcast %299 : vector<1x96xf32> to vector<56x96xf32>
    %301 = arith.addf %298, %300 : vector<56x96xf32>
    %302 = vector.extract_strided_slice %301 {offsets = [0, 0], sizes = [56, 8], strides = [1, 1]} : vector<56x96xf32> to vector<56x8xf32>
    %303 = vector.extract_strided_slice %301 {offsets = [0, 32], sizes = [56, 8], strides = [1, 1]} : vector<56x96xf32> to vector<56x8xf32>
    %cst_57 = arith.constant dense<0.000000e+00> : vector<56x56xf32>
    %304 = tpu.matmul %302, %303, %cst_57 {dimension_numbers = #tpu.dot_dimension_numbers<[1], [1], [0], [0], [0, 0, 1, 0], [], []>} : vector<56x8xf32>, vector<56x8xf32>, vector<56x56xf32> -> vector<56x56xf32>
    %305 = vector.extract_strided_slice %301 {offsets = [0, 8], sizes = [56, 8], strides = [1, 1]} : vector<56x96xf32> to vector<56x8xf32>
    %306 = vector.extract_strided_slice %301 {offsets = [0, 40], sizes = [56, 8], strides = [1, 1]} : vector<56x96xf32> to vector<56x8xf32>
    %cst_58 = arith.constant dense<0.000000e+00> : vector<56x56xf32>
    %307 = tpu.matmul %305, %306, %cst_58 {dimension_numbers = #tpu.dot_dimension_numbers<[1], [1], [0], [0], [0, 0, 1, 0], [], []>} : vector<56x8xf32>, vector<56x8xf32>, vector<56x56xf32> -> vector<56x56xf32>
    %308 = vector.extract_strided_slice %301 {offsets = [0, 16], sizes = [56, 8], strides = [1, 1]} : vector<56x96xf32> to vector<56x8xf32>
    %309 = vector.extract_strided_slice %301 {offsets = [0, 48], sizes = [56, 8], strides = [1, 1]} : vector<56x96xf32> to vector<56x8xf32>
    %cst_59 = arith.constant dense<0.000000e+00> : vector<56x56xf32>
    %310 = tpu.matmul %308, %309, %cst_59 {dimension_numbers = #tpu.dot_dimension_numbers<[1], [1], [0], [0], [0, 0, 1, 0], [], []>} : vector<56x8xf32>, vector<56x8xf32>, vector<56x56xf32> -> vector<56x56xf32>
    %311 = vector.extract_strided_slice %301 {offsets = [0, 24], sizes = [56, 8], strides = [1, 1]} : vector<56x96xf32> to vector<56x8xf32>
    %312 = vector.extract_strided_slice %301 {offsets = [0, 56], sizes = [56, 8], strides = [1, 1]} : vector<56x96xf32> to vector<56x8xf32>
    %cst_60 = arith.constant dense<0.000000e+00> : vector<56x56xf32>
    %313 = tpu.matmul %311, %312, %cst_60 {dimension_numbers = #tpu.dot_dimension_numbers<[1], [1], [0], [0], [0, 0, 1, 0], [], []>} : vector<56x8xf32>, vector<56x8xf32>, vector<56x56xf32> -> vector<56x56xf32>
    %314 = vector.shape_cast %304 : vector<56x56xf32> to vector<1x56x56xf32>
    %315 = vector.shape_cast %307 : vector<56x56xf32> to vector<1x56x56xf32>
    %316 = vector.shape_cast %310 : vector<56x56xf32> to vector<1x56x56xf32>
    %317 = vector.shape_cast %313 : vector<56x56xf32> to vector<1x56x56xf32>
    %318 = tpu.concatenate %314, %315, %316, %317 in 0 : vector<1x56x56xf32>, vector<1x56x56xf32>, vector<1x56x56xf32>, vector<1x56x56xf32> -> vector<4x56x56xf32>
    %c0_61 = arith.constant 0 : index
    %c0_62 = arith.constant 0 : index
    %319 = vector.load %arg13[%c0_61, %c0_62] : memref<56x56xf32, #tpu.memory_space<vmem>>, vector<56x56xf32>
    %320 = vector.shape_cast %319 : vector<56x56xf32> to vector<1x56x56xf32>
    %321 = vector.broadcast %320 : vector<1x56x56xf32> to vector<4x56x56xf32>
    %322 = arith.addf %318, %321 : vector<4x56x56xf32>
    %cst_63 = arith.constant dense<0xFF800000> : vector<4x56xf32>
    %323 = vector.multi_reduction <maximumf>, %322, %cst_63 [2] : vector<4x56x56xf32> to vector<4x56xf32>
    %324 = vector.shape_cast %323 : vector<4x56xf32> to vector<4x56x1xf32>
    %325 = vector.broadcast %324 : vector<4x56x1xf32> to vector<4x56x56xf32>
    %326 = arith.subf %322, %325 : vector<4x56x56xf32>
    %327 = math.exp %326 : vector<4x56x56xf32>
    %cst_64 = arith.constant dense<0.000000e+00> : vector<4x56xf32>
    %328 = vector.multi_reduction <add>, %327, %cst_64 [2] : vector<4x56x56xf32> to vector<4x56xf32>
    %329 = vector.shape_cast %328 : vector<4x56xf32> to vector<4x56x1xf32>
    %330 = vector.broadcast %329 : vector<4x56x1xf32> to vector<4x56x56xf32>
    %331 = arith.divf %327, %330 : vector<4x56x56xf32>
    %332 = vector.extract_strided_slice %331 {offsets = [0, 0, 0], sizes = [1, 56, 56], strides = [1, 1, 1]} : vector<4x56x56xf32> to vector<1x56x56xf32>
    %333 = vector.shape_cast %332 : vector<1x56x56xf32> to vector<56x56xf32>
    %334 = vector.extract_strided_slice %331 {offsets = [1, 0, 0], sizes = [1, 56, 56], strides = [1, 1, 1]} : vector<4x56x56xf32> to vector<1x56x56xf32>
    %335 = vector.shape_cast %334 : vector<1x56x56xf32> to vector<56x56xf32>
    %336 = arith.addf %333, %335 : vector<56x56xf32>
    %337 = vector.extract_strided_slice %331 {offsets = [2, 0, 0], sizes = [1, 56, 56], strides = [1, 1, 1]} : vector<4x56x56xf32> to vector<1x56x56xf32>
    %338 = vector.shape_cast %337 : vector<1x56x56xf32> to vector<56x56xf32>
    %339 = arith.addf %336, %338 : vector<56x56xf32>
    %340 = vector.extract_strided_slice %331 {offsets = [3, 0, 0], sizes = [1, 56, 56], strides = [1, 1, 1]} : vector<4x56x56xf32> to vector<1x56x56xf32>
    %341 = vector.shape_cast %340 : vector<1x56x56xf32> to vector<56x56xf32>
    %342 = arith.addf %339, %341 : vector<56x56xf32>
    %cst_65 = arith.constant 2.500000e-01 : f32
    %343 = vector.broadcast %cst_65 : f32 to vector<56x56xf32>
    %344 = arith.mulf %342, %343 : vector<56x56xf32>
    %c0_66 = arith.constant 0 : index
    %c0_67 = arith.constant 0 : index
    %345 = vector.load %arg14[%c0_66, %c0_67] : memref<56x7xf32, #tpu.memory_space<vmem>>, vector<56x7xf32>
    %cst_68 = arith.constant dense<0.000000e+00> : vector<56x7xf32>
    %346 = tpu.matmul %344, %345, %cst_68 {dimension_numbers = #tpu.dot_dimension_numbers<[1], [0], [0], [1], [0, 0, 1, 1], [], []>} : vector<56x56xf32>, vector<56x7xf32>, vector<56x7xf32> -> vector<56x7xf32>
    %c0_69 = arith.constant 0 : index
    %c0_70 = arith.constant 0 : index
    %347 = vector.load %arg15[%c0_69, %c0_70] : memref<16x56xf32, #tpu.memory_space<vmem>>, vector<16x56xf32>
    %cst_71 = arith.constant dense<0.000000e+00> : vector<16x7xf32>
    %348 = tpu.matmul %347, %346, %cst_71 {dimension_numbers = #tpu.dot_dimension_numbers<[1], [0], [0], [1], [0, 0, 1, 1], [], []>} : vector<16x56xf32>, vector<56x7xf32>, vector<16x7xf32> -> vector<16x7xf32>
    %349 = vector.shape_cast %348 : vector<16x7xf32> to vector<2x8x7xf32>
    %350 = vector.extract_strided_slice %349 {offsets = [0, 0, 0], sizes = [2, 7, 7], strides = [1, 1, 1]} : vector<2x8x7xf32> to vector<2x7x7xf32>
    %c0_72 = arith.constant 0 : index
    %c0_73 = arith.constant 0 : index
    %c0_74 = arith.constant 0 : index
    %351 = vector.load %arg23[%c0_72, %c0_73, %c0_74] : memref<2x7x7xf32, #tpu.memory_space<vmem>>, vector<2x7x7xf32>
    tpu.vector_store %arg23[%c0_72, %c0_73, %c0_74], %350 {strides = array<i32>} : memref<2x7x7xf32, #tpu.memory_space<vmem>>, vector<2x7x7xf32>,
    %352 = vector.extract_strided_slice %301 {offsets = [0, 64], sizes = [56, 8], strides = [1, 1]} : vector<56x96xf32> to vector<56x8xf32>
    %353 = vector.extract_strided_slice %331 {offsets = [0, 48, 0], sizes = [1, 8, 56], strides = [1, 1, 1]} : vector<4x56x56xf32> to vector<1x8x56xf32>
    %354 = vector.shape_cast %353 : vector<1x8x56xf32> to vector<8x56xf32>
    %cst_75 = arith.constant dense<0.000000e+00> : vector<8x8xf32>
    %355 = tpu.matmul %354, %352, %cst_75 {dimension_numbers = #tpu.dot_dimension_numbers<[1], [0], [0], [1], [0, 0, 1, 1], [], []>} : vector<8x56xf32>, vector<56x8xf32>, vector<8x8xf32> -> vector<8x8xf32>
    %356 = vector.extract_strided_slice %301 {offsets = [0, 72], sizes = [56, 8], strides = [1, 1]} : vector<56x96xf32> to vector<56x8xf32>
    %357 = vector.extract_strided_slice %331 {offsets = [1, 48, 0], sizes = [1, 8, 56], strides = [1, 1, 1]} : vector<4x56x56xf32> to vector<1x8x56xf32>
    %358 = vector.shape_cast %357 : vector<1x8x56xf32> to vector<8x56xf32>
    %cst_76 = arith.constant dense<0.000000e+00> : vector<8x8xf32>
    %359 = tpu.matmul %358, %356, %cst_76 {dimension_numbers = #tpu.dot_dimension_numbers<[1], [0], [0], [1], [0, 0, 1, 1], [], []>} : vector<8x56xf32>, vector<56x8xf32>, vector<8x8xf32> -> vector<8x8xf32>
    %360 = vector.extract_strided_slice %301 {offsets = [0, 80], sizes = [56, 8], strides = [1, 1]} : vector<56x96xf32> to vector<56x8xf32>
    %361 = vector.extract_strided_slice %331 {offsets = [2, 48, 0], sizes = [1, 8, 56], strides = [1, 1, 1]} : vector<4x56x56xf32> to vector<1x8x56xf32>
    %362 = vector.shape_cast %361 : vector<1x8x56xf32> to vector<8x56xf32>
    %cst_77 = arith.constant dense<0.000000e+00> : vector<8x8xf32>
    %363 = tpu.matmul %362, %360, %cst_77 {dimension_numbers = #tpu.dot_dimension_numbers<[1], [0], [0], [1], [0, 0, 1, 1], [], []>} : vector<8x56xf32>, vector<56x8xf32>, vector<8x8xf32> -> vector<8x8xf32>
    %364 = vector.extract_strided_slice %301 {offsets = [0, 88], sizes = [56, 8], strides = [1, 1]} : vector<56x96xf32> to vector<56x8xf32>
    %365 = vector.extract_strided_slice %331 {offsets = [3, 48, 0], sizes = [1, 8, 56], strides = [1, 1, 1]} : vector<4x56x56xf32> to vector<1x8x56xf32>
    %366 = vector.shape_cast %365 : vector<1x8x56xf32> to vector<8x56xf32>
    %cst_78 = arith.constant dense<0.000000e+00> : vector<8x8xf32>
    %367 = tpu.matmul %366, %364, %cst_78 {dimension_numbers = #tpu.dot_dimension_numbers<[1], [0], [0], [1], [0, 0, 1, 1], [], []>} : vector<8x56xf32>, vector<56x8xf32>, vector<8x8xf32> -> vector<8x8xf32>
    %368 = tpu.concatenate %355, %359, %363, %367 in 1 : vector<8x8xf32>, vector<8x8xf32>, vector<8x8xf32>, vector<8x8xf32> -> vector<8x32xf32>
    %c0_79 = arith.constant 0 : index
    %c0_80 = arith.constant 0 : index
    %369 = vector.load %arg11[%c0_79, %c0_80] : memref<32x32xf32, #tpu.memory_space<vmem>>, vector<32x32xf32>
    %cst_81 = arith.constant dense<0.000000e+00> : vector<8x32xf32>
    %370 = tpu.matmul %368, %369, %cst_81 {dimension_numbers = #tpu.dot_dimension_numbers<[1], [0], [0], [1], [0, 0, 1, 1], [], []>} : vector<8x32xf32>, vector<32x32xf32>, vector<8x32xf32> -> vector<8x32xf32>
    %c0_82 = arith.constant 0 : index
    %c0_83 = arith.constant 0 : index
    %371 = vector.load %arg12[%c0_82, %c0_83] : memref<1x32xf32, #tpu.memory_space<vmem>>, vector<1x32xf32>
    %372 = vector.broadcast %371 : vector<1x32xf32> to vector<8x32xf32>
    %373 = arith.addf %370, %372 : vector<8x32xf32>
    %c0_84 = arith.constant 0 : index
    %c0_85 = arith.constant 0 : index
    %374 = vector.load %arg16[%c0_84, %c0_85] : memref<32x32xf32, #tpu.memory_space<vmem>>, vector<32x32xf32>
    %cst_86 = arith.constant dense<0.000000e+00> : vector<8x32xf32>
    %375 = tpu.matmul %373, %374, %cst_86 {dimension_numbers = #tpu.dot_dimension_numbers<[1], [0], [0], [1], [0, 0, 1, 1], [], []>} : vector<8x32xf32>, vector<32x32xf32>, vector<8x32xf32> -> vector<8x32xf32>
    %c0_87 = arith.constant 0 : index
    %c0_88 = arith.constant 0 : index
    %376 = vector.load %arg17[%c0_87, %c0_88] : memref<1x32xf32, #tpu.memory_space<vmem>>, vector<1x32xf32>
    %377 = vector.broadcast %376 : vector<1x32xf32> to vector<8x32xf32>
    %378 = arith.addf %375, %377 : vector<8x32xf32>
    %cst_89 = arith.constant 0.000000e+00 : f32
    %379 = vector.broadcast %cst_89 : f32 to vector<8x32xf32>
    %380 = arith.maximumf %378, %379 : vector<8x32xf32>
    %c0_90 = arith.constant 0 : index
    %c0_91 = arith.constant 0 : index
    %381 = vector.load %arg18[%c0_90, %c0_91] : memref<32x16xf32, #tpu.memory_space<vmem>>, vector<32x16xf32>
    %cst_92 = arith.constant dense<0.000000e+00> : vector<8x16xf32>
    %382 = tpu.matmul %380, %381, %cst_92 {dimension_numbers = #tpu.dot_dimension_numbers<[1], [0], [0], [1], [0, 0, 1, 1], [], []>} : vector<8x32xf32>, vector<32x16xf32>, vector<8x16xf32> -> vector<8x16xf32>
    %c0_93 = arith.constant 0 : index
    %c0_94 = arith.constant 0 : index
    %383 = vector.load %arg19[%c0_93, %c0_94] : memref<1x16xf32, #tpu.memory_space<vmem>>, vector<1x16xf32>
    %384 = vector.broadcast %383 : vector<1x16xf32> to vector<8x16xf32>
    %385 = arith.addf %382, %384 : vector<8x16xf32>
    %cst_95 = arith.constant 0.000000e+00 : f32
    %386 = vector.broadcast %cst_95 : f32 to vector<8x16xf32>
    %387 = arith.maximumf %385, %386 : vector<8x16xf32>
    %c0_96 = arith.constant 0 : index
    %c0_97 = arith.constant 0 : index
    %388 = vector.load %arg20[%c0_96, %c0_97] : memref<16x1xf32, #tpu.memory_space<vmem>>, vector<16x1xf32>
    %cst_98 = arith.constant dense<0.000000e+00> : vector<8x1xf32>
    %389 = tpu.matmul %387, %388, %cst_98 {dimension_numbers = #tpu.dot_dimension_numbers<[1], [0], [0], [1], [0, 0, 1, 1], [], []>} : vector<8x16xf32>, vector<16x1xf32>, vector<8x1xf32> -> vector<8x1xf32>
    %c0_99 = arith.constant 0 : index
    %c0_100 = arith.constant 0 : index
    %390 = vector.load %arg21[%c0_99, %c0_100] : memref<1x1xf32, #tpu.memory_space<vmem>>, vector<1x1xf32>
    %391 = vector.broadcast %390 : vector<1x1xf32> to vector<8x1xf32>
    %392 = arith.addf %389, %391 : vector<8x1xf32>
    %393 = vector.extract_strided_slice %392 {offsets = [0, 0], sizes = [2, 1], strides = [1, 1]} : vector<8x1xf32> to vector<2x1xf32>
    %c0_101 = arith.constant 0 : index
    %c0_102 = arith.constant 0 : index
    %394 = vector.load %arg22[%c0_101, %c0_102] : memref<2x1xf32, #tpu.memory_space<vmem>>, vector<2x1xf32>
    tpu.vector_store %arg22[%c0_101, %c0_102], %393 {strides = array<i32>} : memref<2x1xf32, #tpu.memory_space<vmem>>, vector<2x1xf32>,
    return
  }
}

</mosaic_0001>

<bundles_post_ra>
// kernel: tpu_custom_call.1
= control target key start
LH: loop header
LB: loop body
LE: loop exit
PB: predicated region body
PF: predicated region fallthrough
CT: control target
= control target key end

     0   :  { %s7129_s0 = inlined_call_operand.vmem [shape: f32[168,56], index: 0, kind: input, shape index: {}]   ;;  %s7130_s1 = inlined_call_operand.vmem [shape: f32[56,96], index: 1, kind: input, shape index: {}]   ;;  %s7131_s2 = inlined_call_operand.vmem [shape: f32[1,96], index: 2, kind: input, shape index: {}]   ;;  %s7132_s3 = inlined_call_operand.vmem [shape: f32[96,128], index: 3, kind: input, shape index: {}]   ;;  %s7133_s4 = inlined_call_operand.vmem [shape: f32[32,128], index: 4, kind: input, shape index: {}]   ;;  %s7134_s5 = inlined_call_operand.vmem [shape: f32[1,128], index: 5, kind: input, shape index: {}]   ;;  %s7135_s6 = inlined_call_operand.vmem [shape: f32[32,128], index: 6, kind: input, shape index: {}]   ;;  %s7136_s7 = inlined_call_operand.hbm [shape: f32[32,128], index: 7, kind: input, shape index: {}]   ;;  %s7137_s8 = inlined_call_operand.vmem [shape: f32[1,128], index: 8, kind: input, shape index: {}]   ;;  %s7138_s9 = inlined_call_operand.vmem [shape: f32[32,96], index: 9, kind: input, shape index: {}]   ;;  %s7139_s10 = inlined_call_operand.vmem [shape: f32[1,96], index: 10, kind: input, shape index: {}]   ;;  %s7140_s11 = inlined_call_operand.hbm [shape: f32[32,32], index: 11, kind: input, shape index: {}]   ;;  %s7141_s12 = inlined_call_operand.vmem [shape: f32[1,32], index: 12, kind: input, shape index: {}]   ;;  %s7142_s13 = inlined_call_operand.vmem [shape: f32[56,56], index: 13, kind: input, shape index: {}]   ;;  %s7143_s14 = inlined_call_operand.vmem [shape: f32[56,7], index: 14, kind: input, shape index: {}]   ;;  %s7144_s15 = inlined_call_operand.hbm [shape: f32[16,56], index: 15, kind: input, shape index: {}]   ;;  %s7145_s16 = inlined_call_operand.hbm [shape: f32[32,32], index: 16, kind: input, shape index: {}]   ;;  %s7146_s17 = inlined_call_operand.vmem [shape: f32[1,32], index: 17, kind: input, shape index: {}]   ;;  %s7147_s18 = inlined_call_operand.vmem [shape: f32[32,16], index: 18, kind: input, shape index: {}]   ;;  %s7148_s19 = inlined_call_operand.vmem [shape: f32[1,16], index: 19, kind: input, shape index: {}]   ;;  %s7149_s20 = inlined_call_operand.vmem [shape: f32[16,1], index: 20, kind: input, shape index: {}]   ;;  %s7150_s21 = inlined_call_operand.<no memory space> [shape: f32[1,1], index: 21, kind: input, shape index: {}]   ;;  %s7151_s22 = inlined_call_operand.vmem [shape: f32[2,1], index: 22, kind: output, shape index: {0}]   ;;  %s7152_s23 = inlined_call_operand.vmem [shape: f32[2,7,7], index: 23, kind: output, shape index: {1}]  }
   0x1   :  { %7158 = sst [smem:[#allocation13_spill]] %s7129_s0  ;;  %v29_v0 = vstv %s7150_s21 }
   0x2   :  { %7159 = sst [smem:[#allocation14_spill]] %s7130_s1  ;;  %30 = vst [vmem:[#allocation2] sm:$0x1] %v29_v0 }
   0x3   :  { %7160 = sst [smem:[#allocation15_spill]] %s7131_s2 }
   0x4   :  { %7161 = sst [smem:[#allocation16_spill]] %s7132_s3 }
   0x5   :  { %7162 = sst [smem:[#allocation17_spill]] %s7133_s4 }
   0x6   :  { %7163 = sst [smem:[#allocation18_spill]] %s7134_s5 }
   0x7   :  { %7164 = sst [smem:[#allocation19_spill]] %s7135_s6 }
   0x8   :  { %7165 = sst [smem:[#allocation20_spill]] %s7136_s7 }
   0x9   :  { %31 = vsyncpa [#allocation4], 0 }
   0xa   :  { %32 = vsyncpa [#allocation6], 0 }
   0xb   :  { %33 = vsyncpa [#allocation9], 0  ;;  %s5537_s24 = smov [#allocation5]   ;;  %s5538_s5 = smov [#allocation3]  }
   0xc   :  { %s71_s25 = sshll.u32 %s5537_s24, 4  ;;  %s53_s1 = sshll.u32 %s5538_s5, 4  ;;  %s72_s25 = int_to_ptr.vmem [resolvable:$true] %s71_s25  ;;  %s54_s1 = int_to_ptr.vmem [resolvable:$true] %s53_s1 }
   0xd   :  { %s5459_s26 = scalar_lea.vmem %s72_s25, 512  ;;  %p5464_p1 = scmp.lt.s32.totalorder %s72_s25, %s72_s25 }
   0xe   :  { %p5460_p0 = scmp.ne.s32.totalorder %s72_s25, %s5459_s26  ;;  %p5465_p2 = scmp.lt.s32.totalorder %s5459_s26, %s5459_s26 }
  0x10   :  { %p5466_p3 = por %p5465_p2, %p5464_p1 }
  0x12   :  { %p5467_p4 = pnand %p5466_p3, %p5460_p0 }
  0x14   :  { %5470 = shalt.err (!%p5467_p4)
}
  0x15   :  { %s5539_s2 = smov 128   ;;  %s5540_s6 = smov 8  }
  0x16   :  { %77 = dma.hbm_to_vmem [thread:$0]  %s7140_s11, 512, %s72_s25, [#allocation6], %s5539_s2, %s5539_s2, %s5540_s6  }
  0x17   :  { %s5479_s7 = scalar_lea.vmem %s54_s1, 512  ;;  %p5484_p6 = scmp.lt.s32.totalorder %s54_s1, %s54_s1 }
  0x18   :  { %p5480_p5 = scmp.ne.s32.totalorder %s54_s1, %s5479_s7  ;;  %p5485_p7 = scmp.lt.s32.totalorder %s5479_s7, %s5479_s7 }
  0x1a   :  { %p5486_p8 = por %p5485_p7, %p5484_p6 }
  0x1c   :  { %p5487_p9 = pnand %p5486_p8, %p5480_p5 }
  0x1e   :  { %5490 = shalt.err (!%p5487_p9)
}
  0x1f   :  { %s7166_s3 = sld [smem:[#allocation20_spill]]  ;;  %s5541_s0 = smov [#allocation7]  }
  0x20   :  { %s89_s4 = sshll.u32 %s5541_s0, 4  ;;  %s5542_s30 = smov [#allocation8]   ;;  %s90_s4 = int_to_ptr.vmem [resolvable:$true] %s89_s4 }
  0x21   :  { %s101_s24 = sshll.u32 %s5542_s30, 4  ;;  %s5499_s11 = scalar_lea.vmem %s90_s4, 256  ;;  %s102_s24 = int_to_ptr.vmem [resolvable:$true] %s101_s24 }
  0x22   :  { %p5500_p10 = scmp.ne.s32.totalorder %s90_s4, %s5499_s11  ;;  %p5504_p11 = scmp.lt.s32.totalorder %s90_s4, %s90_s4 }
  0x23   :  { %p5505_p12 = scmp.lt.s32.totalorder %s5499_s11, %s5499_s11 }
  0x25   :  { %59 = dma.hbm_to_vmem [thread:$0]  %s7166_s3, 512, %s54_s1, [#allocation4], %s5539_s2, %s5539_s2, %s5540_s6  }
  0x26   :  { %p5506_p13 = por %p5505_p12, %p5504_p11 }
  0x28   :  { %p5507_p0 = pnand %p5506_p13, %p5500_p10 }
  0x2a   :  { %5510 = shalt.err (!%p5507_p0)
}
  0x2b   :  { %95 = dma.hbm_to_vmem [thread:$0]  %s7144_s15, 256, %s90_s4, [#allocation6], %s5539_s2, %s5539_s2, %s5540_s6  }
  0x2c   :  { %s5519_s1 = scalar_lea.vmem %s102_s24, 512  ;;  %p5524_p2 = scmp.lt.s32.totalorder %s102_s24, %s102_s24 }
  0x2d   :  { %p5520_p1 = scmp.ne.s32.totalorder %s102_s24, %s5519_s1  ;;  %p5525_p3 = scmp.lt.s32.totalorder %s5519_s1, %s5519_s1 }
  0x2f   :  { %p5526_p4 = por %p5525_p3, %p5524_p2 }
  0x31   :  { %p5527_p5 = pnand %p5526_p4, %p5520_p1 }
  0x33   :  { %5530 = shalt.err (!%p5527_p5)
}
  0x34   :  { %107 = dma.hbm_to_vmem [thread:$0]  %s7145_s16, 512, %s102_s24, [#allocation9], %s5539_s2, %s5539_s2, %s5540_s6  }
  0x35   :  { %5531 = dma.done.wait [#allocation4], 512  }
  0x36   :  { %5532 = vsyncadd [#allocation4], 4294966784 }
  0x37   :  { %5533 = dma.done.wait [#allocation6], 768  }
  0x38   :  { %5534 = vsyncadd [#allocation6], 4294966528 }
  0x39   :  { %5535 = dma.done.wait [#allocation9], 512  }
  0x3a   :  { %5536 = vsyncadd [#allocation9], 4294966784  ;;  %v5543_v1 = vmov 0.0   ;;  %vm5544_vm0 = vmmov 0   ;;  %s7167_s2 = sld [smem:[#allocation14_spill]]  ;;  %vm165_vm1 = vcmask 457728  }
  0x3b   :  { %4571 = vmatprep.subr.mxu0 %v5543_v1  ;;  %4585 = vmatprep.mubr.msk.f32.mxu0 %vm5544_vm0, %v5543_v1  ;;  %s7168_s21 = sld [smem:[#allocation13_spill]]  ;;  %vm453_vm2 = vcmask 785408   ;;  %s5546_s24 = smov 64   ;;  %vm579_vm3 = vcmask 261120   ;;  %vm2230_vm4 = vcmask 64512   ;;  %vm3409_vm5 = vcmask 55296  }
  0x3c   :  { %4648 = vmatprep.subr.mxu1 %v5543_v1  ;;  %4672 = vmatprep.mubr.msk.f32.mxu1 %vm5544_vm0, %v5543_v1  ;;  %s7169_s0 = sld [smem:[#allocation16_spill]]  ;;  %s5550_s26 = smov 80   ;;  %vm3801_vm6 = vcmask 130048   ;;  %vm3803_vm7 = vcmask 195584   ;;  %vm4141_vm8 = vcmask 1024  }
  0x3d   :  { %s7170_s1 = sld [smem:[#allocation17_spill]]  ;;  %s5551_s15 = smov 72  }
  0x3e   :  { %s7171_s29 = sld [smem:[#allocation15_spill]]  ;;  %s5553_s16 = smov 104  }
  0x3f   :  { %s7172_s30 = sld [smem:[#allocation18_spill]]  ;;  %s5554_s4 = smov 56  }
  0x40   :  { %v157_v2 = vld [vmem:[%s7167_s2 + $0x30] sm:$0xff]  ;;  %v156_v3 = vld [vmem:[%s7167_s2 + $0x28] sm:$0xff]  ;;  %v155_v4 = vld [vmem:[%s7167_s2 + $0x20] sm:$0xff]  ;;  %s7173_s5 = sld [smem:[#allocation19_spill]] }
  0x41   :  { %4572 = vmatpush3.msra.mxu0 %v157_v2  ;;  %v154_v5 = vld [vmem:[%s7167_s2 + $0x18] sm:$0xff]  ;;  %v153_v6 = vld [vmem:[%s7167_s2 + $0x10] sm:$0xff]  ;;  %v152_v7 = vld [vmem:[%s7167_s2 + $0x8] sm:$0xff] }
  0x42   :  { %4573 = vmatprep.subr.mxu0 %v5543_v1  ;;  %v151_v8 = vld [vmem:[%s7167_s2] sm:$0xff]  ;;  %v131_v10 = vld [vmem:[%s7168_s21 + $0x8] sm:$0xff]  ;;  %v132_v11 = vld [vmem:[%s7168_s21 + $0x10] sm:$0xff] }
  0x43   :  { %4574 = vmatpush3.msra.mxu0 %v156_v3  ;;  %v130_v9 = vld [vmem:[%s7168_s21] sm:$0xff]  ;;  %v133_v12 = vld [vmem:[%s7168_s21 + $0x18] sm:$0xff]  ;;  %v135_v14 = vld [vmem:[%s7168_s21 + $0x28] sm:$0xff] }
  0x44   :  { %4575 = vmatprep.subr.mxu0 %v5543_v1  ;;  %v134_v13 = vld [vmem:[%s7168_s21 + $0x20] sm:$0xff]  ;;  %v136_v15 = vld [vmem:[%s7168_s21 + $0x30] sm:$0xff]  ;;  %v137_v16 = vld [vmem:[%s7168_s21 + $0x38] sm:$0xff] }
  0x45   :  { %4576 = vmatpush3.msra.mxu0 %v155_v4  ;;  %v138_v17 = vld [vmem:[%s7168_s21 + $0x40] sm:$0xff]  ;;  %v139_v18 = vld [vmem:[%s7168_s21 + $0x48] sm:$0xff]  ;;  %v140_v19 = vld [vmem:[%s7168_s21 + $0x50] sm:$0xff] }
  0x46   :  { %4577 = vmatprep.subr.mxu0 %v5543_v1  ;;  %v141_v20 = vld [vmem:[%s7168_s21 + $0x58] sm:$0xff]  ;;  %v142_v21 = vld [vmem:[%s7168_s21 + $0x60] sm:$0xff]  ;;  %v143_v22 = vld [vmem:[%s7168_s21 + $0x68] sm:$0xff] }
  0x47   :  { %4578 = vmatpush3.msra.mxu0 %v154_v5  ;;  %v144_v23 = vld [vmem:[%s7168_s21 + $0x70] sm:$0xff]  ;;  %v145_v24 = vld [vmem:[%s7168_s21 + $0x78] sm:$0xff]  ;;  %v146_v25 = vld [vmem:[%s7168_s21 + $0x80] sm:$0xff] }
  0x48   :  { %4579 = vmatprep.subr.mxu0 %v5543_v1  ;;  %v147_v26 = vld [vmem:[%s7168_s21 + $0x88] sm:$0xff]  ;;  %v148_v27 = vld [vmem:[%s7168_s21 + $0x90] sm:$0xff]  ;;  %v149_v28 = vld [vmem:[%s7168_s21 + $0x98] sm:$0xff] }
  0x49   :  { %4580 = vmatpush3.msra.mxu0 %v153_v6  ;;  %v150_v29 = vld [vmem:[%s7168_s21 + $0xa0] sm:$0xff]  ;;  %v445_v30 = vld [vmem:[%s7169_s0 + $0x58] sm:$0xff]  ;;  %v444_v31 = vld [vmem:[%s7169_s0 + $0x50] sm:$0xff]  ;;  %s5545_s21 = smov 32  }
  0x4a   :  { %4581 = vmatprep.subr.mxu0 %v5543_v1  ;;  %4649 = vmatpush3.msra.mxu1 %v445_v30  ;;  %v443_v32 = vld [vmem:[%s7169_s0 + $0x48] sm:$0xff]  ;;  %v442_v33 = vld [vmem:[%s7169_s0 + $0x40] sm:$0xff]  ;;  %v441_v34 = vld [vmem:[%s7169_s0 + $0x38] sm:$0xff] }
  0x4b   :  { %4582 = vmatpush3.msra.mxu0 %v152_v7  ;;  %4650 = vmatprep.subr.mxu1 %v5543_v1  ;;  %v440_v35 = vld [vmem:[%s7169_s0 + $0x30] sm:$0xff]  ;;  %v439_v36 = vld [vmem:[%s7169_s0 + $0x28] sm:$0xff]  ;;  %v438_v37 = vld [vmem:[%s7169_s0 + $0x20] sm:$0xff] }
  0x4c   :  { %4583 = vmatprep.subr.mxu0 %v5543_v1  ;;  %4651 = vmatpush3.msra.mxu1 %v444_v31  ;;  %v437_v38 = vld [vmem:[%s7169_s0 + $0x18] sm:$0xff]  ;;  %v436_v39 = vld [vmem:[%s7169_s0 + $0x10] sm:$0xff]  ;;  %v435_v40 = vld [vmem:[%s7169_s0 + $0x8] sm:$0xff] }
  0x4d   :  { %4584 = vmatpush3.msra.mxu0 %v151_v8  ;;  %4652 = vmatprep.subr.mxu1 %v5543_v1  ;;  %v434_v41 = vld [vmem:[%s7169_s0] sm:$0xff]  ;;  %v5917_v42 = vld [vmem:[%s7170_s1 + $0x18] sm:$0xff]  ;;  %v5924_v43 = vld [vmem:[%s7170_s1 + $0x10] sm:$0xff]  ;;  %s5552_s0 = smov 112  }
  0x4e   :  { %4586 = vmatmul.mubr.msk.f32.vlgmr.msra.gmra.mxu0 %vm165_vm1, %v130_v9  ;;  %4759 = vmatprep.subr.mxu0 %v5543_v1  ;;  %v5930_v44 = vld [vmem:[%s7170_s1 + $0x8] sm:$0xff]  ;;  %v5937_v45 = vld [vmem:[%s7170_s1] sm:$0xff]  ;;  %s5547_s1 = smov 96  }
  0x4f   :  { %4588 = vmatprep.mubr.msk.f32.mxu0 %vm5544_vm0, %v5543_v1  ;;  %4653 = vmatpush3.msra.mxu1 %v443_v32  ;;  %v5951_v8 = vld [vmem:[%s7171_s29] ss:$0 sm:$0xff] }
  0x50   :  { %4654 = vmatprep.subr.mxu1 %v5543_v1  ;;  %4760 = vmatpush3.msra.mxu0 %v5917_v42 }
  0x51   :  { %4655 = vmatpush3.msra.mxu1 %v442_v33  ;;  %4761 = vmatprep.subr.mxu0 %v5543_v1 }
  0x52   :  { %4589 = vmatmul.mubr.msk.f32.gmra.mxu0 %vm165_vm1, %v131_v10  ;;  %4656 = vmatprep.subr.mxu1 %v5543_v1 }
  0x53   :  { %4591 = vmatprep.mubr.msk.f32.mxu0 %vm5544_vm0, %v5543_v1  ;;  %4657 = vmatpush3.msra.mxu1 %v441_v34 }
  0x54   :  { %4658 = vmatprep.subr.mxu1 %v5543_v1  ;;  %4762 = vmatpush3.msra.mxu0 %v5924_v43 }
  0x55   :  { %4659 = vmatpush3.msra.mxu1 %v440_v35  ;;  %4763 = vmatprep.subr.mxu0 %v5543_v1 }
  0x56   :  { %4592 = vmatmul.mubr.msk.f32.gmra.mxu0 %vm165_vm1, %v132_v11  ;;  %4660 = vmatprep.subr.mxu1 %v5543_v1 }
  0x57   :  { %4594 = vmatprep.mubr.msk.f32.mxu0 %vm5544_vm0, %v5543_v1  ;;  %4661 = vmatpush3.msra.mxu1 %v439_v36 }
  0x58   :  { %4662 = vmatprep.subr.mxu1 %v5543_v1  ;;  %4764 = vmatpush3.msra.mxu0 %v5930_v44 }
  0x59   :  { %4663 = vmatpush3.msra.mxu1 %v438_v37  ;;  %4765 = vmatprep.subr.mxu0 %v5543_v1 }
  0x5a   :  { %4595 = vmatmul.mubr.msk.f32.gmra.mxu0 %vm165_vm1, %v133_v12  ;;  %4664 = vmatprep.subr.mxu1 %v5543_v1 }
  0x5b   :  { %4597 = vmatprep.mubr.msk.f32.mxu0 %vm5544_vm0, %v5543_v1  ;;  %4665 = vmatpush3.msra.mxu1 %v437_v38 }
  0x5c   :  { %4666 = vmatprep.subr.mxu1 %v5543_v1  ;;  %4766 = vmatpush3.msra.mxu0 %v5937_v45 }
  0x5d   :  { %4667 = vmatpush3.msra.mxu1 %v436_v39  ;;  %4799 = vmatprep.subr.mxu0 %v5543_v1 }
  0x5e   :  { %4598 = vmatmul.mubr.msk.f32.gmra.mxu0 %vm165_vm1, %v134_v13  ;;  %4668 = vmatprep.subr.mxu1 %v5543_v1 }
  0x5f   :  { %4600 = vmatprep.mubr.msk.f32.mxu0 %vm5544_vm0, %v5543_v1  ;;  %4669 = vmatpush3.msra.mxu1 %v435_v40 }
  0x60   :  { %4670 = vmatprep.subr.mxu1 %v5543_v1 }
  0x61   :  { %4671 = vmatpush3.msra.mxu1 %v434_v41 }
  0x62   :  { %4601 = vmatmul.mubr.msk.f32.gmra.mxu0 %vm165_vm1, %v135_v14  ;;  %4693 = vmatprep.subr.mxu1 %v5543_v1 }
  0x63   :  { %4603 = vmatprep.mubr.msk.f32.mxu0 %vm5544_vm0, %v5543_v1 }
  0x66   :  { %4604 = vmatmul.mubr.msk.f32.gmra.mxu0 %vm165_vm1, %v136_v15 }
  0x67   :  { %4606 = vmatprep.mubr.msk.f32.mxu0 %vm5544_vm0, %v5543_v1 }
  0x6a   :  { %4607 = vmatmul.mubr.msk.f32.gmra.mxu0 %vm165_vm1, %v137_v16 }
  0x6b   :  { %4609 = vmatprep.mubr.msk.f32.mxu0 %vm5544_vm0, %v5543_v1 }
  0x6e   :  { %4610 = vmatmul.mubr.msk.f32.gmra.mxu0 %vm165_vm1, %v138_v17 }
  0x6f   :  { %4612 = vmatprep.mubr.msk.f32.mxu0 %vm5544_vm0, %v5543_v1 }
  0x72   :  { %4613 = vmatmul.mubr.msk.f32.gmra.mxu0 %vm165_vm1, %v139_v18 }
  0x73   :  { %4615 = vmatprep.mubr.msk.f32.mxu0 %vm5544_vm0, %v5543_v1 }
  0x76   :  { %4616 = vmatmul.mubr.msk.f32.gmra.mxu0 %vm165_vm1, %v140_v19 }
  0x77   :  { %4618 = vmatprep.mubr.msk.f32.mxu0 %vm5544_vm0, %v5543_v1 }
  0x7a   :  { %4619 = vmatmul.mubr.msk.f32.gmra.mxu0 %vm165_vm1, %v141_v20 }
  0x7b   :  { %4621 = vmatprep.mubr.msk.f32.mxu0 %vm5544_vm0, %v5543_v1 }
  0x7e   :  { %4622 = vmatmul.mubr.msk.f32.gmra.mxu0 %vm165_vm1, %v142_v21 }
  0x7f   :  { %4624 = vmatprep.mubr.msk.f32.mxu0 %vm5544_vm0, %v5543_v1 }
  0x82   :  { %4625 = vmatmul.mubr.msk.f32.gmra.mxu0 %vm165_vm1, %v143_v22 }
  0x83   :  { %4627 = vmatprep.mubr.msk.f32.mxu0 %vm5544_vm0, %v5543_v1 }
  0x86   :  { %4628 = vmatmul.mubr.msk.f32.gmra.mxu0 %vm165_vm1, %v144_v23 }
  0x87   :  { %4630 = vmatprep.mubr.msk.f32.mxu0 %vm5544_vm0, %v5543_v1 }
  0x8a   :  { %4631 = vmatmul.mubr.msk.f32.gmra.mxu0 %vm165_vm1, %v145_v24 }
  0x8b   :  { %4633 = vmatprep.mubr.msk.f32.mxu0 %vm5544_vm0, %v5543_v1 }
  0x8e   :  { %4634 = vmatmul.mubr.msk.f32.gmra.mxu0 %vm165_vm1, %v146_v25 }
  0x8f   :  { %4636 = vmatprep.mubr.msk.f32.mxu0 %vm5544_vm0, %v5543_v1 }
  0x92   :  { %4637 = vmatmul.mubr.msk.f32.gmra.mxu0 %vm165_vm1, %v147_v26 }
  0x93   :  { %4639 = vmatprep.mubr.msk.f32.mxu0 %vm5544_vm0, %v5543_v1 }
  0x96   :  { %4640 = vmatmul.mubr.msk.f32.gmra.mxu0 %vm165_vm1, %v148_v27 }
  0x97   :  { %4642 = vmatprep.mubr.msk.f32.mxu0 %vm5544_vm0, %v5543_v1 }
  0x9a   :  { %4643 = vmatmul.mubr.msk.f32.gmra.mxu0 %vm165_vm1, %v149_v28 }
  0x9b   :  { %4645 = vmatprep.mubr.msk.f32.mxu0 %vm5544_vm0, %v5543_v1 }
  0x9e   :  { %4646 = vmatmul.mubr.msk.f32.gmra.mxu0 %vm165_vm1, %v150_v29 }
  0x9f   :  { %4767 = vmatprep.mubr.msk.f32.mxu0 %vm5544_vm0, %v5543_v1 }
 0x10e   :  { %v295_v46 = vpop.f32.mrf.mxu0 }
 0x10f   :  { %v296_v12 = vadd.f32 %v5951_v8, %v295_v46 }
 0x110   :  { %v4587_v47 = vpop.f32.mrf.mxu0 }
 0x111   :  { %v399_v17 = vmax.f32 %v296_v12, 0.0 }
 0x112   :  { %v300_v48 = vpop.f32.mrf.mxu0 }
 0x113   :  { %v301_v18 = vadd.f32 %v5951_v8, %v300_v48 }
 0x114   :  { %v4590_v49 = vpop.f32.mrf.mxu0 }
 0x115   :  { %v400_v26 = vmax.f32 %v301_v18, 0.0 }
 0x116   :  { %v305_v50 = vpop.f32.mrf.mxu0 }
 0x117   :  { %v306_v27 = vadd.f32 %v5951_v8, %v305_v50 }
 0x118   :  { %v4593_v51 = vpop.f32.mrf.mxu0 }
 0x119   :  { %v401_v36 = vmax.f32 %v306_v27, 0.0 }
 0x11a   :  { %v310_v52 = vpop.f32.mrf.mxu0 }
 0x11b   :  { %v311_v37 = vadd.f32 %v5951_v8, %v310_v52 }
 0x11c   :  { %v4596_v53 = vpop.f32.mrf.mxu0 }
 0x11d   :  { %v402_v50 = vmax.f32 %v311_v37, 0.0 }
 0x11e   :  { %v5942_v54 = vpop.f32.mrf.mxu0 }
 0x11f   :  { %v316_v51 = vadd.f32 %v5951_v8, %v5942_v54 }
 0x120   :  { %v4599_v55 = vpop.f32.mrf.mxu0 }
 0x121   :  { %v403_v54 = vmax.f32 %v316_v51, 0.0 }
 0x122   :  { %v5944_v56 = vpop.f32.mrf.mxu0 }
 0x124   :  { %v4602_v57 = vpop.f32.mrf.mxu0 }
 0x126   :  { %v5946_v58 = vpop.f32.mrf.mxu0 }
 0x128   :  { %v4605_v59 = vpop.f32.mrf.mxu0 }
 0x12a   :  { %v330_v60 = vpop.f32.mrf.mxu0 }
 0x12b   :  { %v331_v10 = vadd.f32 %v5951_v8, %v330_v60 }
 0x12c   :  { %v4608_v61 = vpop.f32.mrf.mxu0 }
 0x12d   :  { %v406_v14 = vmax.f32 %v331_v10, 0.0 }
 0x12e   :  { %v335_v62 = vpop.f32.mrf.mxu0 }
 0x12f   :  { %v336_v15 = vadd.f32 %v5951_v8, %v335_v62  ;;  %v420_v21 = vmax.f32 %v399_v17, %v406_v14 }
 0x130   :  { %v4611_v63 = vpop.f32.mrf.mxu0 }
 0x131   :  { %v407_v22 = vmax.f32 %v336_v15, 0.0  ;;  %v321_v63 = vadd.f32 %v5951_v8, %v5944_v56  ;;  %v326_v56 = vadd.f32 %v5951_v8, %v5946_v58 }
 0x132   :  { %v340_v0 = vpop.f32.mrf.mxu0 }
 0x133   :  { %v341_v23 = vadd.f32 %v5951_v8, %v340_v0  ;;  %v421_v31 = vmax.f32 %v400_v26, %v407_v22  ;;  %v404_v10 = vmax.f32 %v321_v63, 0.0  ;;  %v405_v18 = vmax.f32 %v326_v56, 0.0 }
 0x134   :  { %v4614_v2 = vpop.f32.mrf.mxu0 }
 0x135   :  { %v408_v32 = vmax.f32 %v341_v23, 0.0 }
 0x136   :  { %v345_v3 = vpop.f32.mrf.mxu0 }
 0x137   :  { %v346_v33 = vadd.f32 %v5951_v8, %v345_v3  ;;  %v422_v41 = vmax.f32 %v401_v36, %v408_v32 }
 0x138   :  { %v4617_v4 = vpop.f32.mrf.mxu0 }
 0x139   :  { %v409_v46 = vmax.f32 %v346_v33, 0.0 }
 0x13a   :  { %v350_v5 = vpop.f32.mrf.mxu0 }
 0x13b   :  { %v351_v47 = vadd.f32 %v5951_v8, %v350_v5  ;;  %v423_v57 = vmax.f32 %v402_v50, %v409_v46 }
 0x13c   :  { %v4620_v6 = vpop.f32.mrf.mxu0 }
 0x13d   :  { %v410_v59 = vmax.f32 %v351_v47, 0.0 }
 0x13e   :  { %v355_v7 = vpop.f32.mrf.mxu0 }
 0x13f   :  { %v356_v60 = vadd.f32 %v5951_v8, %v355_v7  ;;  %v424_v4 = vmax.f32 %v403_v54, %v410_v59 }
 0x140   :  { %v4623_v9 = vpop.f32.mrf.mxu0 }
 0x141   :  { %v411_v5 = vmax.f32 %v356_v60, 0.0 }
 0x142   :  { %v5954_v11 = vpop.f32.mrf.mxu0 }
 0x143   :  { %v361_v6 = vadd.f32 %v5951_v8, %v5954_v11  ;;  %v425_v15 = vmax.f32 %v404_v10, %v411_v5 }
 0x144   :  { %v4626_v13 = vpop.f32.mrf.mxu0 }
 0x146   :  { %v365_v16 = vpop.f32.mrf.mxu0 }
 0x147   :  { %v366_v19 = vadd.f32 %v5951_v8, %v365_v16  ;;  %v412_v16 = vmax.f32 %v361_v6, 0.0 }
 0x148   :  { %v4629_v20 = vpop.f32.mrf.mxu0 }
 0x149   :  { %v413_v24 = vmax.f32 %v366_v19, 0.0  ;;  %v426_v22 = vmax.f32 %v405_v18, %v412_v16 }
 0x14a   :  { %v370_v25 = vpop.f32.mrf.mxu0 }
 0x14b   :  { %v427_v28 = vmax.f32 %v420_v21, %v413_v24  ;;  %v371_v29 = vadd.f32 %v5951_v8, %v370_v25  ;;  %v4176_v25 = vld [vmem:[%s7172_s30] ss:$0 sm:$0xff]  ;;  %s5556_s30 = smov 40  }
 0x14c   :  { %v4632_v30 = vpop.f32.mrf.mxu0 }
 0x14d   :  { %v414_v34 = vmax.f32 %v371_v29, 0.0  ;;  %4673 = vmatmul.mubr.msk.f32.vlgmr.msra.gmra.mxu1 %vm453_vm2, %v427_v28 }
 0x14e   :  { %v375_v35 = vpop.f32.mrf.mxu0  ;;  %4675 = vmatprep.mubr.msk.f32.mxu1 %vm5544_vm0, %v5543_v1  ;;  %4694 = vmatpush3.msra.mxu1 %v5917_v42 }
 0x14f   :  { %v428_v38 = vmax.f32 %v421_v31, %v414_v34  ;;  %v376_v39 = vadd.f32 %v5951_v8, %v375_v35  ;;  %4695 = vmatprep.subr.mxu1 %v5543_v1 }
 0x150   :  { %v4635_v40 = vpop.f32.mrf.mxu0  ;;  %4696 = vmatpush3.msra.mxu1 %v5924_v43 }
 0x151   :  { %v415_v48 = vmax.f32 %v376_v39, 0.0  ;;  %4676 = vmatmul.mubr.msk.f32.gmra.mxu1 %vm453_vm2, %v428_v38  ;;  %4697 = vmatprep.subr.mxu1 %v5543_v1 }
 0x152   :  { %v380_v49 = vpop.f32.mrf.mxu0  ;;  %4678 = vmatprep.mubr.msk.f32.mxu1 %vm5544_vm0, %v5543_v1  ;;  %4698 = vmatpush3.msra.mxu1 %v5930_v44 }
 0x153   :  { %v429_v52 = vmax.f32 %v422_v41, %v415_v48  ;;  %v381_v53 = vadd.f32 %v5951_v8, %v380_v49  ;;  %4699 = vmatprep.subr.mxu1 %v5543_v1 }
 0x154   :  { %v4638_v55 = vpop.f32.mrf.mxu0  ;;  %4700 = vmatpush3.msra.mxu1 %v5937_v45 }
 0x155   :  { %v416_v61 = vmax.f32 %v381_v53, 0.0  ;;  %4679 = vmatmul.mubr.msk.f32.gmra.mxu1 %vm453_vm2, %v429_v52  ;;  %4704 = vmatprep.subr.mxu1 %v5543_v1 }
 0x156   :  { %v385_v62 = vpop.f32.mrf.mxu0  ;;  %4681 = vmatprep.mubr.msk.f32.mxu1 %vm5544_vm0, %v5543_v1 }
 0x157   :  { %v430_v0 = vmax.f32 %v423_v57, %v416_v61  ;;  %v386_v2 = vadd.f32 %v5951_v8, %v385_v62 }
 0x158   :  { %v4641_v3 = vpop.f32.mrf.mxu0 }
 0x159   :  { %v417_v7 = vmax.f32 %v386_v2, 0.0  ;;  %4682 = vmatmul.mubr.msk.f32.gmra.mxu1 %vm453_vm2, %v430_v0 }
 0x15a   :  { %v390_v9 = vpop.f32.mrf.mxu0  ;;  %4684 = vmatprep.mubr.msk.f32.mxu1 %vm5544_vm0, %v5543_v1 }
 0x15b   :  { %v431_v12 = vmax.f32 %v424_v4, %v417_v7  ;;  %v391_v13 = vadd.f32 %v5951_v8, %v390_v9 }
 0x15c   :  { %v4644_v14 = vpop.f32.mrf.mxu0 }
 0x15d   :  { %v418_v17 = vmax.f32 %v391_v13, 0.0  ;;  %4685 = vmatmul.mubr.msk.f32.gmra.mxu1 %vm453_vm2, %v431_v12 }
 0x15e   :  { %v395_v11 = vpop.f32.mrf.mxu0  ;;  %4687 = vmatprep.mubr.msk.f32.mxu1 %vm5544_vm0, %v5543_v1 }
 0x15f   :  { %v432_v19 = vmax.f32 %v425_v15, %v418_v17  ;;  %v396_v20 = vadd.f32 %v5951_v8, %v395_v11 }
 0x160   :  { %v4647_v21 = vpop.f32.mrf.mxu0 }
 0x161   :  { %v419_v58 = vmax.f32 %v396_v20, 0.0  ;;  %4688 = vmatmul.mubr.msk.f32.gmra.mxu1 %vm453_vm2, %v432_v19 }
 0x162   :  { %4690 = vmatprep.mubr.msk.f32.mxu1 %vm5544_vm0, %v5543_v1 }
 0x163   :  { %v433_v23 = vmax.f32 %v426_v22, %v419_v58 }
 0x165   :  { %4691 = vmatmul.mubr.msk.f32.gmra.mxu1 %vm453_vm2, %v433_v23 }
 0x166   :  { %4701 = vmatprep.mubr.msk.f32.mxu1 %vm5544_vm0, %v5543_v1 }
 0x169   :  { %4702 = vmatmul.mubr.f32.vlgmr.msra.gmra.mxu1 %v5543_v1 }
 0x16a   :  { %4705 = vmatpush3.msra.mxu1 %v5917_v42  ;;  %4712 = vmatprep.mubr.msk.f32.mxu1 %vm5544_vm0, %v5543_v1 }
 0x16b   :  { %4706 = vmatprep.subr.mxu1 %v5543_v1 }
 0x16c   :  { %4707 = vmatpush3.msra.mxu1 %v5924_v43 }
 0x16d   :  { %4708 = vmatprep.subr.mxu1 %v5543_v1 }
 0x16e   :  { %4709 = vmatpush3.msra.mxu1 %v5930_v44 }
 0x16f   :  { %4710 = vmatprep.subr.mxu1 %v5543_v1 }
 0x170   :  { %4711 = vmatpush3.msra.mxu1 %v5937_v45 }
 0x171   :  { %4715 = vmatprep.subr.mxu1 %v5543_v1 }
 0x20d   :  { %v541_v8 = vpop.f32.mrf.mxu1 }
 0x20e   :  { %v542_v48 = vadd.f32 %v4176_v25, %v541_v8 }
 0x20f   :  { %v4674_v24 = vpop.f32.mrf.mxu1 }
 0x211   :  { %v546_v26 = vpop.f32.mrf.mxu1 }
 0x212   :  { %v547_v27 = vadd.f32 %v4176_v25, %v546_v26 }
 0x213   :  { %v4677_v28 = vpop.f32.mrf.mxu1 }
 0x215   :  { %v551_v29 = vpop.f32.mrf.mxu1 }
 0x216   :  { %v6023_v30 = vadd.f32 %v4176_v25, %v551_v29 }
 0x217   :  { %v4680_v31 = vpop.f32.mrf.mxu1 }
 0x219   :  { %v556_v32 = vpop.f32.mrf.mxu1 }
 0x21a   :  { %v6025_v33 = vadd.f32 %v4176_v25, %v556_v32 }
 0x21b   :  { %v4683_v34 = vpop.f32.mrf.mxu1 }
 0x21d   :  { %v561_v35 = vpop.f32.mrf.mxu1 }
 0x21e   :  { %v6027_v36 = vadd.f32 %v4176_v25, %v561_v35 }
 0x21f   :  { %v4686_v37 = vpop.f32.mrf.mxu1 }
 0x221   :  { %v566_v38 = vpop.f32.mrf.mxu1 }
 0x222   :  { %v6029_v39 = vadd.f32 %v4176_v25, %v566_v38 }
 0x223   :  { %v4689_v40 = vpop.f32.mrf.mxu1 }
 0x225   :  { %v571_v41 = vpop.f32.mrf.mxu1 }
 0x226   :  { %v6031_v46 = vadd.f32 %v4176_v25, %v571_v41 }
 0x227   :  { %v4692_v47 = vpop.f32.mrf.mxu1 }
 0x229   :  { %v649_v49 = vpop.f32.mrf.mxu1 }
 0x22a   :  { %v653_v50 = vadd.f32 %v649_v49, %v542_v48 }
 0x22b   :  { %v4703_v51 = vpop.f32.mrf.mxu1 }
 0x22c   :  { %5227 = vtanh.f32 %v653_v50  ;;  %v4184_v53 = vmul.f32 -1.442695, %v653_v50 }
 0x22e   :  { %5229 = vpow2.f32 %v4184_v53 }
 0x239   :  { %v5228_v52 = vpop.eup %5227 }
 0x23a   :  { %663 = vrot.lane.b32.xlu0 %v5228_v52, %s5545_s21 }
 0x23b   :  { %v5230_v55 = vpop.eup %5229 }
 0x23c   :  { %v657_v57 = vadd.f32 1.0, %v5230_v55 }
 0x23e   :  { %5231 = vrcp.f32 %v657_v57 }
 0x24b   :  { %v5232_v59 = vpop.eup %5231 }
 0x24c   :  { %v661_v62 = vmul.f32 0.0, %v5232_v59 }
 0x2ac   :  { %v664_v60 = vpop.permute.xlu0 %663 }
 0x2ad   :  { %v666_v61 = vmul.f32 %v5232_v59, %v664_v60 }
 0x2af   :  { %668 = vrot.lane.b32.xlu0 %v666_v61, %s5545_s21 }
 0x321   :  { %v669_v54 = vpop.permute.xlu0 %668 }
 0x322   :  { %v671_v63 = vadd.f32 %v669_v54, %v661_v62 }
 0x324   :  { %5233 = vtanh.f32 %v671_v63 }
 0x331   :  { %v5234_v0 = vpop.eup %5233 }
 0x332   :  { %674 = vrot.lane.b32.xlu1 %v5234_v0, %s5545_s21 }
 0x3a4   :  { %v675_v2 = vpop.permute.xlu1 %674 }
 0x3a5   :  { %v677_v3 = vmul.f32 %v5232_v59, %v675_v2 }
 0x3a7   :  { %679 = vrot.lane.b32.xlu1 %v677_v3, %s5546_s24 }
 0x419   :  { %v6037_v4 = vpop.permute.xlu1 %679 }
 0x41a   :  { %4713 = vmatmul.mubr.msk.f32.vlgmr.msra.gmra.mxu1 %vm579_vm3, %v6037_v4 }
 0x41b   :  { %4716 = vmatpush3.msra.mxu1 %v5917_v42  ;;  %4723 = vmatprep.mubr.msk.f32.mxu1 %vm5544_vm0, %v5543_v1 }
 0x41c   :  { %4717 = vmatprep.subr.mxu1 %v5543_v1 }
 0x41d   :  { %4718 = vmatpush3.msra.mxu1 %v5924_v43 }
 0x41e   :  { %4719 = vmatprep.subr.mxu1 %v5543_v1 }
 0x41f   :  { %4720 = vmatpush3.msra.mxu1 %v5930_v44 }
 0x420   :  { %4721 = vmatprep.subr.mxu1 %v5543_v1 }
 0x421   :  { %4722 = vmatpush3.msra.mxu1 %v5937_v45 }
 0x422   :  { %4726 = vmatprep.subr.mxu1 %v5543_v1 }
 0x4da   :  { %v749_v5 = vpop.f32.mrf.mxu1 }
 0x4db   :  { %v753_v6 = vadd.f32 %v749_v5, %v547_v27 }
 0x4dc   :  { %v4714_v7 = vpop.f32.mrf.mxu1 }
 0x4dd   :  { %5235 = vtanh.f32 %v753_v6  ;;  %v4186_v10 = vmul.f32 -1.442695, %v753_v6 }
 0x4df   :  { %5237 = vpow2.f32 %v4186_v10 }
 0x4ea   :  { %v5236_v9 = vpop.eup %5235 }
 0x4eb   :  { %763 = vrot.lane.b32.xlu0 %v5236_v9, %s5545_s21 }
 0x4ec   :  { %v5238_v56 = vpop.eup %5237 }
 0x4ed   :  { %v757_v12 = vadd.f32 1.0, %v5238_v56 }
 0x4ef   :  { %5239 = vrcp.f32 %v757_v12 }
 0x4fc   :  { %v5240_v13 = vpop.eup %5239 }
 0x4fd   :  { %v761_v16 = vmul.f32 %v5240_v13, %v671_v63 }
 0x55d   :  { %v764_v14 = vpop.permute.xlu0 %763 }
 0x55e   :  { %v766_v15 = vmul.f32 %v5240_v13, %v764_v14 }
 0x560   :  { %768 = vrot.lane.b32.xlu1 %v766_v15, %s5545_s21  ;;  %v1280_v15 = vld [vmem:[%s7173_s5 + $0x10] sm:$0xff] }
 0x5d2   :  { %v769_v17 = vpop.permute.xlu1 %768 }
 0x5d3   :  { %v771_v11 = vadd.f32 %v769_v17, %v761_v16  ;;  %v1279_v16 = vld [vmem:[%s7173_s5 + $0x8] sm:$0xff]  ;;  %v1278_v17 = vld [vmem:[%s7173_s5] sm:$0xff] }
 0x5d5   :  { %5241 = vtanh.f32 %v771_v11 }
 0x5e2   :  { %v5242_v18 = vpop.eup %5241 }
 0x5e3   :  { %774 = vrot.lane.b32.xlu0 %v5242_v18, %s5545_s21 }
 0x655   :  { %v775_v19 = vpop.permute.xlu0 %774 }
 0x656   :  { %v777_v20 = vmul.f32 %v5240_v13, %v775_v19  ;;  %v1281_v13 = vld [vmem:[%s7173_s5 + $0x18] sm:$0xff]  ;;  %s5558_s5 = smov 16  }
 0x658   :  { %779 = vrot.lane.b32.xlu1 %v777_v20, %s5546_s24 }
 0x6ca   :  { %v6055_v21 = vpop.permute.xlu1 %779 }
 0x6cb   :  { %4724 = vmatmul.mubr.msk.f32.vlgmr.msra.gmra.mxu1 %vm579_vm3, %v6055_v21 }
 0x6cc   :  { %4727 = vmatpush3.msra.mxu1 %v5917_v42  ;;  %4734 = vmatprep.mubr.msk.f32.mxu1 %vm5544_vm0, %v5543_v1 }
 0x6cd   :  { %4728 = vmatprep.subr.mxu1 %v5543_v1 }
 0x6ce   :  { %4729 = vmatpush3.msra.mxu1 %v5924_v43 }
 0x6cf   :  { %4730 = vmatprep.subr.mxu1 %v5543_v1 }
 0x6d0   :  { %4731 = vmatpush3.msra.mxu1 %v5930_v44 }
 0x6d1   :  { %4732 = vmatprep.subr.mxu1 %v5543_v1 }
 0x6d2   :  { %4733 = vmatpush3.msra.mxu1 %v5937_v45 }
 0x6d3   :  { %4737 = vmatprep.subr.mxu1 %v5543_v1 }
 0x78b   :  { %v849_v22 = vpop.f32.mrf.mxu1 }
 0x78c   :  { %v853_v58 = vadd.f32 %v849_v22, %v6023_v30 }
 0x78d   :  { %v4725_v23 = vpop.f32.mrf.mxu1 }
 0x78e   :  { %5243 = vtanh.f32 %v853_v58  ;;  %v4188_v24 = vmul.f32 -1.442695, %v853_v58 }
 0x790   :  { %5245 = vpow2.f32 %v4188_v24 }
 0x79b   :  { %v5244_v8 = vpop.eup %5243 }
 0x79c   :  { %863 = vrot.lane.b32.xlu0 %v5244_v8, %s5545_s21 }
 0x79d   :  { %v5246_v25 = vpop.eup %5245 }
 0x79e   :  { %v857_v26 = vadd.f32 1.0, %v5246_v25 }
 0x7a0   :  { %5247 = vrcp.f32 %v857_v26 }
 0x7ad   :  { %v5248_v27 = vpop.eup %5247 }
 0x7ae   :  { %v861_v31 = vmul.f32 %v5248_v27, %v771_v11 }
 0x80e   :  { %v864_v28 = vpop.permute.xlu0 %863 }
 0x80f   :  { %v866_v29 = vmul.f32 %v5248_v27, %v864_v28 }
 0x811   :  { %868 = vrot.lane.b32.xlu1 %v866_v29, %s5545_s21 }
 0x883   :  { %v869_v32 = vpop.permute.xlu1 %868 }
 0x884   :  { %v871_v34 = vadd.f32 %v869_v32, %v861_v31 }
 0x886   :  { %5249 = vtanh.f32 %v871_v34 }
 0x893   :  { %v5250_v30 = vpop.eup %5249 }
 0x894   :  { %874 = vrot.lane.b32.xlu0 %v5250_v30, %s5545_s21 }
 0x906   :  { %v875_v35 = vpop.permute.xlu0 %874 }
 0x907   :  { %v877_v37 = vmul.f32 %v5248_v27, %v875_v35 }
 0x909   :  { %879 = vrot.lane.b32.xlu1 %v877_v37, %s5546_s24 }
 0x97b   :  { %v6074_v38 = vpop.permute.xlu1 %879 }
 0x97c   :  { %4735 = vmatmul.mubr.msk.f32.vlgmr.msra.gmra.mxu1 %vm579_vm3, %v6074_v38 }
 0x97d   :  { %4738 = vmatpush3.msra.mxu1 %v5917_v42  ;;  %4745 = vmatprep.mubr.msk.f32.mxu1 %vm5544_vm0, %v5543_v1 }
 0x97e   :  { %4739 = vmatprep.subr.mxu1 %v5543_v1 }
 0x97f   :  { %4740 = vmatpush3.msra.mxu1 %v5924_v43 }
 0x980   :  { %4741 = vmatprep.subr.mxu1 %v5543_v1 }
 0x981   :  { %4742 = vmatpush3.msra.mxu1 %v5930_v44 }
 0x982   :  { %4743 = vmatprep.subr.mxu1 %v5543_v1 }
 0x983   :  { %4744 = vmatpush3.msra.mxu1 %v5937_v45 }
 0x984   :  { %4748 = vmatprep.subr.mxu1 %v5543_v1 }
 0xa3c   :  { %v949_v40 = vpop.f32.mrf.mxu1 }
 0xa3d   :  { %v953_v41 = vadd.f32 %v949_v40, %v6025_v33  ;;  %v6163_v40 = vld [vmem:[#allocation3 + $0x18] sm:$0xff] }
 0xa3e   :  { %v4736_v47 = vpop.f32.mrf.mxu1 }
 0xa3f   :  { %5251 = vtanh.f32 %v953_v41  ;;  %v4190_v49 = vmul.f32 -1.442695, %v953_v41  ;;  %v6166_v41 = vld [vmem:[#allocation3 + $0x10] sm:$0xff]  ;;  %v6170_v47 = vld [vmem:[#allocation3 + $0x8] sm:$0xff] }
 0xa41   :  { %5253 = vpow2.f32 %v4190_v49 }
 0xa4c   :  { %v5252_v48 = vpop.eup %5251 }
 0xa4d   :  { %963 = vrot.lane.b32.xlu0 %v5252_v48, %s5545_s21  ;;  %v6174_v48 = vld [vmem:[#allocation3] sm:$0xff] }
 0xa4e   :  { %v5254_v50 = vpop.eup %5253 }
 0xa4f   :  { %v957_v51 = vadd.f32 1.0, %v5254_v50 }
 0xa51   :  { %5255 = vrcp.f32 %v957_v51 }
 0xa5e   :  { %v5256_v52 = vpop.eup %5255 }
 0xa5f   :  { %v961_v57 = vmul.f32 %v5256_v52, %v871_v34 }
 0xabf   :  { %v964_v53 = vpop.permute.xlu0 %963 }
 0xac0   :  { %v966_v55 = vmul.f32 %v5256_v52, %v964_v53 }
 0xac2   :  { %968 = vrot.lane.b32.xlu1 %v966_v55, %s5545_s21 }
 0xb34   :  { %v969_v59 = vpop.permute.xlu1 %968 }
 0xb35   :  { %v971_v60 = vadd.f32 %v969_v59, %v961_v57 }
 0xb37   :  { %5257 = vtanh.f32 %v971_v60 }
 0xb44   :  { %v5258_v33 = vpop.eup %5257 }
 0xb45   :  { %974 = vrot.lane.b32.xlu0 %v5258_v33, %s5545_s21 }
 0xbb7   :  { %v975_v61 = vpop.permute.xlu0 %974 }
 0xbb8   :  { %v977_v62 = vmul.f32 %v5256_v52, %v975_v61 }
 0xbba   :  { %979 = vrot.lane.b32.xlu1 %v977_v62, %s5546_s24 }
 0xc2c   :  { %v980_v54 = vpop.permute.xlu1 %979 }
 0xc2d   :  { %4746 = vmatmul.mubr.msk.f32.vlgmr.msra.gmra.mxu1 %vm579_vm3, %v980_v54 }
 0xc2e   :  { %4749 = vmatpush3.msra.mxu1 %v5917_v42  ;;  %4756 = vmatprep.mubr.msk.f32.mxu1 %vm5544_vm0, %v5543_v1 }
 0xc2f   :  { %4750 = vmatprep.subr.mxu1 %v5543_v1 }
 0xc30   :  { %4751 = vmatpush3.msra.mxu1 %v5924_v43 }
 0xc31   :  { %4752 = vmatprep.subr.mxu1 %v5543_v1 }
 0xc32   :  { %4753 = vmatpush3.msra.mxu1 %v5930_v44 }
 0xc33   :  { %4754 = vmatprep.subr.mxu1 %v5543_v1 }
 0xc34   :  { %4755 = vmatpush3.msra.mxu1 %v5937_v45 }
 0xc35   :  { %4770 = vmatprep.subr.mxu1 %v5543_v1 }
 0xced   :  { %v1049_v63 = vpop.f32.mrf.mxu1 }
 0xcee   :  { %v1053_v42 = vadd.f32 %v1049_v63, %v6027_v36 }
 0xcef   :  { %v4747_v0 = vpop.f32.mrf.mxu1 }
 0xcf0   :  { %5259 = vtanh.f32 %v1053_v42  ;;  %v4192_v3 = vmul.f32 -1.442695, %v1053_v42 }
 0xcf2   :  { %5261 = vpow2.f32 %v4192_v3 }
 0xcfd   :  { %v5260_v2 = vpop.eup %5259 }
 0xcfe   :  { %1063 = vrot.lane.b32.xlu0 %v5260_v2, %s5545_s21 }
 0xcff   :  { %v5262_v43 = vpop.eup %5261 }
 0xd00   :  { %v1057_v5 = vadd.f32 1.0, %v5262_v43 }
 0xd02   :  { %5263 = vrcp.f32 %v1057_v5 }
 0xd0f   :  { %v5264_v44 = vpop.eup %5263 }
 0xd10   :  { %v1061_v45 = vmul.f32 %v5264_v44, %v971_v60  ;;  %v6213_v60 = vld [vmem:[%s7137_s8] ss:$0 sm:$0xff] }
 0xd70   :  { %v1064_v6 = vpop.permute.xlu0 %1063 }
 0xd71   :  { %v1066_v7 = vmul.f32 %v5264_v44, %v1064_v6 }
 0xd73   :  { %1068 = vrot.lane.b32.xlu1 %v1066_v7, %s5545_s21 }
 0xde5   :  { %v1069_v9 = vpop.permute.xlu1 %1068 }
 0xde6   :  { %v1071_v10 = vadd.f32 %v1069_v9, %v1061_v45 }
 0xde8   :  { %5265 = vtanh.f32 %v1071_v10 }
 0xdf5   :  { %v5266_v36 = vpop.eup %5265 }
 0xdf6   :  { %1074 = vrot.lane.b32.xlu0 %v5266_v36, %s5545_s21 }
 0xe68   :  { %v1075_v56 = vpop.permute.xlu0 %1074 }
 0xe69   :  { %v1077_v12 = vmul.f32 %v5264_v44, %v1075_v56 }
 0xe6b   :  { %1079 = vrot.lane.b32.xlu1 %v1077_v12, %s5546_s24 }
 0xedd   :  { %v1080_v14 = vpop.permute.xlu1 %1079 }
 0xede   :  { %4757 = vmatmul.mubr.msk.f32.vlgmr.msra.gmra.mxu1 %vm579_vm3, %v1080_v14 }
 0xedf   :  { %4771 = vmatpush3.msra.mxu1 %v1281_v13  ;;  %4778 = vmatprep.mubr.msk.f32.mxu1 %vm5544_vm0, %v5543_v1 }
 0xee0   :  { %4772 = vmatprep.subr.mxu1 %v5543_v1 }
 0xee1   :  { %4773 = vmatpush3.msra.mxu1 %v1280_v15 }
 0xee2   :  { %4774 = vmatprep.subr.mxu1 %v5543_v1 }
 0xee3   :  { %4775 = vmatpush3.msra.mxu1 %v1279_v16 }
 0xee4   :  { %4776 = vmatprep.subr.mxu1 %v5543_v1 }
 0xee5   :  { %4777 = vmatpush3.msra.mxu1 %v1278_v17 }
 0xee6   :  { %4779 = vmatmul.mubr.msk.f32.vlgmr.msra.gmra.mxu1 %vm579_vm3, %v6037_v4  ;;  %4832 = vmatprep.subr.mxu1 %v5543_v1 }
 0xee7   :  { %4781 = vmatprep.mubr.msk.f32.mxu1 %vm5544_vm0, %v5543_v1  ;;  %4833 = vmatpush3.msra.mxu1 %v6163_v40 }
 0xee8   :  { %4834 = vmatprep.subr.mxu1 %v5543_v1 }
 0xee9   :  { %4835 = vmatpush3.msra.mxu1 %v6166_v41 }
 0xeea   :  { %4782 = vmatmul.mubr.msk.f32.gmra.mxu1 %vm579_vm3, %v6055_v21  ;;  %4836 = vmatprep.subr.mxu1 %v5543_v1 }
 0xeeb   :  { %4784 = vmatprep.mubr.msk.f32.mxu1 %vm5544_vm0, %v5543_v1  ;;  %4837 = vmatpush3.msra.mxu1 %v6170_v47 }
 0xeec   :  { %4838 = vmatprep.subr.mxu1 %v5543_v1 }
 0xeed   :  { %4839 = vmatpush3.msra.mxu1 %v6174_v48 }
 0xeee   :  { %4785 = vmatmul.mubr.msk.f32.gmra.mxu1 %vm579_vm3, %v6074_v38  ;;  %4854 = vmatprep.subr.mxu1 %v5543_v1 }
 0xeef   :  { %4787 = vmatprep.mubr.msk.f32.mxu1 %vm5544_vm0, %v5543_v1 }
 0xef2   :  { %4788 = vmatmul.mubr.msk.f32.gmra.mxu1 %vm579_vm3, %v980_v54 }
 0xef3   :  { %4790 = vmatprep.mubr.msk.f32.mxu1 %vm5544_vm0, %v5543_v1 }
 0xef6   :  { %4791 = vmatmul.mubr.msk.f32.gmra.mxu1 %vm579_vm3, %v1080_v14 }
 0xef7   :  { %4793 = vmatprep.mubr.msk.f32.mxu1 %vm5544_vm0, %v5543_v1 }
 0xf9e   :  { %v1149_v4 = vpop.f32.mrf.mxu1 }
 0xf9f   :  { %v1153_v11 = vadd.f32 %v1149_v4, %v6029_v39 }
 0xfa0   :  { %v4758_v18 = vpop.f32.mrf.mxu1 }
 0xfa1   :  { %5267 = vtanh.f32 %v1153_v11  ;;  %v4194_v27 = vmul.f32 -1.442695, %v1153_v11 }
 0xfa3   :  { %5269 = vpow2.f32 %v4194_v27 }
 0xfa6   :  { %v6147_v19 = vpop.f32.mrf.mxu1 }
 0xfa7   :  { %v1361_v33 = vadd.f32 %v6213_v60, %v6147_v19 }
 0xfa8   :  { %v4780_v20 = vpop.f32.mrf.mxu1 }
 0xfaa   :  { %v6149_v21 = vpop.f32.mrf.mxu1 }
 0xfab   :  { %v1366_v36 = vadd.f32 %v6213_v60, %v6149_v21 }
 0xfac   :  { %v4783_v22 = vpop.f32.mrf.mxu1 }
 0xfae   :  { %v5268_v58 = vpop.eup %5267  ;;  %v6151_v23 = vpop.f32.mrf.mxu1 }
 0xfaf   :  { %1163 = vrot.lane.b32.xlu0 %v5268_v58, %s5545_s21 }
 0xfb0   :  { %v4786_v8 = vpop.f32.mrf.mxu1  ;;  %v5270_v28 = vpop.eup %5269 }
 0xfb1   :  { %v1157_v29 = vadd.f32 1.0, %v5270_v28 }
 0xfb2   :  { %v6154_v24 = vpop.f32.mrf.mxu1 }
 0xfb3   :  { %5271 = vrcp.f32 %v1157_v29 }
 0xfb4   :  { %v4789_v25 = vpop.f32.mrf.mxu1 }
 0xfb6   :  { %v6156_v26 = vpop.f32.mrf.mxu1 }
 0xfb8   :  { %v4792_v39 = vpop.f32.mrf.mxu1 }
 0xfc0   :  { %v5272_v31 = vpop.eup %5271 }
 0xfc1   :  { %v1161_v30 = vmul.f32 %v5272_v31, %v1071_v10 }
0x1021   :  { %v1164_v32 = vpop.permute.xlu0 %1163 }
0x1022   :  { %v1166_v34 = vmul.f32 %v5272_v31, %v1164_v32 }
0x1024   :  { %1168 = vrot.lane.b32.xlu1 %v1166_v34, %s5545_s21 }
0x1096   :  { %v1169_v35 = vpop.permute.xlu1 %1168 }
0x1097   :  { %v6159_v37 = vadd.f32 %v1169_v35, %v1161_v30 }
0x1099   :  { %5273 = vtanh.f32 %v6159_v37 }
0x10a6   :  { %v5274_v38 = vpop.eup %5273 }
0x10a7   :  { %1174 = vrot.lane.b32.xlu0 %v5274_v38, %s5545_s21 }
0x1119   :  { %v1175_v49 = vpop.permute.xlu0 %1174 }
0x111a   :  { %v1177_v50 = vmul.f32 %v5272_v31, %v1175_v49 }
0x111c   :  { %1179 = vrot.lane.b32.xlu1 %v1177_v50, %s5546_s24 }
0x118e   :  { %v1180_v51 = vpop.permute.xlu1 %1179 }
0x118f   :  { %4768 = vmatmul.mubr.msk.f32.vlgmr.msra.gmra.mxu0 %vm579_vm3, %v1180_v51  ;;  %4794 = vmatmul.mubr.msk.f32.gmra.mxu1 %vm579_vm3, %v1180_v51  ;;  %v1371_v51 = vadd.f32 %v6213_v60, %v6151_v23 }
0x1190   :  { %4800 = vmatpush3.msra.mxu0 %v6163_v40  ;;  %4807 = vmatprep.mubr.msk.f32.mxu0 %vm5544_vm0, %v5543_v1 }
0x1191   :  { %4801 = vmatprep.subr.mxu0 %v5543_v1  ;;  %4796 = vmatprep.mubr.msk.f32.mxu1 %vm5544_vm0, %v5543_v1 }
0x1192   :  { %4802 = vmatpush3.msra.mxu0 %v6166_v41 }
0x1193   :  { %4803 = vmatprep.subr.mxu0 %v5543_v1 }
0x1194   :  { %4804 = vmatpush3.msra.mxu0 %v6170_v47 }
0x1195   :  { %4805 = vmatprep.subr.mxu0 %v5543_v1 }
0x1196   :  { %4806 = vmatpush3.msra.mxu0 %v6174_v48 }
0x1197   :  { %4808 = vmatmul.mubr.f32.vlgmr.msra.gmra.mxu0 %v5543_v1  ;;  %4810 = vmatprep.subr.mxu0 %v5543_v1 }
0x1198   :  { %4811 = vmatpush3.msra.mxu0 %v6163_v40  ;;  %4818 = vmatprep.mubr.msk.f32.mxu0 %vm5544_vm0, %v5543_v1 }
0x1199   :  { %4812 = vmatprep.subr.mxu0 %v5543_v1 }
0x119a   :  { %4813 = vmatpush3.msra.mxu0 %v6166_v41 }
0x119b   :  { %4814 = vmatprep.subr.mxu0 %v5543_v1 }
0x119c   :  { %4815 = vmatpush3.msra.mxu0 %v6170_v47 }
0x119d   :  { %4816 = vmatprep.subr.mxu0 %v5543_v1 }
0x119e   :  { %4817 = vmatpush3.msra.mxu0 %v6174_v48 }
0x119f   :  { %4821 = vmatprep.subr.mxu0 %v5543_v1 }
0x124f   :  { %v1249_v52 = vpop.f32.mrf.mxu0  ;;  %v6205_v53 = vpop.f32.mrf.mxu1 }
0x1250   :  { %v6208_v55 = vadd.f32 %v1249_v52, %v6031_v46 }
0x1251   :  { %v4769_v57 = vpop.f32.mrf.mxu0  ;;  %v4795_v59 = vpop.f32.mrf.mxu1 }
0x1252   :  { %v4196_v8 = vmul.f32 -1.442695, %v6208_v55 }
0x1257   :  { %v1464_v61 = vpop.f32.mrf.mxu0 }
0x1258   :  { %v1468_v62 = vadd.f32 %v1464_v61, %v1361_v33 }
0x1259   :  { %v4809_v54 = vpop.f32.mrf.mxu0 }
0x125a   :  { %5275 = vtanh.f32 %v1468_v62  ;;  %v4205_v42 = vmul.f32 -1.442695, %v1468_v62 }
0x125c   :  { %5277 = vpow2.f32 %v4205_v42 }
0x1267   :  { %v5276_v63 = vpop.eup %5275 }
0x1268   :  { %1478 = vrot.lane.b32.xlu0 %v5276_v63, %s5545_s21 }
0x1269   :  { %v5278_v46 = vpop.eup %5277 }
0x126a   :  { %v1472_v0 = vadd.f32 1.0, %v5278_v46 }
0x126c   :  { %5279 = vrcp.f32 %v1472_v0 }
0x1279   :  { %v5280_v2 = vpop.eup %5279 }
0x127a   :  { %v1476_v5 = vmul.f32 0.0, %v5280_v2 }
0x12da   :  { %v1479_v3 = vpop.permute.xlu0 %1478 }
0x12db   :  { %v1481_v43 = vmul.f32 %v5280_v2, %v1479_v3 }
0x12dd   :  { %1483 = vrot.lane.b32.xlu1 %v1481_v43, %s5545_s21 }
0x134f   :  { %v1484_v44 = vpop.permute.xlu1 %1483 }
0x1350   :  { %v1486_v6 = vadd.f32 %v1484_v44, %v1476_v5 }
0x1352   :  { %5281 = vtanh.f32 %v1486_v6 }
0x135f   :  { %v5282_v7 = vpop.eup %5281 }
0x1360   :  { %1489 = vrot.lane.b32.xlu0 %v5282_v7, %s5545_s21 }
0x13d2   :  { %v1490_v45 = vpop.permute.xlu0 %1489 }
0x13d3   :  { %v1492_v9 = vmul.f32 %v5280_v2, %v1490_v45  ;;  %v1376_v45 = vadd.f32 %v6213_v60, %v6154_v24 }
0x13d5   :  { %1494 = vrot.lane.b32.xlu1 %v1492_v9, %s5546_s24 }
0x1447   :  { %v6221_v10 = vpop.permute.xlu1 %1494 }
0x1448   :  { %4819 = vmatmul.mubr.msk.f32.vlgmr.msra.gmra.mxu0 %vm579_vm3, %v6221_v10 }
0x1449   :  { %4822 = vmatpush3.msra.mxu0 %v6163_v40  ;;  %4829 = vmatprep.mubr.msk.f32.mxu0 %vm5544_vm0, %v5543_v1 }
0x144a   :  { %4823 = vmatprep.subr.mxu0 %v5543_v1 }
0x144b   :  { %4824 = vmatpush3.msra.mxu0 %v6166_v41 }
0x144c   :  { %4825 = vmatprep.subr.mxu0 %v5543_v1 }
0x144d   :  { %4826 = vmatpush3.msra.mxu0 %v6170_v47 }
0x144e   :  { %4827 = vmatprep.subr.mxu0 %v5543_v1 }
0x144f   :  { %4828 = vmatpush3.msra.mxu0 %v6174_v48 }
0x1450   :  { %4843 = vmatprep.subr.mxu0 %v5543_v1 }
0x1508   :  { %v1564_v56 = vpop.f32.mrf.mxu0 }
0x1509   :  { %v1568_v12 = vadd.f32 %v1564_v56, %v1366_v36 }
0x150a   :  { %v4820_v13 = vpop.f32.mrf.mxu0 }
0x150b   :  { %5283 = vtanh.f32 %v1568_v12  ;;  %v4207_v15 = vmul.f32 -1.442695, %v1568_v12 }
0x150d   :  { %5285 = vpow2.f32 %v4207_v15 }
0x1518   :  { %v5284_v14 = vpop.eup %5283 }
0x1519   :  { %1578 = vrot.lane.b32.xlu0 %v5284_v14, %s5545_s21 }
0x151a   :  { %v5286_v16 = vpop.eup %5285 }
0x151b   :  { %v1572_v17 = vadd.f32 1.0, %v5286_v16 }
0x151d   :  { %5287 = vrcp.f32 %v1572_v17 }
0x152a   :  { %v5288_v4 = vpop.eup %5287 }
0x152b   :  { %v1576_v19 = vmul.f32 %v5288_v4, %v1486_v6 }
0x158b   :  { %v1579_v11 = vpop.permute.xlu0 %1578 }
0x158c   :  { %v1581_v18 = vmul.f32 %v5288_v4, %v1579_v11 }
0x158e   :  { %1583 = vrot.lane.b32.xlu1 %v1581_v18, %s5545_s21 }
0x1600   :  { %v1584_v20 = vpop.permute.xlu1 %1583 }
0x1601   :  { %v1586_v21 = vadd.f32 %v1584_v20, %v1576_v19 }
0x1603   :  { %5289 = vtanh.f32 %v1586_v21 }
0x1604   :  { %5291 = vtanh.f32 %v6208_v55 }
0x1605   :  { %5293 = vpow2.f32 %v4196_v8 }
0x1610   :  { %v5290_v22 = vpop.eup %5289 }
0x1611   :  { %1589 = vrot.lane.b32.xlu0 %v5290_v22, %s5545_s21  ;;  %v5292_v58 = vpop.eup %5291 }
0x1612   :  { %v5294_v25 = vpop.eup %5293 }
0x1613   :  { %v1257_v39 = vadd.f32 1.0, %v5294_v25 }
0x1615   :  { %1263 = vrot.lane.b32.xlu0 %v5292_v58, %s5545_s21  ;;  %5295 = vrcp.f32 %v1257_v39 }
0x1622   :  { %v5296_v29 = vpop.eup %5295 }
0x1623   :  { %v1261_v30 = vmul.f32 %v5296_v29, %v6159_v37 }
0x1683   :  { %v1590_v27 = vpop.permute.xlu0 %1589 }
0x1684   :  { %v1592_v28 = vmul.f32 %v5288_v4, %v1590_v27 }
0x1686   :  { %1594 = vrot.lane.b32.xlu1 %v1592_v28, %s5546_s24 }
0x1687   :  { %v1264_v31 = vpop.permute.xlu0 %1263 }
0x1688   :  { %v1266_v32 = vmul.f32 %v5296_v29, %v1264_v31 }
0x168a   :  { %1268 = vrot.lane.b32.xlu0 %v1266_v32, %s5545_s21 }
0x16f8   :  { %v6245_v34 = vpop.permute.xlu1 %1594 }
0x16f9   :  { %4830 = vmatmul.mubr.msk.f32.vlgmr.msra.gmra.mxu0 %vm579_vm3, %v6245_v34 }
0x16fa   :  { %4844 = vmatpush3.msra.mxu0 %v6163_v40  ;;  %4851 = vmatprep.mubr.msk.f32.mxu0 %vm5544_vm0, %v5543_v1 }
0x16fb   :  { %4845 = vmatprep.subr.mxu0 %v5543_v1 }
0x16fc   :  { %v1269_v35 = vpop.permute.xlu0 %1268  ;;  %4846 = vmatpush3.msra.mxu0 %v6166_v41 }
0x16fd   :  { %v1271_v38 = vadd.f32 %v1269_v35, %v1261_v30  ;;  %4847 = vmatprep.subr.mxu0 %v5543_v1 }
0x16fe   :  { %4848 = vmatpush3.msra.mxu0 %v6170_v47 }
0x16ff   :  { %5297 = vtanh.f32 %v1271_v38  ;;  %4849 = vmatprep.subr.mxu0 %v5543_v1 }
0x1700   :  { %4850 = vmatpush3.msra.mxu0 %v6174_v48 }
0x1701   :  { %4865 = vmatprep.subr.mxu0 %v5543_v1 }
0x170c   :  { %v5298_v49 = vpop.eup %5297 }
0x170d   :  { %1274 = vrot.lane.b32.xlu0 %v5298_v49, %s5545_s21  ;;  %v2096_v49 = vld [vmem:[%s7138_s9 + $0x18] sm:$0xff] }
0x177f   :  { %v1275_v37 = vpop.permute.xlu0 %1274 }
0x1780   :  { %v1277_v50 = vmul.f32 %v5296_v29, %v1275_v37 }
0x1782   :  { %1290 = vrot.lane.b32.xlu0 %v1277_v50, %s5546_s24  ;;  %v2095_v50 = vld [vmem:[%s7138_s9 + $0x10] sm:$0xff] }
0x17b9   :  { %v1664_v52 = vpop.f32.mrf.mxu0 }
0x17ba   :  { %v1668_v55 = vadd.f32 %v1664_v52, %v1371_v51  ;;  %v2094_v51 = vld [vmem:[%s7138_s9 + $0x8] sm:$0xff]  ;;  %v2093_v52 = vld [vmem:[%s7138_s9] sm:$0xff] }
0x17bb   :  { %v4831_v57 = vpop.f32.mrf.mxu0 }
0x17bc   :  { %5299 = vtanh.f32 %v1668_v55  ;;  %v4209_v61 = vmul.f32 -1.442695, %v1668_v55 }
0x17be   :  { %5301 = vpow2.f32 %v4209_v61 }
0x17c9   :  { %v5300_v59 = vpop.eup %5299 }
0x17ca   :  { %1678 = vrot.lane.b32.xlu1 %v5300_v59, %s5545_s21 }
0x17cb   :  { %v5302_v62 = vpop.eup %5301 }
0x17cc   :  { %v1672_v54 = vadd.f32 1.0, %v5302_v62 }
0x17ce   :  { %5303 = vrcp.f32 %v1672_v54 }
0x17db   :  { %v5304_v63 = vpop.eup %5303 }
0x17dc   :  { %v1676_v46 = vmul.f32 %v5304_v63, %v1586_v21 }
0x17f4   :  { %v1291_v33 = vpop.permute.xlu0 %1290 }
0x17f5   :  { %4797 = vmatmul.mubr.msk.f32.gmra.mxu1 %vm579_vm3, %v1291_v33 }
0x17f6   :  { %4840 = vmatprep.mubr.msk.f32.mxu1 %vm5544_vm0, %v5543_v1 }
0x183c   :  { %v1679_v23 = vpop.permute.xlu1 %1678 }
0x183d   :  { %v1681_v42 = vmul.f32 %v5304_v63, %v1679_v23 }
0x183f   :  { %1683 = vrot.lane.b32.xlu1 %v1681_v42, %s5545_s21 }
0x18b1   :  { %v1684_v0 = vpop.permute.xlu1 %1683 }
0x18b2   :  { %v1686_v2 = vadd.f32 %v1684_v0, %v1676_v46 }
0x18b4   :  { %5305 = vtanh.f32 %v1686_v2 }
0x18b5   :  { %v6269_v3 = vpop.f32.mrf.mxu1 }
0x18b7   :  { %v4798_v43 = vpop.f32.mrf.mxu1 }
0x18c1   :  { %v5306_v5 = vpop.eup %5305 }
0x18c2   :  { %1689 = vrot.lane.b32.xlu1 %v5306_v5, %s5545_s21 }
0x1934   :  { %v1690_v44 = vpop.permute.xlu1 %1689 }
0x1935   :  { %v1692_v6 = vmul.f32 %v5304_v63, %v1690_v44 }
0x1937   :  { %1694 = vrot.lane.b32.xlu1 %v1692_v6, %s5546_s24 }
0x19a9   :  { %v6273_v7 = vpop.permute.xlu1 %1694 }
0x19aa   :  { %4841 = vmatmul.mubr.msk.f32.vlgmr.msra.gmra.mxu1 %vm579_vm3, %v6273_v7 }
0x19ab   :  { %4855 = vmatpush3.msra.mxu1 %v6163_v40  ;;  %4862 = vmatprep.mubr.msk.f32.mxu1 %vm5544_vm0, %v5543_v1 }
0x19ac   :  { %4856 = vmatprep.subr.mxu1 %v5543_v1 }
0x19ad   :  { %4857 = vmatpush3.msra.mxu1 %v6166_v41 }
0x19ae   :  { %4858 = vmatprep.subr.mxu1 %v5543_v1 }
0x19af   :  { %4859 = vmatpush3.msra.mxu1 %v6170_v47 }
0x19b0   :  { %4860 = vmatprep.subr.mxu1 %v5543_v1 }
0x19b1   :  { %4861 = vmatpush3.msra.mxu1 %v6174_v48 }
0x19b2   :  { %4876 = vmatprep.subr.mxu1 %v5543_v1 }
0x1a6a   :  { %v1764_v9 = vpop.f32.mrf.mxu1 }
0x1a6b   :  { %v1768_v36 = vadd.f32 %v1764_v9, %v1376_v45 }
0x1a6c   :  { %v4842_v56 = vpop.f32.mrf.mxu1 }
0x1a6d   :  { %5307 = vtanh.f32 %v1768_v36  ;;  %v4211_v13 = vmul.f32 -1.442695, %v1768_v36 }
0x1a6f   :  { %5309 = vpow2.f32 %v4211_v13 }
0x1a7a   :  { %v5308_v12 = vpop.eup %5307 }
0x1a7b   :  { %1778 = vrot.lane.b32.xlu0 %v5308_v12, %s5545_s21 }
0x1a7c   :  { %v5310_v14 = vpop.eup %5309 }
0x1a7d   :  { %v1772_v15 = vadd.f32 1.0, %v5310_v14 }
0x1a7f   :  { %5311 = vrcp.f32 %v1772_v15  ;;  %v1391_v15 = vadd.f32 %v6213_v60, %v6269_v3 }
0x1a8c   :  { %v5312_v16 = vpop.eup %5311 }
0x1a8d   :  { %v1776_v11 = vmul.f32 %v5312_v16, %v1686_v2 }
0x1aed   :  { %v1779_v17 = vpop.permute.xlu0 %1778 }
0x1aee   :  { %v1781_v4 = vmul.f32 %v5312_v16, %v1779_v17 }
0x1af0   :  { %1783 = vrot.lane.b32.xlu1 %v1781_v4, %s5545_s21 }
0x1b62   :  { %v1784_v18 = vpop.permute.xlu1 %1783 }
0x1b63   :  { %v1786_v24 = vadd.f32 %v1784_v18, %v1776_v11 }
0x1b65   :  { %5313 = vtanh.f32 %v1786_v24 }
0x1b72   :  { %v5314_v19 = vpop.eup %5313 }
0x1b73   :  { %1789 = vrot.lane.b32.xlu0 %v5314_v19, %s5545_s21 }
0x1be5   :  { %v1790_v20 = vpop.permute.xlu0 %1789 }
0x1be6   :  { %v1792_v21 = vmul.f32 %v5312_v16, %v1790_v20 }
0x1be8   :  { %1794 = vrot.lane.b32.xlu1 %v1792_v21, %s5546_s24 }
0x1c5a   :  { %v1795_v22 = vpop.permute.xlu1 %1794 }
0x1c5b   :  { %4852 = vmatmul.mubr.msk.f32.vlgmr.msra.gmra.mxu0 %vm579_vm3, %v1795_v22 }
0x1c5c   :  { %4866 = vmatpush3.msra.mxu0 %v6163_v40  ;;  %4873 = vmatprep.mubr.msk.f32.mxu0 %vm5544_vm0, %v5543_v1  ;;  %v1381_v40 = vadd.f32 %v6213_v60, %v6156_v26 }
0x1c5d   :  { %4867 = vmatprep.subr.mxu0 %v5543_v1 }
0x1c5e   :  { %4868 = vmatpush3.msra.mxu0 %v6166_v41 }
0x1c5f   :  { %4869 = vmatprep.subr.mxu0 %v5543_v1 }
0x1c60   :  { %4870 = vmatpush3.msra.mxu0 %v6170_v47 }
0x1c61   :  { %4871 = vmatprep.subr.mxu0 %v5543_v1 }
0x1c62   :  { %4872 = vmatpush3.msra.mxu0 %v6174_v48 }
0x1c63   :  { %4905 = vmatprep.subr.mxu0 %v5543_v1 }
0x1d1b   :  { %v1864_v58 = vpop.f32.mrf.mxu0 }
0x1d1c   :  { %v1868_v8 = vadd.f32 %v1864_v58, %v1381_v40 }
0x1d1d   :  { %v4853_v25 = vpop.f32.mrf.mxu0 }
0x1d1e   :  { %5315 = vtanh.f32 %v1868_v8  ;;  %v4213_v41 = vmul.f32 -1.442695, %v1868_v8 }
0x1d20   :  { %5317 = vpow2.f32 %v4213_v41 }
0x1d2b   :  { %v5316_v39 = vpop.eup %5315 }
0x1d2c   :  { %1878 = vrot.lane.b32.xlu0 %v5316_v39, %s5545_s21  ;;  %v4218_v39 = vld [vmem:[%s7139_s10] ss:$0 sm:$0xff]  ;;  %s5549_s10 = smov 120  }
0x1d2d   :  { %v5318_v27 = vpop.eup %5317 }
0x1d2e   :  { %v1872_v47 = vadd.f32 1.0, %v5318_v27 }
0x1d30   :  { %5319 = vrcp.f32 %v1872_v47 }
0x1d3d   :  { %v5320_v28 = vpop.eup %5319 }
0x1d3e   :  { %v1876_v31 = vmul.f32 %v5320_v28, %v1786_v24 }
0x1d9e   :  { %v1879_v29 = vpop.permute.xlu0 %1878 }
0x1d9f   :  { %v1881_v48 = vmul.f32 %v5320_v28, %v1879_v29 }
0x1da1   :  { %1883 = vrot.lane.b32.xlu1 %v1881_v48, %s5545_s21 }
0x1e13   :  { %v1884_v32 = vpop.permute.xlu1 %1883 }
0x1e14   :  { %v1886_v26 = vadd.f32 %v1884_v32, %v1876_v31 }
0x1e16   :  { %5321 = vtanh.f32 %v1886_v26 }
0x1e23   :  { %v5322_v30 = vpop.eup %5321 }
0x1e24   :  { %1889 = vrot.lane.b32.xlu0 %v5322_v30, %s5545_s21 }
0x1e96   :  { %v1890_v35 = vpop.permute.xlu0 %1889 }
0x1e97   :  { %v1892_v38 = vmul.f32 %v5320_v28, %v1890_v35 }
0x1e99   :  { %1894 = vrot.lane.b32.xlu1 %v1892_v38, %s5546_s24 }
0x1f0b   :  { %v1895_v37 = vpop.permute.xlu1 %1894 }
0x1f0c   :  { %4863 = vmatmul.mubr.msk.f32.vlgmr.msra.gmra.mxu1 %vm579_vm3, %v1895_v37 }
0x1f0d   :  { %4877 = vmatpush3.msra.mxu1 %v2096_v49  ;;  %4884 = vmatprep.mubr.msk.f32.mxu1 %vm5544_vm0, %v5543_v1 }
0x1f0e   :  { %4878 = vmatprep.subr.mxu1 %v5543_v1 }
0x1f0f   :  { %4879 = vmatpush3.msra.mxu1 %v2095_v50 }
0x1f10   :  { %4880 = vmatprep.subr.mxu1 %v5543_v1 }
0x1f11   :  { %4881 = vmatpush3.msra.mxu1 %v2094_v51 }
0x1f12   :  { %4882 = vmatprep.subr.mxu1 %v5543_v1 }
0x1f13   :  { %4883 = vmatpush3.msra.mxu1 %v2093_v52 }
0x1f14   :  { %4885 = vmatmul.mubr.msk.f32.vlgmr.msra.gmra.mxu1 %vm579_vm3, %v6221_v10  ;;  %4940 = vmatprep.subr.mxu1 %v5543_v1  ;;  %v1386_v10 = vadd.f32 %v6213_v60, %v6205_v53 }
0x1f15   :  { %4887 = vmatprep.mubr.msk.f32.mxu1 %vm5544_vm0, %v5543_v1 }
0x1f18   :  { %4888 = vmatmul.mubr.msk.f32.gmra.mxu1 %vm579_vm3, %v6245_v34 }
0x1f19   :  { %4890 = vmatprep.mubr.msk.f32.mxu1 %vm5544_vm0, %v5543_v1 }
0x1f1c   :  { %4891 = vmatmul.mubr.msk.f32.gmra.mxu1 %vm579_vm3, %v6273_v7 }
0x1f1d   :  { %4893 = vmatprep.mubr.msk.f32.mxu1 %vm5544_vm0, %v5543_v1 }
0x1f20   :  { %4894 = vmatmul.mubr.msk.f32.gmra.mxu1 %vm579_vm3, %v1795_v22 }
0x1f21   :  { %4896 = vmatprep.mubr.msk.f32.mxu1 %vm5544_vm0, %v5543_v1 }
0x1f24   :  { %4897 = vmatmul.mubr.msk.f32.gmra.mxu1 %vm579_vm3, %v1895_v37 }
0x1f25   :  { %4899 = vmatprep.mubr.msk.f32.mxu1 %vm5544_vm0, %v5543_v1 }
0x1fcc   :  { %v1964_v34 = vpop.f32.mrf.mxu1 }
0x1fcd   :  { %v1968_v55 = vadd.f32 %v1964_v34, %v1386_v10 }
0x1fce   :  { %v4864_v57 = vpop.f32.mrf.mxu1 }
0x1fcf   :  { %5323 = vtanh.f32 %v1968_v55  ;;  %v4215_v2 = vmul.f32 -1.442695, %v1968_v55 }
0x1fd1   :  { %5325 = vpow2.f32 %v4215_v2 }
0x1fd4   :  { %v6349_v59 = vpop.f32.mrf.mxu1 }
0x1fd5   :  { %v6404_v38 = vadd.f32 %v4218_v39, %v6349_v59 }
0x1fd6   :  { %v4886_v33 = vpop.f32.mrf.mxu1 }
0x1fd8   :  { %v6351_v61 = vpop.f32.mrf.mxu1 }
0x1fd9   :  { %v6399_v35 = vadd.f32 %v4218_v39, %v6351_v61 }
0x1fda   :  { %v4889_v62 = vpop.f32.mrf.mxu1 }
0x1fdc   :  { %v5324_v54 = vpop.eup %5323  ;;  %v6353_v63 = vpop.f32.mrf.mxu1 }
0x1fdd   :  { %1978 = vrot.lane.b32.xlu0 %v5324_v54, %s5545_s21  ;;  %v6394_v30 = vadd.f32 %v4218_v39, %v6353_v63 }
0x1fde   :  { %v4892_v23 = vpop.f32.mrf.mxu1  ;;  %v5326_v43 = vpop.eup %5325 }
0x1fdf   :  { %v1972_v5 = vadd.f32 1.0, %v5326_v43 }
0x1fe0   :  { %v2190_v42 = vpop.f32.mrf.mxu1 }
0x1fe1   :  { %5327 = vrcp.f32 %v1972_v5  ;;  %v6379_v47 = vadd.f32 %v4218_v39, %v2190_v42 }
0x1fe2   :  { %v4895_v46 = vpop.f32.mrf.mxu1 }
0x1fe4   :  { %v2195_v0 = vpop.f32.mrf.mxu1 }
0x1fe5   :  { %v6376_v27 = vadd.f32 %v4218_v39, %v2195_v0 }
0x1fe6   :  { %v4898_v53 = vpop.f32.mrf.mxu1 }
0x1fee   :  { %v5328_v44 = vpop.eup %5327 }
0x1fef   :  { %v1976_v45 = vmul.f32 %v5328_v44, %v1886_v26 }
0x204f   :  { %v1979_v6 = vpop.permute.xlu0 %1978 }
0x2050   :  { %v1981_v7 = vmul.f32 %v5328_v44, %v1979_v6 }
0x2052   :  { %1983 = vrot.lane.b32.xlu1 %v1981_v7, %s5545_s21 }
0x20c4   :  { %v1984_v9 = vpop.permute.xlu1 %1983 }
0x20c5   :  { %v1986_v36 = vadd.f32 %v1984_v9, %v1976_v45 }
0x20c7   :  { %5329 = vtanh.f32 %v1986_v36 }
0x20d4   :  { %v5330_v56 = vpop.eup %5329 }
0x20d5   :  { %1989 = vrot.lane.b32.xlu0 %v5330_v56, %s5545_s21 }
0x2147   :  { %v1990_v12 = vpop.permute.xlu0 %1989 }
0x2148   :  { %v1992_v13 = vmul.f32 %v5328_v44, %v1990_v12 }
0x214a   :  { %1994 = vrot.lane.b32.xlu1 %v1992_v13, %s5546_s24 }
0x21bc   :  { %v1995_v14 = vpop.permute.xlu1 %1994 }
0x21bd   :  { %4874 = vmatmul.mubr.msk.f32.vlgmr.msra.gmra.mxu0 %vm579_vm3, %v1995_v14  ;;  %4900 = vmatmul.mubr.msk.f32.gmra.mxu1 %vm579_vm3, %v1995_v14 }
0x21be   :  { %4902 = vmatprep.mubr.msk.f32.mxu1 %vm5544_vm0, %v5543_v1  ;;  %4919 = vmatprep.mubr.msk.f32.mxu0 %vm5544_vm0, %v5543_v1 }
0x227d   :  { %v2064_v16 = vpop.f32.mrf.mxu0  ;;  %v2200_v17 = vpop.f32.mrf.mxu1 }
0x227e   :  { %v2068_v4 = vadd.f32 %v2064_v16, %v1391_v15  ;;  %v6373_v41 = vadd.f32 %v4218_v39, %v2200_v17 }
0x227f   :  { %v4875_v11 = vpop.f32.mrf.mxu0  ;;  %v4901_v18 = vpop.f32.mrf.mxu1 }
0x2280   :  { %5331 = vtanh.f32 %v2068_v4  ;;  %v4217_v19 = vmul.f32 -1.442695, %v2068_v4 }
0x2282   :  { %5333 = vpow2.f32 %v4217_v19 }
0x228d   :  { %v5332_v24 = vpop.eup %5331 }
0x228e   :  { %2078 = vrot.lane.b32.xlu0 %v5332_v24, %s5545_s21 }
0x228f   :  { %v5334_v20 = vpop.eup %5333 }
0x2290   :  { %v2072_v21 = vadd.f32 1.0, %v5334_v20 }
0x2292   :  { %5335 = vrcp.f32 %v2072_v21 }
0x229f   :  { %v5336_v22 = vpop.eup %5335 }
0x22a0   :  { %v2076_v60 = vmul.f32 %v5336_v22, %v1986_v36 }
0x2300   :  { %v2079_v40 = vpop.permute.xlu0 %2078 }
0x2301   :  { %v2081_v58 = vmul.f32 %v5336_v22, %v2079_v40 }
0x2303   :  { %2083 = vrot.lane.b32.xlu1 %v2081_v58, %s5545_s21 }
0x2375   :  { %v2084_v3 = vpop.permute.xlu1 %2083 }
0x2376   :  { %v2086_v8 = vadd.f32 %v2084_v3, %v2076_v60 }
0x2378   :  { %5337 = vtanh.f32 %v2086_v8 }
0x2385   :  { %v5338_v25 = vpop.eup %5337 }
0x2386   :  { %2089 = vrot.lane.b32.xlu0 %v5338_v25, %s5545_s21  ;;  %s5548_s21 = smov 88   ;;  %v6590_v25 = vld [vmem:[%s7142_s13] sm:$0xff] }
0x238a   :  { %2226 = vrot.lane.b32.xlu0 %v6373_v41, %s5547_s1 }
0x238e   :  { %2224 = vrot.lane.b32.xlu0 %v6376_v27, %s5547_s1 }
0x2392   :  { %2222 = vrot.lane.b32.xlu0 %v6379_v47, %s5547_s1 }
0x23f8   :  { %v2090_v28 = vpop.permute.xlu0 %2089 }
0x23f9   :  { %v2092_v29 = vmul.f32 %v5336_v22, %v2090_v28 }
0x23fb   :  { %2105 = vrot.lane.b32.xlu1 %v2092_v29, %s5546_s24 }
0x23fc   :  { %v2227_v49 = vpop.permute.xlu0 %2226 }
0x23ff   :  { %2383 = vrot.lane.b32.xlu1 %v6373_v41, %s5548_s21 }
0x2400   :  { %v2225_v50 = vpop.permute.xlu0 %2224 }
0x2403   :  { %2381 = vrot.lane.b32.xlu1 %v6376_v27, %s5548_s21 }
0x2404   :  { %v2223_v52 = vpop.permute.xlu0 %2222 }
0x2407   :  { %2379 = vrot.lane.b32.xlu1 %v6379_v47, %s5548_s21 }
0x246d   :  { %v2106_v48 = vpop.permute.xlu1 %2105 }
0x246e   :  { %4903 = vmatmul.mubr.msk.f32.gmra.mxu1 %vm579_vm3, %v2106_v48 }
0x246f   :  { %4954 = vmatprep.mubr.msk.f32.mxu1 %vm5544_vm0, %v5543_v1 }
0x2471   :  { %v2384_v37 = vpop.permute.xlu1 %2383 }
0x2475   :  { %v2382_v51 = vpop.permute.xlu1 %2381 }
0x2479   :  { %v2380_v10 = vpop.permute.xlu1 %2379 }
0x252e   :  { %v2205_v31 = vpop.f32.mrf.mxu1 }
0x252f   :  { %v6389_v32 = vadd.f32 %v4218_v39, %v2205_v31 }
0x2530   :  { %v4904_v26 = vpop.f32.mrf.mxu1 }
0x2531   :  { %2385 = vrot.lane.b32.xlu1 %v6389_v32, %s5548_s21  ;;  %2228 = vrot.lane.b32.xlu0 %v6389_v32, %s5547_s1 }
0x2535   :  { %2377 = vrot.lane.b32.xlu1 %v6394_v30, %s5548_s21  ;;  %2220 = vrot.lane.b32.xlu0 %v6394_v30, %s5547_s1 }
0x2539   :  { %2375 = vrot.lane.b32.xlu1 %v6399_v35, %s5548_s21  ;;  %2218 = vrot.lane.b32.xlu0 %v6399_v35, %s5547_s1 }
0x253d   :  { %2373 = vrot.lane.b32.xlu1 %v6404_v38, %s5548_s21  ;;  %2216 = vrot.lane.b32.xlu0 %v6404_v38, %s5547_s1 }
0x2541   :  { %2359 = vrot.lane.b32.xlu1 %v6404_v38, %s5549_s10  ;;  %2361 = vrot.lane.b32.xlu0 %v6399_v35, %s5549_s10 }
0x2545   :  { %2539 = vrot.lane.b32.xlu1 %v6373_v41, %s5550_s26  ;;  %2537 = vrot.lane.b32.xlu0 %v6376_v27, %s5550_s26 }
0x2549   :  { %2695 = vrot.lane.b32.xlu1 %v6373_v41, %s5551_s15  ;;  %2693 = vrot.lane.b32.xlu0 %v6376_v27, %s5551_s15 }
0x254d   :  { %2363 = vrot.lane.b32.xlu1 %v6394_v30, %s5549_s10  ;;  %2541 = vrot.lane.b32.xlu0 %v6389_v32, %s5550_s26 }
0x2551   :  { %2535 = vrot.lane.b32.xlu1 %v6379_v47, %s5550_s26  ;;  %2697 = vrot.lane.b32.xlu0 %v6389_v32, %s5551_s15 }
0x2555   :  { %2691 = vrot.lane.b32.xlu1 %v6379_v47, %s5551_s15  ;;  %2365 = vrot.lane.b32.xlu0 %v6379_v47, %s5549_s10 }
0x2559   :  { %2367 = vrot.lane.b32.xlu1 %v6376_v27, %s5549_s10  ;;  %2533 = vrot.lane.b32.xlu0 %v6394_v30, %s5550_s26 }
0x255d   :  { %2531 = vrot.lane.b32.xlu1 %v6399_v35, %s5550_s26  ;;  %2689 = vrot.lane.b32.xlu0 %v6394_v30, %s5551_s15 }
0x2561   :  { %2687 = vrot.lane.b32.xlu1 %v6399_v35, %s5551_s15  ;;  %2369 = vrot.lane.b32.xlu0 %v6373_v41, %s5549_s10 }
0x2565   :  { %2371 = vrot.lane.b32.xlu1 %v6389_v32, %s5549_s10  ;;  %2529 = vrot.lane.b32.xlu0 %v6404_v38, %s5550_s26 }
0x2569   :  { %2515 = vrot.lane.b32.xlu1 %v6404_v38, %s5552_s0  ;;  %2685 = vrot.lane.b32.xlu0 %v6404_v38, %s5551_s15 }
0x256d   :  { %2517 = vrot.lane.b32.xlu1 %v6399_v35, %s5552_s0  ;;  %2671 = vrot.lane.b32.xlu0 %v6404_v38, %s5553_s16 }
0x2571   :  { %2519 = vrot.lane.b32.xlu1 %v6394_v30, %s5552_s0  ;;  %2673 = vrot.lane.b32.xlu0 %v6399_v35, %s5553_s16 }
0x2575   :  { %2521 = vrot.lane.b32.xlu1 %v6379_v47, %s5552_s0  ;;  %2675 = vrot.lane.b32.xlu0 %v6394_v30, %s5553_s16 }
0x2579   :  { %2523 = vrot.lane.b32.xlu1 %v6376_v27, %s5552_s0  ;;  %2677 = vrot.lane.b32.xlu0 %v6379_v47, %s5553_s16 }
0x257d   :  { %2525 = vrot.lane.b32.xlu1 %v6373_v41, %s5552_s0  ;;  %2679 = vrot.lane.b32.xlu0 %v6376_v27, %s5553_s16 }
0x2581   :  { %2527 = vrot.lane.b32.xlu1 %v6389_v32, %s5552_s0  ;;  %2681 = vrot.lane.b32.xlu0 %v6373_v41, %s5553_s16 }
0x2585   :  { %2683 = vrot.lane.b32.xlu0 %v6389_v32, %s5553_s16 }
0x25a3   :  { %v2386_v34 = vpop.permute.xlu1 %2385  ;;  %v2229_v55 = vpop.permute.xlu0 %2228 }
0x25a4   :  { %4906 = vmatpush3.xpose.msk.msra.mxu0 %vm2230_vm4, %v2229_v55  ;;  %4941 = vmatpush3.xpose.msk.msra.mxu1 %vm2230_vm4, %v2386_v34 }
0x25a5   :  { %4942 = vmatprep.subr.mxu1 %v5543_v1  ;;  %4907 = vmatprep.subr.mxu0 %v5543_v1 }
0x25a7   :  { %v2378_v57 = vpop.permute.xlu1 %2377  ;;  %v2221_v59 = vpop.permute.xlu0 %2220 }
0x25a8   :  { %4908 = vmatpush3.xpose.msk.msra.mxu0 %vm2230_vm4, %v2227_v49  ;;  %4943 = vmatpush3.xpose.msk.msra.mxu1 %vm2230_vm4, %v2384_v37  ;;  %v6601_v49 = vld [vmem:[%s7142_s13 + $0x8] sm:$0xff] }
0x25a9   :  { %4944 = vmatprep.subr.mxu1 %v5543_v1  ;;  %4909 = vmatprep.subr.mxu0 %v5543_v1 }
0x25ab   :  { %v2376_v33 = vpop.permute.xlu1 %2375  ;;  %v2219_v61 = vpop.permute.xlu0 %2218 }
0x25ac   :  { %4910 = vmatpush3.xpose.msk.msra.mxu0 %vm2230_vm4, %v2225_v50  ;;  %4945 = vmatpush3.xpose.msk.msra.mxu1 %vm2230_vm4, %v2382_v51 }
0x25ad   :  { %4946 = vmatprep.subr.mxu1 %v5543_v1  ;;  %4911 = vmatprep.subr.mxu0 %v5543_v1 }
0x25af   :  { %v2374_v62 = vpop.permute.xlu1 %2373  ;;  %v2217_v54 = vpop.permute.xlu0 %2216 }
0x25b0   :  { %4912 = vmatpush3.xpose.msk.msra.mxu0 %vm2230_vm4, %v2223_v52  ;;  %4947 = vmatpush3.xpose.msk.msra.mxu1 %vm2230_vm4, %v2380_v10 }
0x25b1   :  { %4948 = vmatprep.subr.mxu1 %v5543_v1  ;;  %4913 = vmatprep.subr.mxu0 %v5543_v1 }
0x25b3   :  { %v2360_v63 = vpop.permute.xlu1 %2359  ;;  %v2362_v23 = vpop.permute.xlu0 %2361 }
0x25b4   :  { %4914 = vmatpush3.xpose.msk.msra.mxu0 %vm2230_vm4, %v2221_v59  ;;  %4949 = vmatpush3.xpose.msk.msra.mxu1 %vm2230_vm4, %v2378_v57  ;;  %v6616_v59 = vld [vmem:[%s7142_s13 + $0x10] sm:$0xff] }
0x25b5   :  { %4950 = vmatprep.subr.mxu1 %v5543_v1  ;;  %4915 = vmatprep.subr.mxu0 %v5543_v1 }
0x25b7   :  { %v2540_v42 = vpop.permute.xlu1 %2539  ;;  %v2538_v46 = vpop.permute.xlu0 %2537 }
0x25b8   :  { %4916 = vmatpush3.xpose.msk.msra.mxu0 %vm2230_vm4, %v2219_v61  ;;  %4951 = vmatpush3.xpose.msk.msra.mxu1 %vm2230_vm4, %v2376_v33 }
0x25b9   :  { %4952 = vmatprep.subr.mxu1 %v5543_v1  ;;  %4917 = vmatprep.subr.mxu0 %v5543_v1 }
0x25bb   :  { %v2696_v0 = vpop.permute.xlu1 %2695  ;;  %v2694_v53 = vpop.permute.xlu0 %2693 }
0x25bc   :  { %4918 = vmatpush3.xpose.msk.msra.mxu0 %vm2230_vm4, %v2217_v54  ;;  %4953 = vmatpush3.xpose.msk.msra.mxu1 %vm2230_vm4, %v2374_v62 }
0x25bd   :  { %4975 = vmatprep.subr.mxu0 %v5543_v1  ;;  %5010 = vmatprep.subr.mxu1 %v5543_v1 }
0x25bf   :  { %4955 = vmatmul.mubr.msk.f32.vlgmr.msra.gmra.mxu1 %vm2230_vm4, %v2360_v63  ;;  %v2364_v2 = vpop.permute.xlu1 %2363  ;;  %4920 = vmatmul.mubr.msk.f32.vlgmr.msra.gmra.mxu0 %vm2230_vm4, %v6404_v38  ;;  %v2542_v43 = vpop.permute.xlu0 %2541 }
0x25c0   :  { %4976 = vmatpush3.xpose.msk.msra.mxu0 %vm2230_vm4, %v2542_v43  ;;  %4922 = vmatprep.mubr.msk.f32.mxu0 %vm5544_vm0, %v5543_v1 }
0x25c1   :  { %4957 = vmatprep.mubr.msk.f32.mxu1 %vm5544_vm0, %v5543_v1  ;;  %4977 = vmatprep.subr.mxu0 %v5543_v1 }
0x25c3   :  { %v2536_v5 = vpop.permute.xlu1 %2535  ;;  %4923 = vmatmul.mubr.msk.f32.gmra.mxu0 %vm2230_vm4, %v6399_v35  ;;  %4958 = vmatmul.mubr.msk.f32.gmra.mxu1 %vm2230_vm4, %v2362_v23  ;;  %v2698_v44 = vpop.permute.xlu0 %2697 }
0x25c4   :  { %4978 = vmatpush3.xpose.msk.msra.mxu0 %vm2230_vm4, %v2540_v42  ;;  %5011 = vmatpush3.xpose.msk.msra.mxu1 %vm2230_vm4, %v2698_v44 }
0x25c5   :  { %4925 = vmatprep.mubr.msk.f32.mxu0 %vm5544_vm0, %v5543_v1  ;;  %4960 = vmatprep.mubr.msk.f32.mxu1 %vm5544_vm0, %v5543_v1 }
0x25c6   :  { %4979 = vmatprep.subr.mxu0 %v5543_v1  ;;  %5012 = vmatprep.subr.mxu1 %v5543_v1 }
0x25c7   :  { %v2692_v6 = vpop.permute.xlu1 %2691  ;;  %4926 = vmatmul.mubr.msk.f32.gmra.mxu0 %vm2230_vm4, %v6394_v30  ;;  %4961 = vmatmul.mubr.msk.f32.gmra.mxu1 %vm2230_vm4, %v2364_v2  ;;  %v2366_v7 = vpop.permute.xlu0 %2365 }
0x25c8   :  { %4980 = vmatpush3.xpose.msk.msra.mxu0 %vm2230_vm4, %v2538_v46  ;;  %5013 = vmatpush3.xpose.msk.msra.mxu1 %vm2230_vm4, %v2696_v0  ;;  %v6631_v0 = vld [vmem:[%s7142_s13 + $0x18] sm:$0xff] }
0x25c9   :  { %4928 = vmatprep.mubr.msk.f32.mxu0 %vm5544_vm0, %v5543_v1  ;;  %4963 = vmatprep.mubr.msk.f32.mxu1 %vm5544_vm0, %v5543_v1 }
0x25ca   :  { %4981 = vmatprep.subr.mxu0 %v5543_v1  ;;  %5014 = vmatprep.subr.mxu1 %v5543_v1 }
0x25cb   :  { %v2368_v45 = vpop.permute.xlu1 %2367  ;;  %4929 = vmatmul.mubr.msk.f32.gmra.mxu0 %vm2230_vm4, %v6379_v47  ;;  %4964 = vmatmul.mubr.msk.f32.gmra.mxu1 %vm2230_vm4, %v2366_v7  ;;  %v2534_v9 = vpop.permute.xlu0 %2533 }
0x25cc   :  { %4982 = vmatpush3.xpose.msk.msra.mxu0 %vm2230_vm4, %v2536_v5  ;;  %5015 = vmatpush3.xpose.msk.msra.mxu1 %vm2230_vm4, %v2694_v53 }
0x25cd   :  { %4931 = vmatprep.mubr.msk.f32.mxu0 %vm5544_vm0, %v5543_v1  ;;  %4966 = vmatprep.mubr.msk.f32.mxu1 %vm5544_vm0, %v5543_v1 }
0x25ce   :  { %4983 = vmatprep.subr.mxu0 %v5543_v1  ;;  %5016 = vmatprep.subr.mxu1 %v5543_v1 }
0x25cf   :  { %v2532_v36 = vpop.permute.xlu1 %2531  ;;  %4932 = vmatmul.mubr.msk.f32.gmra.mxu0 %vm2230_vm4, %v6376_v27  ;;  %4967 = vmatmul.mubr.msk.f32.gmra.mxu1 %vm2230_vm4, %v2368_v45  ;;  %v2690_v56 = vpop.permute.xlu0 %2689 }
0x25d0   :  { %4984 = vmatpush3.xpose.msk.msra.mxu0 %vm2230_vm4, %v2534_v9  ;;  %5017 = vmatpush3.xpose.msk.msra.mxu1 %vm2230_vm4, %v2692_v6  ;;  %v6646_v9 = vld [vmem:[%s7142_s13 + $0x20] sm:$0xff] }
0x25d1   :  { %4934 = vmatprep.mubr.msk.f32.mxu0 %vm5544_vm0, %v5543_v1  ;;  %4969 = vmatprep.mubr.msk.f32.mxu1 %vm5544_vm0, %v5543_v1 }
0x25d2   :  { %4985 = vmatprep.subr.mxu0 %v5543_v1  ;;  %5018 = vmatprep.subr.mxu1 %v5543_v1 }
0x25d3   :  { %v2688_v12 = vpop.permute.xlu1 %2687  ;;  %4935 = vmatmul.mubr.msk.f32.gmra.mxu0 %vm2230_vm4, %v6373_v41  ;;  %v2370_v13 = vpop.permute.xlu0 %2369 }
0x25d4   :  { %4970 = vmatmul.mubr.msk.f32.gmra.mxu1 %vm2230_vm4, %v2370_v13  ;;  %4986 = vmatpush3.xpose.msk.msra.mxu0 %vm2230_vm4, %v2532_v36 }
0x25d5   :  { %5019 = vmatpush3.xpose.msk.msra.mxu1 %vm2230_vm4, %v2690_v56  ;;  %4937 = vmatprep.mubr.msk.f32.mxu0 %vm5544_vm0, %v5543_v1 }
0x25d6   :  { %4972 = vmatprep.mubr.msk.f32.mxu1 %vm5544_vm0, %v5543_v1  ;;  %4987 = vmatprep.subr.mxu0 %v5543_v1 }
0x25d7   :  { %v2372_v14 = vpop.permute.xlu1 %2371  ;;  %4938 = vmatmul.mubr.msk.f32.gmra.mxu0 %vm2230_vm4, %v6389_v32  ;;  %5020 = vmatprep.subr.mxu1 %v5543_v1  ;;  %v2530_v15 = vpop.permute.xlu0 %2529 }
0x25d8   :  { %4973 = vmatmul.mubr.msk.f32.gmra.mxu1 %vm2230_vm4, %v2372_v14  ;;  %4988 = vmatpush3.xpose.msk.msra.mxu0 %vm2230_vm4, %v2530_v15 }
0x25d9   :  { %5021 = vmatpush3.xpose.msk.msra.mxu1 %vm2230_vm4, %v2688_v12  ;;  %4989 = vmatprep.mubr.msk.f32.mxu0 %vm5544_vm0, %v5543_v1 }
0x25da   :  { %5022 = vmatprep.subr.mxu1 %v5543_v1  ;;  %5024 = vmatprep.mubr.msk.f32.mxu1 %vm5544_vm0, %v5543_v1 }
0x25db   :  { %v2516_v16 = vpop.permute.xlu1 %2515  ;;  %v2686_v17 = vpop.permute.xlu0 %2685  ;;  %5045 = vmatprep.subr.mxu0 %v5543_v1 }
0x25dc   :  { %4990 = vmatmul.mubr.msk.f32.vlgmr.msra.gmra.mxu0 %vm2230_vm4, %v2516_v16 }
0x25dd   :  { %5023 = vmatpush3.xpose.msk.msra.mxu1 %vm2230_vm4, %v2686_v17  ;;  %4992 = vmatprep.mubr.msk.f32.mxu0 %vm5544_vm0, %v5543_v1 }
0x25df   :  { %v2518_v4 = vpop.permute.xlu1 %2517  ;;  %v2672_v11 = vpop.permute.xlu0 %2671 }
0x25e0   :  { %4993 = vmatmul.mubr.msk.f32.gmra.mxu0 %vm2230_vm4, %v2518_v4  ;;  %5025 = vmatmul.mubr.msk.f32.vlgmr.msra.gmra.mxu1 %vm2230_vm4, %v2672_v11  ;;  %v6661_v4 = vld [vmem:[%s7142_s13 + $0x28] sm:$0xff] }
0x25e1   :  { %4995 = vmatprep.mubr.msk.f32.mxu0 %vm5544_vm0, %v5543_v1  ;;  %5027 = vmatprep.mubr.msk.f32.mxu1 %vm5544_vm0, %v5543_v1 }
0x25e3   :  { %v2520_v18 = vpop.permute.xlu1 %2519  ;;  %v2674_v24 = vpop.permute.xlu0 %2673 }
0x25e4   :  { %4996 = vmatmul.mubr.msk.f32.gmra.mxu0 %vm2230_vm4, %v2520_v18  ;;  %5028 = vmatmul.mubr.msk.f32.gmra.mxu1 %vm2230_vm4, %v2674_v24 }
0x25e5   :  { %4998 = vmatprep.mubr.msk.f32.mxu0 %vm5544_vm0, %v5543_v1  ;;  %5030 = vmatprep.mubr.msk.f32.mxu1 %vm5544_vm0, %v5543_v1 }
0x25e7   :  { %v2522_v19 = vpop.permute.xlu1 %2521  ;;  %v2676_v20 = vpop.permute.xlu0 %2675 }
0x25e8   :  { %4999 = vmatmul.mubr.msk.f32.gmra.mxu0 %vm2230_vm4, %v2522_v19  ;;  %5031 = vmatmul.mubr.msk.f32.gmra.mxu1 %vm2230_vm4, %v2676_v20 }
0x25e9   :  { %5001 = vmatprep.mubr.msk.f32.mxu0 %vm5544_vm0, %v5543_v1  ;;  %5033 = vmatprep.mubr.msk.f32.mxu1 %vm5544_vm0, %v5543_v1 }
0x25eb   :  { %v2524_v21 = vpop.permute.xlu1 %2523  ;;  %v2678_v22 = vpop.permute.xlu0 %2677 }
0x25ec   :  { %5002 = vmatmul.mubr.msk.f32.gmra.mxu0 %vm2230_vm4, %v2524_v21  ;;  %5034 = vmatmul.mubr.msk.f32.gmra.mxu1 %vm2230_vm4, %v2678_v22 }
0x25ed   :  { %5004 = vmatprep.mubr.msk.f32.mxu0 %vm5544_vm0, %v5543_v1  ;;  %5036 = vmatprep.mubr.msk.f32.mxu1 %vm5544_vm0, %v5543_v1 }
0x25ef   :  { %v2526_v40 = vpop.permute.xlu1 %2525  ;;  %v2680_v58 = vpop.permute.xlu0 %2679 }
0x25f0   :  { %5005 = vmatmul.mubr.msk.f32.gmra.mxu0 %vm2230_vm4, %v2526_v40  ;;  %5037 = vmatmul.mubr.msk.f32.gmra.mxu1 %vm2230_vm4, %v2680_v58  ;;  %v6676_v40 = vld [vmem:[%s7142_s13 + $0x30] sm:$0xff] }
0x25f1   :  { %5007 = vmatprep.mubr.msk.f32.mxu0 %vm5544_vm0, %v5543_v1  ;;  %5039 = vmatprep.mubr.msk.f32.mxu1 %vm5544_vm0, %v5543_v1 }
0x25f3   :  { %v2528_v60 = vpop.permute.xlu1 %2527  ;;  %v2682_v3 = vpop.permute.xlu0 %2681 }
0x25f4   :  { %5008 = vmatmul.mubr.msk.f32.gmra.mxu0 %vm2230_vm4, %v2528_v60  ;;  %5040 = vmatmul.mubr.msk.f32.gmra.mxu1 %vm2230_vm4, %v2682_v3 }
0x25f5   :  { %5042 = vmatprep.mubr.msk.f32.mxu1 %vm5544_vm0, %v5543_v1  ;;  %5059 = vmatprep.mubr.msk.f32.mxu0 %vm5544_vm0, %v5543_v1 }
0x25f7   :  { %v2684_v8 = vpop.permute.xlu0 %2683 }
0x25f8   :  { %5043 = vmatmul.mubr.msk.f32.gmra.mxu1 %vm2230_vm4, %v2684_v8 }
0x267f   :  { %v2325_v39 = vpop.f32.mrf.mxu0  ;;  %v2481_v28 = vpop.f32.mrf.mxu1 }
0x2680   :  { %v6593_v29 = vadd.f32 %v6590_v25, %v2325_v39  ;;  %v6596_v48 = vadd.f32 %v6590_v25, %v2481_v28 }
0x2681   :  { %v4921_v31 = vpop.f32.mrf.mxu0  ;;  %v4956_v26 = vpop.f32.mrf.mxu1 }
0x2682   :  { %v2883_v37 = vsel %vm165_vm1, %v6596_v48, -inf  ;;  %v2862_v50 = vsel %vm165_vm1, %v6593_v29, -inf }
0x2683   :  { %2884 = vmax.xlane.f32.xlu0 %v2883_v37  ;;  %v2486_v51 = vpop.f32.mrf.mxu1  ;;  %2863 = vmax.xlane.f32.xlu1 %v2862_v50  ;;  %v2330_v52 = vpop.f32.mrf.mxu0 }
0x2684   :  { %v6608_v10 = vadd.f32 %v6601_v49, %v2486_v51  ;;  %v6611_v34 = vadd.f32 %v6601_v49, %v2330_v52 }
0x2685   :  { %v4924_v55 = vpop.f32.mrf.mxu0  ;;  %v4959_v57 = vpop.f32.mrf.mxu1 }
0x2686   :  { %v2886_v33 = vsel %vm165_vm1, %v6608_v10, -inf  ;;  %v2865_v61 = vsel %vm165_vm1, %v6611_v34, -inf }
0x2687   :  { %2887 = vmax.xlane.f32.xlu0 %v2886_v33  ;;  %v2491_v62 = vpop.f32.mrf.mxu1  ;;  %2866 = vmax.xlane.f32.xlu1 %v2865_v61  ;;  %v2335_v54 = vpop.f32.mrf.mxu0 }
0x2688   :  { %v6623_v63 = vadd.f32 %v6616_v59, %v2491_v62  ;;  %v6626_v23 = vadd.f32 %v6616_v59, %v2335_v54 }
0x2689   :  { %v4927_v42 = vpop.f32.mrf.mxu0  ;;  %v4962_v46 = vpop.f32.mrf.mxu1 }
0x268a   :  { %v2889_v53 = vsel %vm165_vm1, %v6623_v63, -inf  ;;  %v2868_v2 = vsel %vm165_vm1, %v6626_v23, -inf }
0x268b   :  { %2890 = vmax.xlane.f32.xlu0 %v2889_v53  ;;  %v2496_v43 = vpop.f32.mrf.mxu1  ;;  %2869 = vmax.xlane.f32.xlu1 %v2868_v2  ;;  %v2340_v5 = vpop.f32.mrf.mxu0 }
0x268c   :  { %v6638_v44 = vadd.f32 %v6631_v0, %v2496_v43  ;;  %v6641_v6 = vadd.f32 %v6631_v0, %v2340_v5 }
0x268d   :  { %v4930_v7 = vpop.f32.mrf.mxu0  ;;  %v4965_v45 = vpop.f32.mrf.mxu1 }
0x268e   :  { %v2892_v36 = vsel %vm165_vm1, %v6638_v44, -inf  ;;  %v2871_v56 = vsel %vm165_vm1, %v6641_v6, -inf }
0x268f   :  { %2893 = vmax.xlane.f32.xlu0 %v2892_v36  ;;  %v2501_v12 = vpop.f32.mrf.mxu1  ;;  %2872 = vmax.xlane.f32.xlu1 %v2871_v56  ;;  %v2345_v13 = vpop.f32.mrf.mxu0 }
0x2690   :  { %v6653_v14 = vadd.f32 %v6646_v9, %v2501_v12  ;;  %v6656_v15 = vadd.f32 %v6646_v9, %v2345_v13 }
0x2691   :  { %v4933_v16 = vpop.f32.mrf.mxu0  ;;  %v4968_v17 = vpop.f32.mrf.mxu1 }
0x2692   :  { %v2895_v11 = vsel %vm165_vm1, %v6653_v14, -inf  ;;  %v2874_v18 = vsel %vm165_vm1, %v6656_v15, -inf }
0x2693   :  { %2896 = vmax.xlane.f32.xlu0 %v2895_v11  ;;  %2875 = vmax.xlane.f32.xlu1 %v2874_v18  ;;  %v2350_v24 = vpop.f32.mrf.mxu0 }
0x2694   :  { %v6668_v19 = vadd.f32 %v6661_v4, %v2350_v24  ;;  %v2506_v20 = vpop.f32.mrf.mxu1 }
0x2695   :  { %v6671_v21 = vadd.f32 %v6661_v4, %v2506_v20  ;;  %v4936_v22 = vpop.f32.mrf.mxu0 }
0x2696   :  { %v4971_v58 = vpop.f32.mrf.mxu1  ;;  %v2877_v60 = vsel %vm165_vm1, %v6668_v19, -inf }
0x2697   :  { %2878 = vmax.xlane.f32.xlu1 %v2877_v60  ;;  %v2355_v3 = vpop.f32.mrf.mxu0  ;;  %v2898_v8 = vsel %vm165_vm1, %v6671_v21, -inf }
0x2698   :  { %v6683_v39 = vadd.f32 %v6676_v40, %v2355_v3  ;;  %2899 = vmax.xlane.f32.xlu0 %v2898_v8  ;;  %v2511_v28 = vpop.f32.mrf.mxu1 }
0x2699   :  { %v6686_v31 = vadd.f32 %v6676_v40, %v2511_v28  ;;  %v4939_v26 = vpop.f32.mrf.mxu0 }
0x269a   :  { %v4974_v37 = vpop.f32.mrf.mxu1  ;;  %v2880_v50 = vsel %vm165_vm1, %v6683_v39, -inf }
0x269b   :  { %2881 = vmax.xlane.f32.xlu1 %v2880_v50  ;;  %v2901_v51 = vsel %vm165_vm1, %v6686_v31, -inf }
0x269c   :  { %2902 = vmax.xlane.f32.xlu0 %v2901_v51  ;;  %v2637_v52 = vpop.f32.mrf.mxu0 }
0x269d   :  { %v6693_v55 = vadd.f32 %v6590_v25, %v2637_v52 }
0x269e   :  { %v4991_v57 = vpop.f32.mrf.mxu0 }
0x269f   :  { %v2904_v33 = vsel %vm165_vm1, %v6693_v55, -inf }
0x26a0   :  { %v2793_v61 = vpop.f32.mrf.mxu1  ;;  %2905 = vmax.xlane.f32.xlu0 %v2904_v33  ;;  %v2642_v62 = vpop.f32.mrf.mxu0 }
0x26a1   :  { %v6698_v54 = vadd.f32 %v6590_v25, %v2793_v61  ;;  %v6701_v42 = vadd.f32 %v6601_v49, %v2642_v62 }
0x26a2   :  { %v4994_v46 = vpop.f32.mrf.mxu0  ;;  %v5026_v53 = vpop.f32.mrf.mxu1 }
0x26a3   :  { %v2925_v2 = vsel %vm165_vm1, %v6698_v54, -inf  ;;  %v2907_v43 = vsel %vm165_vm1, %v6701_v42, -inf }
0x26a4   :  { %v2798_v5 = vpop.f32.mrf.mxu1  ;;  %2926 = vmax.xlane.f32.xlu1 %v2925_v2  ;;  %2908 = vmax.xlane.f32.xlu0 %v2907_v43  ;;  %v2647_v7 = vpop.f32.mrf.mxu0 }
0x26a5   :  { %v6708_v45 = vadd.f32 %v6601_v49, %v2798_v5  ;;  %v6711_v25 = vadd.f32 %v6616_v59, %v2647_v7 }
0x26a6   :  { %v4997_v36 = vpop.f32.mrf.mxu0  ;;  %v5029_v56 = vpop.f32.mrf.mxu1 }
0x26a7   :  { %v2928_v12 = vsel %vm165_vm1, %v6708_v45, -inf  ;;  %v2910_v13 = vsel %vm165_vm1, %v6711_v25, -inf }
0x26a8   :  { %v2803_v16 = vpop.f32.mrf.mxu1  ;;  %2929 = vmax.xlane.f32.xlu1 %v2928_v12  ;;  %2911 = vmax.xlane.f32.xlu0 %v2910_v13  ;;  %v2652_v17 = vpop.f32.mrf.mxu0 }
0x26a9   :  { %v6718_v11 = vadd.f32 %v6616_v59, %v2803_v16  ;;  %v6721_v49 = vadd.f32 %v6631_v0, %v2652_v17 }
0x26aa   :  { %v5000_v18 = vpop.f32.mrf.mxu0  ;;  %v5032_v24 = vpop.f32.mrf.mxu1 }
0x26ab   :  { %v2931_v20 = vsel %vm165_vm1, %v6718_v11, -inf  ;;  %v2913_v22 = vsel %vm165_vm1, %v6721_v49, -inf }
0x26ac   :  { %v2808_v58 = vpop.f32.mrf.mxu1  ;;  %2932 = vmax.xlane.f32.xlu1 %v2931_v20  ;;  %2914 = vmax.xlane.f32.xlu0 %v2913_v22  ;;  %v2657_v60 = vpop.f32.mrf.mxu0 }
0x26ad   :  { %v6728_v3 = vadd.f32 %v6631_v0, %v2808_v58  ;;  %v6731_v59 = vadd.f32 %v6646_v9, %v2657_v60 }
0x26ae   :  { %v5003_v8 = vpop.f32.mrf.mxu0  ;;  %v5035_v28 = vpop.f32.mrf.mxu1 }
0x26af   :  { %v2934_v26 = vsel %vm165_vm1, %v6728_v3, -inf  ;;  %v2916_v37 = vsel %vm165_vm1, %v6731_v59, -inf }
0x26b0   :  { %v2813_v50 = vpop.f32.mrf.mxu1  ;;  %2935 = vmax.xlane.f32.xlu1 %v2934_v26  ;;  %2917 = vmax.xlane.f32.xlu0 %v2916_v37  ;;  %v2662_v51 = vpop.f32.mrf.mxu0 }
0x26b1   :  { %v6738_v52 = vadd.f32 %v6646_v9, %v2813_v50  ;;  %v6741_v0 = vadd.f32 %v6661_v4, %v2662_v51 }
0x26b2   :  { %v5006_v57 = vpop.f32.mrf.mxu0  ;;  %v5038_v33 = vpop.f32.mrf.mxu1 }
0x26b3   :  { %v2937_v61 = vsel %vm165_vm1, %v6738_v52, -inf  ;;  %v2919_v62 = vsel %vm165_vm1, %v6741_v0, -inf }
0x26b4   :  { %v2818_v46 = vpop.f32.mrf.mxu1  ;;  %2938 = vmax.xlane.f32.xlu1 %v2937_v61  ;;  %2920 = vmax.xlane.f32.xlu0 %v2919_v62  ;;  %v2667_v53 = vpop.f32.mrf.mxu0 }
0x26b5   :  { %v6748_v2 = vadd.f32 %v6661_v4, %v2818_v46  ;;  %v6751_v9 = vadd.f32 %v6676_v40, %v2667_v53 }
0x26b6   :  { %v5009_v43 = vpop.f32.mrf.mxu0  ;;  %v5041_v5 = vpop.f32.mrf.mxu1 }
0x26b7   :  { %v2940_v7 = vsel %vm165_vm1, %v6748_v2, -inf  ;;  %v2922_v36 = vsel %vm165_vm1, %v6751_v9, -inf }
0x26b8   :  { %v2823_v56 = vpop.f32.mrf.mxu1  ;;  %2941 = vmax.xlane.f32.xlu1 %v2940_v7  ;;  %2923 = vmax.xlane.f32.xlu0 %v2922_v36 }
0x26b9   :  { %v6758_v12 = vadd.f32 %v6676_v40, %v2823_v56 }
0x26ba   :  { %v5044_v13 = vpop.f32.mrf.mxu1 }
0x26bb   :  { %v2943_v4 = vsel %vm165_vm1, %v6758_v12, -inf }
0x26bc   :  { %2944 = vmax.xlane.f32.xlu1 %v2943_v4 }
0x270c   :  { %v2885_v16 = vpop.xlane.xlu0 %2884  ;;  %v2864_v17 = vpop.xlane.xlu1 %2863 }
0x270d   :  { %v2953_v18 = vsub.f32 %v6596_v48, %v2885_v16  ;;  %v2946_v24 = vsub.f32 %v6593_v29, %v2864_v17 }
0x270f   :  { %v2988_v20 = vmul.f32 1.442695, %v2953_v18  ;;  %v2974_v22 = vmul.f32 1.442695, %v2946_v24 }
0x2710   :  { %v2888_v58 = vpop.xlane.xlu0 %2887  ;;  %v2867_v60 = vpop.xlane.xlu1 %2866 }
0x2711   :  { %5339 = vpow2.f32 %v2988_v20  ;;  %v2954_v8 = vsub.f32 %v6608_v10, %v2888_v58  ;;  %v2947_v40 = vsub.f32 %v6611_v34, %v2867_v60 }
0x2712   :  { %5341 = vpow2.f32 %v2974_v22 }
0x2713   :  { %v2990_v28 = vmul.f32 1.442695, %v2954_v8  ;;  %v2976_v26 = vmul.f32 1.442695, %v2947_v40 }
0x2714   :  { %v2891_v37 = vpop.xlane.xlu0 %2890  ;;  %v2870_v50 = vpop.xlane.xlu1 %2869 }
0x2715   :  { %5343 = vpow2.f32 %v2990_v28  ;;  %v2955_v51 = vsub.f32 %v6623_v63, %v2891_v37  ;;  %v2948_v48 = vsub.f32 %v6626_v23, %v2870_v50 }
0x2716   :  { %5345 = vpow2.f32 %v2976_v26 }
0x2717   :  { %v2992_v29 = vmul.f32 1.442695, %v2955_v51  ;;  %v2978_v57 = vmul.f32 1.442695, %v2948_v48 }
0x2718   :  { %v2894_v33 = vpop.xlane.xlu0 %2893  ;;  %v2873_v61 = vpop.xlane.xlu1 %2872 }
0x2719   :  { %5347 = vpow2.f32 %v2992_v29  ;;  %v2956_v10 = vsub.f32 %v6638_v44, %v2894_v33  ;;  %v2949_v34 = vsub.f32 %v6641_v6, %v2873_v61 }
0x271a   :  { %5349 = vpow2.f32 %v2978_v57 }
0x271b   :  { %v2994_v62 = vmul.f32 1.442695, %v2956_v10  ;;  %v2980_v46 = vmul.f32 1.442695, %v2949_v34 }
0x271c   :  { %v2897_v53 = vpop.xlane.xlu0 %2896  ;;  %v2876_v43 = vpop.xlane.xlu1 %2875 }
0x271d   :  { %5351 = vpow2.f32 %v2994_v62  ;;  %v2957_v63 = vsub.f32 %v6653_v14, %v2897_v53  ;;  %v2950_v23 = vsub.f32 %v6656_v15, %v2876_v43 }
0x271e   :  { %v6772_v5 = vpop.eup %5339  ;;  %5353 = vpow2.f32 %v2980_v46 }
0x271f   :  { %v6774_v7 = vpop.eup %5341  ;;  %v2996_v36 = vmul.f32 1.442695, %v2957_v63  ;;  %v2982_v56 = vmul.f32 1.442695, %v2950_v23  ;;  %v3051_v44 = vsel %vm165_vm1, %v6772_v5, 0.0 }
0x2720   :  { %v2879_v6 = vpop.xlane.xlu1 %2878  ;;  %3052 = vadd.xlane.f32.xlu1 %v3051_v44  ;;  %v3030_v13 = vsel %vm165_vm1, %v6774_v7, 0.0 }
0x2721   :  { %5355 = vpow2.f32 %v2996_v36  ;;  %v2951_v14 = vsub.f32 %v6668_v19, %v2879_v6  ;;  %3031 = vadd.xlane.f32.xlu0 %v3030_v13  ;;  %v2900_v15 = vpop.xlane.xlu0 %2899 }
0x2722   :  { %v6781_v4 = vpop.eup %5343  ;;  %5357 = vpow2.f32 %v2982_v56  ;;  %v2958_v16 = vsub.f32 %v6671_v21, %v2900_v15 }
0x2723   :  { %v6784_v17 = vpop.eup %5345  ;;  %v2984_v18 = vmul.f32 1.442695, %v2951_v14  ;;  %v3054_v24 = vsel %vm165_vm1, %v6781_v4, 0.0 }
0x2724   :  { %v2998_v20 = vmul.f32 1.442695, %v2958_v16  ;;  %v3033_v22 = vsel %vm165_vm1, %v6784_v17, 0.0  ;;  %v2882_v58 = vpop.xlane.xlu1 %2881 }
0x2725   :  { %5359 = vpow2.f32 %v2984_v18  ;;  %3034 = vadd.xlane.f32.xlu1 %v3033_v22  ;;  %v2952_v19 = vsub.f32 %v6683_v39, %v2882_v58  ;;  %3055 = vadd.xlane.f32.xlu0 %v3054_v24  ;;  %v2903_v60 = vpop.xlane.xlu0 %2902 }
0x2726   :  { %v6791_v8 = vpop.eup %5347  ;;  %5361 = vpow2.f32 %v2998_v20  ;;  %v2959_v21 = vsub.f32 %v6686_v31, %v2903_v60 }
0x2727   :  { %v6794_v40 = vpop.eup %5349  ;;  %v2986_v28 = vmul.f32 1.442695, %v2952_v19  ;;  %v3057_v26 = vsel %vm165_vm1, %v6791_v8, 0.0 }
0x2728   :  { %v3000_v37 = vmul.f32 1.442695, %v2959_v21  ;;  %v3036_v50 = vsel %vm165_vm1, %v6794_v40, 0.0 }
0x2729   :  { %5363 = vpow2.f32 %v2986_v28  ;;  %3037 = vadd.xlane.f32.xlu1 %v3036_v50  ;;  %3058 = vadd.xlane.f32.xlu0 %v3057_v26  ;;  %v2906_v39 = vpop.xlane.xlu0 %2905 }
0x272a   :  { %v6800_v51 = vpop.eup %5351  ;;  %5365 = vpow2.f32 %v3000_v37  ;;  %v2960_v48 = vsub.f32 %v6693_v55, %v2906_v39 }
0x272b   :  { %v6803_v31 = vpop.eup %5353  ;;  %v3060_v29 = vsel %vm165_vm1, %v6800_v51, 0.0 }
0x272c   :  { %v3002_v57 = vmul.f32 1.442695, %v2960_v48  ;;  %v3039_v33 = vsel %vm165_vm1, %v6803_v31, 0.0 }
0x272d   :  { %3040 = vadd.xlane.f32.xlu1 %v3039_v33  ;;  %3061 = vadd.xlane.f32.xlu0 %v3060_v29  ;;  %v2927_v61 = vpop.xlane.xlu1 %2926  ;;  %v2909_v10 = vpop.xlane.xlu0 %2908 }
0x272e   :  { %v6809_v34 = vpop.eup %5355  ;;  %5367 = vpow2.f32 %v3002_v57  ;;  %v2967_v62 = vsub.f32 %v6698_v54, %v2927_v61  ;;  %v2961_v55 = vsub.f32 %v6701_v42, %v2909_v10 }
0x272f   :  { %v6813_v46 = vpop.eup %5357  ;;  %v3063_v53 = vsel %vm165_vm1, %v6809_v34, 0.0 }
0x2730   :  { %v3016_v43 = vmul.f32 1.442695, %v2967_v62  ;;  %v3004_v63 = vmul.f32 1.442695, %v2961_v55  ;;  %v3042_v23 = vsel %vm165_vm1, %v6813_v46, 0.0 }
0x2731   :  { %3043 = vadd.xlane.f32.xlu1 %v3042_v23  ;;  %3064 = vadd.xlane.f32.xlu0 %v3063_v53  ;;  %v2930_v36 = vpop.xlane.xlu1 %2929  ;;  %v2912_v56 = vpop.xlane.xlu0 %2911 }
0x2732   :  { %v6819_v44 = vpop.eup %5359  ;;  %5369 = vpow2.f32 %v3016_v43  ;;  %v2968_v54 = vsub.f32 %v6708_v45, %v2930_v36  ;;  %v2962_v42 = vsub.f32 %v6711_v25, %v2912_v56 }
0x2733   :  { %v6823_v6 = vpop.eup %5361  ;;  %5371 = vpow2.f32 %v3004_v63  ;;  %v3045_v13 = vsel %vm165_vm1, %v6819_v44, 0.0 }
0x2734   :  { %v3018_v14 = vmul.f32 1.442695, %v2968_v54  ;;  %v3006_v15 = vmul.f32 1.442695, %v2962_v42  ;;  %v3066_v16 = vsel %vm165_vm1, %v6823_v6, 0.0 }
0x2735   :  { %3046 = vadd.xlane.f32.xlu1 %v3045_v13  ;;  %v2933_v18 = vpop.xlane.xlu1 %2932  ;;  %v2915_v24 = vpop.xlane.xlu0 %2914  ;;  %3067 = vadd.xlane.f32.xlu0 %v3066_v16 }
0x2736   :  { %v6829_v20 = vpop.eup %5363  ;;  %5373 = vpow2.f32 %v3018_v14  ;;  %v2969_v45 = vsub.f32 %v6718_v11, %v2933_v18  ;;  %v2963_v25 = vsub.f32 %v6721_v49, %v2915_v24 }
0x2737   :  { %v6833_v22 = vpop.eup %5365  ;;  %5375 = vpow2.f32 %v3006_v15  ;;  %v3048_v58 = vsel %vm165_vm1, %v6829_v20, 0.0 }
0x2738   :  { %v3020_v19 = vmul.f32 1.442695, %v2969_v45  ;;  %v3008_v60 = vmul.f32 1.442695, %v2963_v25  ;;  %v3069_v21 = vsel %vm165_vm1, %v6833_v22, 0.0 }
0x2739   :  { %3049 = vadd.xlane.f32.xlu1 %v3048_v58  ;;  %v2936_v28 = vpop.xlane.xlu1 %2935  ;;  %v2918_v26 = vpop.xlane.xlu0 %2917  ;;  %3070 = vadd.xlane.f32.xlu0 %v3069_v21 }
0x273a   :  { %5377 = vpow2.f32 %v3020_v19  ;;  %v2970_v11 = vsub.f32 %v6728_v3, %v2936_v28  ;;  %v2964_v49 = vsub.f32 %v6731_v59, %v2918_v26 }
0x273b   :  { %v6841_v37 = vpop.eup %5367  ;;  %5379 = vpow2.f32 %v3008_v60 }
0x273c   :  { %v3022_v50 = vmul.f32 1.442695, %v2970_v11  ;;  %v3010_v39 = vmul.f32 1.442695, %v2964_v49  ;;  %v3072_v48 = vsel %vm165_vm1, %v6841_v37, 0.0  ;;  %v3204_v11 = vld [vmem:[%s7143_s14 + $0x30] sm:$0xff] }
0x273d   :  { %v2939_v29 = vpop.xlane.xlu1 %2938  ;;  %v2921_v57 = vpop.xlane.xlu0 %2920  ;;  %3073 = vadd.xlane.f32.xlu0 %v3072_v48  ;;  %5046 = vmatpush3.msra.mxu0 %v3204_v11  ;;  %v3203_v48 = vld [vmem:[%s7143_s14 + $0x28] sm:$0xff] }
0x273e   :  { %5381 = vpow2.f32 %v3022_v50  ;;  %v2971_v33 = vsub.f32 %v6738_v52, %v2939_v29  ;;  %v2965_v61 = vsub.f32 %v6741_v0, %v2921_v57  ;;  %5047 = vmatprep.subr.mxu0 %v5543_v1  ;;  %v3202_v57 = vld [vmem:[%s7143_s14 + $0x20] sm:$0xff] }
0x273f   :  { %v6847_v10 = vpop.eup %5369  ;;  %5383 = vpow2.f32 %v3010_v39  ;;  %5048 = vmatpush3.msra.mxu0 %v3203_v48 }
0x2740   :  { %v6849_v3 = vpop.eup %5371  ;;  %v3024_v59 = vmul.f32 1.442695, %v2971_v33  ;;  %v3012_v62 = vmul.f32 1.442695, %v2965_v61  ;;  %v3093_v55 = vsel %vm165_vm1, %v6847_v10, 0.0  ;;  %5049 = vmatprep.subr.mxu0 %v5543_v1  ;;  %v3201_v61 = vld [vmem:[%s7143_s14 + $0x18] sm:$0xff] }
0x2741   :  { %3094 = vadd.xlane.f32.xlu1 %v3093_v55  ;;  %v2942_v53 = vpop.xlane.xlu1 %2941  ;;  %v3075_v43 = vsel %vm165_vm1, %v6849_v3, 0.0  ;;  %v2924_v63 = vpop.xlane.xlu0 %2923  ;;  %5050 = vmatpush3.msra.mxu0 %v3202_v57  ;;  %v3198_v55 = vld [vmem:[%s7143_s14] sm:$0xff] }
0x2742   :  { %5385 = vpow2.f32 %v3024_v59  ;;  %v2972_v52 = vsub.f32 %v6748_v2, %v2942_v53  ;;  %3076 = vadd.xlane.f32.xlu0 %v3075_v43  ;;  %v2966_v0 = vsub.f32 %v6751_v9, %v2924_v63  ;;  %5051 = vmatprep.subr.mxu0 %v5543_v1  ;;  %v3200_v59 = vld [vmem:[%s7143_s14 + $0x10] sm:$0xff] }
0x2743   :  { %v6857_v23 = vpop.eup %5373  ;;  %5387 = vpow2.f32 %v3012_v62  ;;  %5052 = vmatpush3.msra.mxu0 %v3201_v61  ;;  %v3199_v62 = vld [vmem:[%s7143_s14 + $0x8] sm:$0xff]  ;;  %s5555_s14 = smov 48  }
0x2744   :  { %v6859_v36 = vpop.eup %5375  ;;  %v3026_v56 = vmul.f32 1.442695, %v2972_v52  ;;  %v3014_v54 = vmul.f32 1.442695, %v2966_v0  ;;  %v3096_v42 = vsel %vm165_vm1, %v6857_v23, 0.0  ;;  %5053 = vmatprep.subr.mxu0 %v5543_v1 }
0x2745   :  { %3097 = vadd.xlane.f32.xlu1 %v3096_v42  ;;  %v2945_v13 = vpop.xlane.xlu1 %2944  ;;  %v3078_v14 = vsel %vm165_vm1, %v6859_v36, 0.0  ;;  %5054 = vmatpush3.msra.mxu0 %v3200_v59 }
0x2746   :  { %5389 = vpow2.f32 %v3026_v56  ;;  %v2973_v2 = vsub.f32 %v6758_v12, %v2945_v13  ;;  %3079 = vadd.xlane.f32.xlu0 %v3078_v14  ;;  %5055 = vmatprep.subr.mxu0 %v5543_v1 }
0x2747   :  { %v6866_v9 = vpop.eup %5377  ;;  %5391 = vpow2.f32 %v3014_v54  ;;  %5056 = vmatpush3.msra.mxu0 %v3199_v62 }
0x2748   :  { %v6868_v15 = vpop.eup %5379  ;;  %v3028_v16 = vmul.f32 1.442695, %v2973_v2  ;;  %v3099_v18 = vsel %vm165_vm1, %v6866_v9, 0.0  ;;  %5057 = vmatprep.subr.mxu0 %v5543_v1 }
0x2749   :  { %3100 = vadd.xlane.f32.xlu1 %v3099_v18  ;;  %v3081_v24 = vsel %vm165_vm1, %v6868_v15, 0.0  ;;  %5058 = vmatpush3.msra.mxu0 %v3198_v55 }
0x274a   :  { %5393 = vpow2.f32 %v3028_v16  ;;  %3082 = vadd.xlane.f32.xlu0 %v3081_v24  ;;  %5114 = vmatprep.subr.mxu0 %v5543_v1 }
0x274b   :  { %v6874_v45 = vpop.eup %5381 }
0x274c   :  { %v6876_v25 = vpop.eup %5383  ;;  %v3102_v12 = vsel %vm165_vm1, %v6874_v45, 0.0 }
0x274d   :  { %3103 = vadd.xlane.f32.xlu1 %v3102_v12  ;;  %v3084_v58 = vsel %vm165_vm1, %v6876_v25, 0.0 }
0x274e   :  { %3085 = vadd.xlane.f32.xlu0 %v3084_v58 }
0x274f   :  { %v6882_v19 = vpop.eup %5385 }
0x2750   :  { %v6884_v60 = vpop.eup %5387  ;;  %v3105_v21 = vsel %vm165_vm1, %v6882_v19, 0.0 }
0x2751   :  { %3106 = vadd.xlane.f32.xlu1 %v3105_v21  ;;  %v3087_v28 = vsel %vm165_vm1, %v6884_v60, 0.0 }
0x2752   :  { %3088 = vadd.xlane.f32.xlu0 %v3087_v28 }
0x2753   :  { %v6890_v26 = vpop.eup %5389 }
0x2754   :  { %v6895_v49 = vpop.eup %5391  ;;  %v3108_v50 = vsel %vm165_vm1, %v6890_v26, 0.0 }
0x2755   :  { %3109 = vadd.xlane.f32.xlu1 %v3108_v50  ;;  %v3090_v39 = vsel %vm165_vm1, %v6895_v49, 0.0 }
0x2756   :  { %3091 = vadd.xlane.f32.xlu0 %v3090_v39 }
0x2757   :  { %v6905_v29 = vpop.eup %5393 }
0x2758   :  { %v3111_v33 = vsel %vm165_vm1, %v6905_v29, 0.0 }
0x2759   :  { %3112 = vadd.xlane.f32.xlu1 %v3111_v33 }
0x276a   :  { %3518 = vrot.lane.b32.xlu1 %v6389_v32, %s5554_s4 }
0x276c   :  { %3424 = vrot.lane.b32.xlu0 %v6389_v32, %s5546_s24 }
0x276e   :  { %3422 = vrot.lane.b32.xlu1 %v6373_v41, %s5546_s24 }
0x2770   :  { %3516 = vrot.lane.b32.xlu0 %v6373_v41, %s5554_s4 }
0x2772   :  { %3420 = vrot.lane.b32.xlu1 %v6376_v27, %s5546_s24 }
0x2774   :  { %3514 = vrot.lane.b32.xlu0 %v6376_v27, %s5554_s4 }
0x2776   :  { %3418 = vrot.lane.b32.xlu1 %v6379_v47, %s5546_s24 }
0x2778   :  { %3512 = vrot.lane.b32.xlu0 %v6379_v47, %s5554_s4 }
0x277a   :  { %3416 = vrot.lane.b32.xlu1 %v6394_v30, %s5546_s24 }
0x277c   :  { %3510 = vrot.lane.b32.xlu0 %v6394_v30, %s5554_s4 }
0x277e   :  { %3414 = vrot.lane.b32.xlu1 %v6399_v35, %s5546_s24 }
0x2780   :  { %3508 = vrot.lane.b32.xlu0 %v6399_v35, %s5554_s4 }
0x2782   :  { %3412 = vrot.lane.b32.xlu1 %v6404_v38, %s5546_s24 }
0x2784   :  { %3506 = vrot.lane.b32.xlu0 %v6404_v38, %s5554_s4 }
0x2786   :  { %3612 = vrot.lane.b32.xlu1 %v6389_v32, %s5555_s14 }
0x2788   :  { %3706 = vrot.lane.b32.xlu0 %v6389_v32, %s5556_s30 }
0x278a   :  { %3610 = vrot.lane.b32.xlu1 %v6373_v41, %s5555_s14 }
0x278c   :  { %3704 = vrot.lane.b32.xlu0 %v6373_v41, %s5556_s30 }
0x278e   :  { %3608 = vrot.lane.b32.xlu1 %v6376_v27, %s5555_s14 }
0x2790   :  { %3702 = vrot.lane.b32.xlu0 %v6376_v27, %s5556_s30 }
0x2792   :  { %3606 = vrot.lane.b32.xlu1 %v6379_v47, %s5555_s14 }
0x2794   :  { %3700 = vrot.lane.b32.xlu0 %v6379_v47, %s5556_s30 }
0x2796   :  { %3604 = vrot.lane.b32.xlu1 %v6394_v30, %s5555_s14 }
0x2798   :  { %3698 = vrot.lane.b32.xlu0 %v6394_v30, %s5556_s30 }
0x279a   :  { %3602 = vrot.lane.b32.xlu1 %v6399_v35, %s5555_s14 }
0x279c   :  { %3696 = vrot.lane.b32.xlu0 %v6399_v35, %s5556_s30 }
0x279e   :  { %3600 = vrot.lane.b32.xlu1 %v6404_v38, %s5555_s14 }
0x27a0   :  { %3694 = vrot.lane.b32.xlu0 %v6404_v38, %s5556_s30 }
0x27a9   :  { %v3053_v41 = vpop.xlane.xlu1 %3052 }
0x27aa   :  { %v3032_v32 = vpop.xlane.xlu0 %3031  ;;  %5395 = vrcp.f32 %v3053_v41 }
0x27ab   :  { %5397 = vrcp.f32 %v3032_v32 }
0x27ae   :  { %v3035_v53 = vpop.xlane.xlu1 %3034  ;;  %v3056_v27 = vpop.xlane.xlu0 %3055 }
0x27af   :  { %5399 = vrcp.f32 %v3035_v53 }
0x27b0   :  { %5401 = vrcp.f32 %v3056_v27 }
0x27b2   :  { %v3038_v43 = vpop.xlane.xlu1 %3037  ;;  %v3059_v63 = vpop.xlane.xlu0 %3058 }
0x27b6   :  { %v3041_v52 = vpop.xlane.xlu1 %3040  ;;  %v3062_v47 = vpop.xlane.xlu0 %3061 }
0x27b7   :  { %v5396_v16 = vpop.eup %5395 }
0x27b8   :  { %v5398_v24 = vpop.eup %5397  ;;  %v3129_v28 = vmul.f32 %v5396_v16, %v6772_v5 }
0x27b9   :  { %v3115_v11 = vmul.f32 %v5398_v24, %v6774_v7 }
0x27ba   :  { %v3044_v0 = vpop.xlane.xlu1 %3043  ;;  %v3065_v56 = vpop.xlane.xlu0 %3064 }
0x27bb   :  { %v3170_v55 = vadd.f32 %v3129_v28, %v3115_v11 }
0x27bc   :  { %v5400_v12 = vpop.eup %5399 }
0x27bd   :  { %v5402_v21 = vpop.eup %5401  ;;  %v3117_v61 = vmul.f32 %v5400_v12, %v6784_v17 }
0x27be   :  { %v3068_v54 = vpop.xlane.xlu0 %3067  ;;  %v3047_v30 = vpop.xlane.xlu1 %3046  ;;  %v3131_v59 = vmul.f32 %v5402_v21, %v6781_v4 }
0x27c2   :  { %v3071_v42 = vpop.xlane.xlu0 %3070  ;;  %v3050_v35 = vpop.xlane.xlu1 %3049 }
0x27c6   :  { %v3074_v13 = vpop.xlane.xlu0 %3073 }
0x27c7   :  { %5403 = vrcp.f32 %v3074_v13 }
0x27c8   :  { %5405 = vrcp.f32 %v3038_v43 }
0x27c9   :  { %5407 = vrcp.f32 %v3059_v63  ;;  %v3171_v63 = vadd.f32 %v3131_v59, %v3117_v61 }
0x27ca   :  { %v3095_v38 = vpop.xlane.xlu1 %3094 }
0x27cb   :  { %5409 = vrcp.f32 %v3095_v38  ;;  %v3077_v14 = vpop.xlane.xlu0 %3076 }
0x27cc   :  { %5411 = vrcp.f32 %v3077_v14 }
0x27cd   :  { %5413 = vrcp.f32 %v3041_v52 }
0x27ce   :  { %5415 = vrcp.f32 %v3062_v47  ;;  %v3098_v2 = vpop.xlane.xlu1 %3097 }
0x27cf   :  { %5417 = vrcp.f32 %v3098_v2  ;;  %v3080_v18 = vpop.xlane.xlu0 %3079 }
0x27d0   :  { %5419 = vrcp.f32 %v3080_v18 }
0x27d1   :  { %5421 = vrcp.f32 %v3044_v0 }
0x27d2   :  { %5423 = vrcp.f32 %v3065_v56  ;;  %v3101_v58 = vpop.xlane.xlu1 %3100 }
0x27d3   :  { %5425 = vrcp.f32 %v3101_v58  ;;  %v3083_v50 = vpop.xlane.xlu0 %3082 }
0x27d4   :  { %v5404_v39 = vpop.eup %5403  ;;  %5427 = vrcp.f32 %v3083_v50 }
0x27d5   :  { %5429 = vrcp.f32 %v3047_v30  ;;  %v3143_v48 = vmul.f32 %v5404_v39, %v6841_v37  ;;  %v5406_v57 = vpop.eup %5405 }
0x27d6   :  { %5431 = vrcp.f32 %v3068_v54  ;;  %v3104_v33 = vpop.xlane.xlu1 %3103  ;;  %v5408_v62 = vpop.eup %5407  ;;  %v3119_v47 = vmul.f32 %v5406_v57, %v6794_v40 }
0x27d7   :  { %5433 = vrcp.f32 %v3104_v33  ;;  %v3086_v5 = vpop.xlane.xlu0 %3085  ;;  %v3177_v32 = vadd.f32 %v3170_v55, %v3143_v48  ;;  %v3133_v0 = vmul.f32 %v5408_v62, %v6791_v8 }
0x27d8   :  { %v5410_v41 = vpop.eup %5409  ;;  %5435 = vrcp.f32 %v3086_v5 }
0x27d9   :  { %v5412_v7 = vpop.eup %5411  ;;  %5437 = vrcp.f32 %v3050_v35  ;;  %v3157_v53 = vmul.f32 %v5410_v41, %v6847_v10  ;;  %v3172_v16 = vadd.f32 %v3133_v0, %v3119_v47 }
0x27da   :  { %v5414_v27 = vpop.eup %5413  ;;  %5439 = vrcp.f32 %v3071_v42  ;;  %v3107_v37 = vpop.xlane.xlu1 %3106  ;;  %v3145_v43 = vmul.f32 %v5412_v7, %v6849_v3 }
0x27db   :  { %v5416_v17 = vpop.eup %5415  ;;  %v3184_v52 = vadd.f32 %v3177_v32, %v3157_v53  ;;  %5441 = vrcp.f32 %v3107_v37  ;;  %v3089_v4 = vpop.xlane.xlu0 %3088  ;;  %v3121_v38 = vmul.f32 %v5414_v27, %v6803_v31 }
0x27dc   :  { %v5418_v56 = vpop.eup %5417  ;;  %5443 = vrcp.f32 %v3089_v4  ;;  %v3178_v35 = vadd.f32 %v3171_v63, %v3145_v43  ;;  %v3135_v14 = vmul.f32 %v5416_v17, %v6800_v51 }
0x27dd   :  { %v5420_v54 = vpop.eup %5419  ;;  %v3191_v30 = vmul.f32 0.25, %v3184_v52  ;;  %v3159_v10 = vmul.f32 %v5418_v56, %v6857_v23 }
0x27de   :  { %v5422_v42 = vpop.eup %5421  ;;  %v3110_v13 = vpop.xlane.xlu1 %3109  ;;  %v3147_v3 = vmul.f32 %v5420_v54, %v6859_v36  ;;  %v3173_v21 = vadd.f32 %v3135_v14, %v3121_v38 }
0x27df   :  { %v5424_v2 = vpop.eup %5423  ;;  %5445 = vrcp.f32 %v3110_v13  ;;  %v3092_v40 = vpop.xlane.xlu0 %3091  ;;  %5060 = vmatmul.mubr.msk.f32.vlgmr.msra.gmra.mxu0 %vm165_vm1, %v3191_v30  ;;  %v3185_v8 = vadd.f32 %v3178_v35, %v3159_v10  ;;  %v3123_v39 = vmul.f32 %v5422_v42, %v6813_v46 }
0x27e0   :  { %v5426_v18 = vpop.eup %5425  ;;  %5447 = vrcp.f32 %v3092_v40  ;;  %5062 = vmatprep.mubr.msk.f32.mxu0 %vm5544_vm0, %v5543_v1  ;;  %v3179_v12 = vadd.f32 %v3172_v16, %v3147_v3  ;;  %v3137_v48 = vmul.f32 %v5424_v2, %v6809_v34 }
0x27e1   :  { %v5428_v23 = vpop.eup %5427  ;;  %v3192_v24 = vmul.f32 0.25, %v3185_v8  ;;  %v3161_v36 = vmul.f32 %v5426_v18, %v6866_v9 }
0x27e2   :  { %v5430_v31 = vpop.eup %5429  ;;  %v3113_v58 = vpop.xlane.xlu1 %3112  ;;  %v3149_v51 = vmul.f32 %v5428_v23, %v6868_v15  ;;  %v3174_v32 = vadd.f32 %v3137_v48, %v3123_v39  ;;  %v3326_v23 = vld [vmem:[#allocation7] sm:$0xff] }
0x27e3   :  { %v5432_v28 = vpop.eup %5431  ;;  %5449 = vrcp.f32 %v3113_v58  ;;  %v6983_v11 = vpop.permute.xlu0 %3424  ;;  %5063 = vmatmul.mubr.msk.f32.gmra.mxu0 %vm165_vm1, %v3192_v24  ;;  %v3186_v50 = vadd.f32 %v3179_v12, %v3161_v36  ;;  %v3125_v5 = vmul.f32 %v5430_v31, %v6819_v44  ;;  %5094 = vmatprep.mubr.msk.f32.mxu1 %vm165_vm1, %v3326_v23 }
0x27e4   :  { %v5434_v57 = vpop.eup %5433  ;;  %5065 = vmatprep.mubr.msk.f32.mxu0 %vm5544_vm0, %v5543_v1  ;;  %v3180_v61 = vadd.f32 %v3173_v21, %v3149_v51  ;;  %v3139_v41 = vmul.f32 %v5432_v28, %v6823_v6 }
0x27e5   :  { %v5436_v9 = vpop.eup %5435  ;;  %v3193_v33 = vmul.f32 0.25, %v3186_v50  ;;  %v3163_v15 = vmul.f32 %v5434_v57, %v6874_v45 }
0x27e6   :  { %v5438_v59 = vpop.eup %5437  ;;  %v3519_v62 = vpop.permute.xlu1 %3518  ;;  %v3151_v55 = vmul.f32 %v5436_v9, %v6876_v25  ;;  %v3175_v37 = vadd.f32 %v3139_v41, %v3125_v5 }
0x27e7   :  { %v5440_v46 = vpop.eup %5439  ;;  %v3517_v7 = vpop.permute.xlu0 %3516  ;;  %5066 = vmatmul.mubr.msk.f32.gmra.mxu0 %vm165_vm1, %v3193_v33  ;;  %v3187_v34 = vadd.f32 %v3180_v61, %v3163_v15  ;;  %v7003_v17 = vmul.f32 %v5438_v59, %v6829_v20 }
0x27e8   :  { %v5442_v53 = vpop.eup %5441  ;;  %5115 = vmatpush3.msra.mxu0 %v3519_v62  ;;  %5068 = vmatprep.mubr.msk.f32.mxu0 %vm5544_vm0, %v5543_v1  ;;  %v3181_v44 = vadd.f32 %v3174_v32, %v3151_v55  ;;  %v3141_v52 = vmul.f32 %v5440_v46, %v6833_v22  ;;  %v3327_v32 = vld [vmem:[#allocation7 + $0x8] sm:$0xff] }
0x27e9   :  { %v5444_v45 = vpop.eup %5443  ;;  %5116 = vmatprep.subr.mxu0 %v5543_v1  ;;  %v3194_v27 = vmul.f32 0.25, %v3187_v34  ;;  %v3165_v25 = vmul.f32 %v5442_v53, %v6882_v19 }
0x27ea   :  { %5117 = vmatpush3.msra.mxu0 %v3517_v7  ;;  %v3153_v6 = vmul.f32 %v5444_v45, %v6884_v60  ;;  %v3176_v22 = vadd.f32 %v3141_v52, %v7003_v17  ;;  %v3423_v24 = vpop.permute.xlu1 %3422 }
0x27eb   :  { %5118 = vmatprep.subr.mxu0 %v5543_v1  ;;  %v3515_v43 = vpop.permute.xlu0 %3514  ;;  %5069 = vmatmul.mubr.msk.f32.gmra.mxu0 %vm165_vm1, %v3194_v27  ;;  %v3188_v63 = vadd.f32 %v3181_v44, %v3165_v25 }
0x27ec   :  { %v5446_v4 = vpop.eup %5445  ;;  %5119 = vmatpush3.msra.mxu0 %v3515_v43  ;;  %5071 = vmatprep.mubr.msk.f32.mxu0 %vm5544_vm0, %v5543_v1  ;;  %v3182_v0 = vadd.f32 %v3175_v37, %v3153_v6  ;;  %v3808_v37 = vld [vmem:[#allocation5 + $0x18] sm:$0xff]  ;;  %v3807_v43 = vld [vmem:[#allocation5 + $0x10] sm:$0xff] }
0x27ed   :  { %v5448_v19 = vpop.eup %5447  ;;  %5120 = vmatprep.subr.mxu0 %v5543_v1  ;;  %v3195_v60 = vmul.f32 0.25, %v3188_v63  ;;  %v3167_v47 = vmul.f32 %v5446_v4, %v6890_v26  ;;  %v3806_v63 = vld [vmem:[#allocation5 + $0x8] sm:$0xff] }
0x27ee   :  { %v7011_v56 = vmul.f32 %v5448_v19, %v6895_v49  ;;  %v3421_v36 = vpop.permute.xlu1 %3420 }
0x27ef   :  { %v3513_v54 = vpop.permute.xlu0 %3512  ;;  %5072 = vmatmul.mubr.msk.f32.gmra.mxu0 %vm165_vm1, %v3195_v60  ;;  %v3189_v20 = vadd.f32 %v3182_v0, %v3167_v47  ;;  %v3805_v60 = vld [vmem:[#allocation5] sm:$0xff]  ;;  %v3892_v47 = vld [vmem:[#allocation8 + $0x18] sm:$0xff] }
0x27f0   :  { %v5450_v30 = vpop.eup %5449  ;;  %5121 = vmatpush3.msra.mxu0 %v3513_v54  ;;  %5074 = vmatprep.mubr.msk.f32.mxu0 %vm5544_vm0, %v5543_v1  ;;  %v3183_v35 = vadd.f32 %v3176_v22, %v7011_v56  ;;  %v3891_v0 = vld [vmem:[#allocation8 + $0x10] sm:$0xff] }
0x27f1   :  { %5122 = vmatprep.subr.mxu0 %v5543_v1  ;;  %v3196_v10 = vmul.f32 0.25, %v3189_v20  ;;  %v3169_v26 = vmul.f32 %v5450_v30, %v6905_v29 }
0x27f2   :  { %v3419_v51 = vpop.permute.xlu1 %3418 }
0x27f3   :  { %v3511_v49 = vpop.permute.xlu0 %3510  ;;  %5075 = vmatmul.mubr.msk.f32.gmra.mxu0 %vm165_vm1, %v3196_v10  ;;  %v3190_v42 = vadd.f32 %v3183_v35, %v3169_v26 }
0x27f4   :  { %5123 = vmatpush3.msra.mxu0 %v3511_v49  ;;  %5077 = vmatprep.mubr.msk.f32.mxu0 %vm5544_vm0, %v5543_v1  ;;  %v3890_v49 = vld [vmem:[#allocation8 + $0x8] sm:$0xff] }
0x27f5   :  { %5124 = vmatprep.subr.mxu0 %v5543_v1  ;;  %v3197_v13 = vmul.f32 0.25, %v3190_v42  ;;  %v3889_v42 = vld [vmem:[#allocation8] sm:$0xff] }
0x27f6   :  { %v3417_v39 = vpop.permute.xlu1 %3416 }
0x27f7   :  { %v3509_v3 = vpop.permute.xlu0 %3508  ;;  %5078 = vmatmul.mubr.msk.f32.gmra.mxu0 %vm165_vm1, %v3197_v13  ;;  %v3977_v13 = vld [vmem:[%s7147_s18 + $0x18] sm:$0xff] }
0x27f8   :  { %5125 = vmatpush3.msra.mxu0 %v3509_v3  ;;  %5128 = vmatprep.mubr.msk.f32.mxu0 %vm5544_vm0, %v5543_v1  ;;  %v4295_v3 = vld [vmem:[%s7141_s12] ss:$0 sm:$0xff] }
0x27f9   :  { %5126 = vmatprep.subr.mxu0 %v5543_v1 }
0x27fa   :  { %v3415_v33 = vpop.permute.xlu1 %3414 }
0x27fb   :  { %v3507_v29 = vpop.permute.xlu0 %3506 }
0x27fc   :  { %5127 = vmatpush3.msra.mxu0 %v3507_v29 }
0x27fd   :  { %5129 = vmatmul.mubr.msk.f32.vlgmr.msra.gmra.mxu0 %vm165_vm1, %v3141_v52  ;;  %5148 = vmatprep.subr.mxu0 %v5543_v1 }
0x27fe   :  { %5162 = vmatprep.mubr.msk.f32.mxu0 %vm5544_vm0, %v5543_v1  ;;  %v3413_v62 = vpop.permute.xlu1 %3412 }
0x27ff   :  { %v3707_v38 = vpop.permute.xlu0 %3706 }
0x2800   :  { %5149 = vmatpush3.msra.mxu0 %v3707_v38 }
0x2801   :  { %5150 = vmatprep.subr.mxu0 %v5543_v1 }
0x2802   :  { %v3613_v41 = vpop.permute.xlu1 %3612 }
0x2803   :  { %v3705_v14 = vpop.permute.xlu0 %3704 }
0x2804   :  { %5151 = vmatpush3.msra.mxu0 %v3705_v14 }
0x2805   :  { %5152 = vmatprep.subr.mxu0 %v5543_v1 }
0x2806   :  { %v3611_v34 = vpop.permute.xlu1 %3610 }
0x2807   :  { %v3703_v2 = vpop.permute.xlu0 %3702 }
0x2808   :  { %5153 = vmatpush3.msra.mxu0 %v3703_v2  ;;  %v3976_v2 = vld [vmem:[%s7147_s18 + $0x10] sm:$0xff] }
0x2809   :  { %5154 = vmatprep.subr.mxu0 %v5543_v1 }
0x280a   :  { %v3609_v53 = vpop.permute.xlu1 %3608 }
0x280b   :  { %v3701_v40 = vpop.permute.xlu0 %3700 }
0x280c   :  { %5155 = vmatpush3.msra.mxu0 %v3701_v40  ;;  %v3975_v40 = vld [vmem:[%s7147_s18 + $0x8] sm:$0xff] }
0x280d   :  { %5156 = vmatprep.subr.mxu0 %v5543_v1 }
0x280e   :  { %v3607_v45 = vpop.permute.xlu1 %3606 }
0x280f   :  { %v3699_v8 = vpop.permute.xlu0 %3698 }
0x2810   :  { %5157 = vmatpush3.msra.mxu0 %v3699_v8  ;;  %v3974_v8 = vld [vmem:[%s7147_s18] sm:$0xff] }
0x2811   :  { %5158 = vmatprep.subr.mxu0 %v5543_v1 }
0x2813   :  { %v3697_v16 = vpop.permute.xlu0 %3696 }
0x2814   :  { %5159 = vmatpush3.msra.mxu0 %v3697_v16  ;;  %v4297_v16 = vld [vmem:[%s7146_s17] ss:$0 sm:$0xff] }
0x2815   :  { %5160 = vmatprep.subr.mxu0 %v5543_v1 }
0x2817   :  { %v3695_v18 = vpop.permute.xlu0 %3694 }
0x2818   :  { %5161 = vmatpush3.msra.mxu0 %v3695_v18 }
0x2819   :  { %5163 = vmatmul.mubr.msk.f32.vlgmr.msra.gmra.mxu0 %vm165_vm1, %v3169_v26  ;;  %5176 = vmatprep.subr.mxu0 %v5543_v1 }
0x281a   :  { %5184 = vmatprep.mubr.msk.f32.mxu0 %vm5544_vm0, %v5543_v1  ;;  %5177 = vmatpush3.msra.mxu0 %v3892_v47 }
0x281b   :  { %5178 = vmatprep.subr.mxu0 %v5543_v1 }
0x281c   :  { %5179 = vmatpush3.msra.mxu0 %v3891_v0 }
0x281d   :  { %5180 = vmatprep.subr.mxu0 %v5543_v1 }
0x281e   :  { %5181 = vmatpush3.msra.mxu0 %v3890_v49 }
0x281f   :  { %5182 = vmatprep.subr.mxu0 %v5543_v1 }
0x2820   :  { %5183 = vmatpush3.msra.mxu0 %v3889_v42 }
0x2821   :  { %5198 = vmatprep.subr.mxu0 %v5543_v1 }
0x289f   :  { %v3292_v12 = vpop.f32.mrf.mxu0 }
0x28a1   :  { %v5061_v31 = vpop.f32.mrf.mxu0 }
0x28a2   :  { %v4059_v31 = vld [vmem:[%s7149_s20] sm:$0xff] }
0x28a3   :  { %v3297_v58 = vpop.f32.mrf.mxu0 }
0x28a5   :  { %v5064_v21 = vpop.f32.mrf.mxu0 }
0x28a7   :  { %v3302_v28 = vpop.f32.mrf.mxu0 }
0x28a9   :  { %v5067_v50 = vpop.f32.mrf.mxu0 }
0x28ab   :  { %v3307_v48 = vpop.f32.mrf.mxu0 }
0x28ad   :  { %v5070_v57 = vpop.f32.mrf.mxu0 }
0x28af   :  { %v3312_v9 = vpop.f32.mrf.mxu0 }
0x28b1   :  { %v5073_v15 = vpop.f32.mrf.mxu0 }
0x28b3   :  { %v3317_v61 = vpop.f32.mrf.mxu0 }
0x28b5   :  { %v5076_v59 = vpop.f32.mrf.mxu0 }
0x28b7   :  { %v3322_v55 = vpop.f32.mrf.mxu0 }
0x28b8   :  { %5080 = vmatprep.subr.mxu1 %v3322_v55 }
0x28b9   :  { %v5079_v5 = vpop.f32.mrf.mxu0  ;;  %5081 = vmatpush3.msra.mxu1 %v3322_v55 }
0x28ba   :  { %5082 = vmatprep.subr.mxu1 %v3317_v61 }
0x28bb   :  { %5083 = vmatpush3.msra.mxu1 %v3317_v61 }
0x28bc   :  { %5084 = vmatprep.subr.mxu1 %v3312_v9 }
0x28bd   :  { %v3596_v46 = vpop.f32.mrf.mxu0  ;;  %5085 = vmatpush3.msra.mxu1 %v3312_v9 }
0x28be   :  { %3789 = vrot.lane.b32.xlu1 %v3596_v46, %s5540_s6  ;;  %5086 = vmatprep.subr.mxu1 %v3307_v48  ;;  %s5557_s6 = smov 24  }
0x28bf   :  { %v5130_v7 = vpop.f32.mrf.mxu0  ;;  %5087 = vmatpush3.msra.mxu1 %v3307_v48 }
0x28c0   :  { %5088 = vmatprep.subr.mxu1 %v3302_v28 }
0x28c1   :  { %5089 = vmatpush3.msra.mxu1 %v3302_v28 }
0x28c2   :  { %5090 = vmatprep.subr.mxu1 %v3297_v58 }
0x28c3   :  { %5091 = vmatpush3.msra.mxu1 %v3297_v58  ;;  %v4299_v58 = vld [vmem:[%s7148_s19] ss:$0 sm:$0xff] }
0x28c4   :  { %5092 = vmatprep.subr.mxu1 %v3292_v12 }
0x28c5   :  { %5093 = vmatpush3.msra.mxu1 %v3292_v12  ;;  %v4060_v12 = vld [vmem:[%s7149_s20 + $0x8] sm:$0xff] }
0x28c6   :  { %5097 = vmatprep.subr.mxu1 %v5543_v1  ;;  %5095 = vmatmul.mubr.msk.f32.vlgmr.msra.gmra.mxu1 %vm165_vm1, %v3327_v32 }
0x28c7   :  { %5098 = vmatpush3.msra.mxu1 %v6983_v11  ;;  %5111 = vmatprep.mubr.msk.f32.mxu1 %vm5544_vm0, %v5543_v1  ;;  %v3605_v11 = vpop.permute.xlu1 %3604 }
0x28c8   :  { %5099 = vmatprep.subr.mxu1 %v5543_v1 }
0x28c9   :  { %5100 = vmatpush3.msra.mxu1 %v3423_v24 }
0x28ca   :  { %5101 = vmatprep.subr.mxu1 %v5543_v1 }
0x28cb   :  { %5102 = vmatpush3.msra.mxu1 %v3421_v36  ;;  %v3603_v25 = vpop.permute.xlu1 %3602 }
0x28cc   :  { %5103 = vmatprep.subr.mxu1 %v5543_v1 }
0x28cd   :  { %5104 = vmatpush3.msra.mxu1 %v3419_v51 }
0x28ce   :  { %5105 = vmatprep.subr.mxu1 %v5543_v1 }
0x28cf   :  { %5106 = vmatpush3.msra.mxu1 %v3417_v39  ;;  %v3601_v6 = vpop.permute.xlu1 %3600  ;;  %v4301_v39 = vld [vmem:[#allocation2] ss:$0 sm:$0xff] }
0x28d0   :  { %5107 = vmatprep.subr.mxu1 %v5543_v1 }
0x28d1   :  { %5108 = vmatpush3.msra.mxu1 %v3415_v33 }
0x28d2   :  { %5109 = vmatprep.subr.mxu1 %v5543_v1 }
0x28d3   :  { %5110 = vmatpush3.msra.mxu1 %v3413_v62 }
0x28d4   :  { %5112 = vmatmul.mubr.msk.f32.vlgmr.msra.gmra.mxu1 %vm165_vm1, %v7003_v17  ;;  %5131 = vmatprep.subr.mxu1 %v5543_v1 }
0x28d5   :  { %5132 = vmatpush3.msra.mxu1 %v3613_v41  ;;  %5145 = vmatprep.mubr.msk.f32.mxu1 %vm5544_vm0, %v5543_v1 }
0x28d6   :  { %5133 = vmatprep.subr.mxu1 %v5543_v1 }
0x28d7   :  { %5134 = vmatpush3.msra.mxu1 %v3611_v34 }
0x28d8   :  { %5135 = vmatprep.subr.mxu1 %v5543_v1 }
0x28d9   :  { %v3784_v27 = vpop.f32.mrf.mxu0  ;;  %5136 = vmatpush3.msra.mxu1 %v3609_v53 }
0x28da   :  { %3797 = vrot.lane.b32.xlu1 %v3784_v27, %s5557_s6  ;;  %5137 = vmatprep.subr.mxu1 %v5543_v1 }
0x28db   :  { %v5164_v44 = vpop.f32.mrf.mxu0  ;;  %5138 = vmatpush3.msra.mxu1 %v3607_v45 }
0x28dc   :  { %5139 = vmatprep.subr.mxu1 %v5543_v1 }
0x28dd   :  { %5140 = vmatpush3.msra.mxu1 %v3605_v11 }
0x28de   :  { %5141 = vmatprep.subr.mxu1 %v5543_v1 }
0x28df   :  { %5142 = vmatpush3.msra.mxu1 %v3603_v25 }
0x28e0   :  { %5143 = vmatprep.subr.mxu1 %v5543_v1 }
0x28e1   :  { %5144 = vmatpush3.msra.mxu1 %v3601_v6 }
0x28e2   :  { %5146 = vmatmul.mubr.msk.f32.vlgmr.msra.gmra.mxu1 %vm165_vm1, %v7011_v56  ;;  %5165 = vmatprep.subr.mxu1 %v5543_v1 }
0x28e3   :  { %5173 = vmatprep.mubr.msk.f32.mxu1 %vm5544_vm0, %v5543_v1  ;;  %5166 = vmatpush3.msra.mxu1 %v3808_v37 }
0x28e4   :  { %5167 = vmatprep.subr.mxu1 %v5543_v1 }
0x28e5   :  { %5168 = vmatpush3.msra.mxu1 %v3807_v43 }
0x28e6   :  { %5169 = vmatprep.subr.mxu1 %v5543_v1 }
0x28e7   :  { %5170 = vmatpush3.msra.mxu1 %v3806_v63 }
0x28e8   :  { %5171 = vmatprep.subr.mxu1 %v5543_v1 }
0x28e9   :  { %5172 = vmatpush3.msra.mxu1 %v3805_v60 }
0x28ea   :  { %5187 = vmatprep.subr.mxu1 %v5543_v1 }
0x2930   :  { %v3790_v20 = vpop.permute.xlu1 %3789 }
0x294c   :  { %v3798_v10 = vpop.permute.xlu1 %3797 }
0x2986   :  { %v5096_v17 = vpop.f32.mrf.mxu1 }
0x2987   :  { %3411 = vst.msk [vmem:[%s7152_s23 + $0x8] sm:$0x7f] %vm3409_vm5, %v5096_v17 }
0x2988   :  { %v3400_v52 = vpop.f32.mrf.mxu1 }
0x2989   :  { %3410 = vst.msk [vmem:[%s7152_s23] sm:$0x7f] %vm3409_vm5, %v3400_v52 }
0x2994   :  { %v3502_v4 = vpop.f32.mrf.mxu1 }
0x2995   :  { %v3800_v22 = vsel %vm2230_vm4, %v3502_v4, %v3790_v20 }
0x2996   :  { %v5113_v19 = vpop.f32.mrf.mxu1 }
0x29a2   :  { %v3690_v56 = vpop.f32.mrf.mxu1 }
0x29a3   :  { %3793 = vrot.lane.b32.xlu0 %v3690_v56, %s5558_s5 }
0x29a4   :  { %v5147_v54 = vpop.f32.mrf.mxu1 }
0x2a15   :  { %v3794_v30 = vpop.permute.xlu0 %3793 }
0x2a16   :  { %v3802_v26 = vsel %vm3801_vm6, %v3800_v22, %v3794_v30 }
0x2a17   :  { %v3804_v35 = vsel %vm3803_vm7, %v3802_v26, %v3798_v10 }
0x2a18   :  { %5174 = vmatmul.mubr.msk.f32.vlgmr.msra.gmra.mxu1 %vm579_vm3, %v3804_v35 }
0x2a19   :  { %5195 = vmatprep.mubr.msk.f32.mxu1 %vm5544_vm0, %v5543_v1  ;;  %5188 = vmatpush3.msra.mxu1 %v3977_v13 }
0x2a1a   :  { %5189 = vmatprep.subr.mxu1 %v5543_v1 }
0x2a1b   :  { %5190 = vmatpush3.msra.mxu1 %v3976_v2 }
0x2a1c   :  { %5191 = vmatprep.subr.mxu1 %v5543_v1 }
0x2a1d   :  { %5192 = vmatpush3.msra.mxu1 %v3975_v40 }
0x2a1e   :  { %5193 = vmatprep.subr.mxu1 %v5543_v1 }
0x2a1f   :  { %5194 = vmatpush3.msra.mxu1 %v3974_v8 }
0x2ad8   :  { %v3885_v29 = vpop.f32.mrf.mxu1 }
0x2ad9   :  { %v3886_v38 = vadd.f32 %v4295_v3, %v3885_v29 }
0x2ada   :  { %v5175_v14 = vpop.f32.mrf.mxu1 }
0x2adb   :  { %5185 = vmatmul.mubr.msk.f32.vlgmr.msra.gmra.mxu0 %vm579_vm3, %v3886_v38 }
0x2adc   :  { %5202 = vmatprep.mubr.msk.f32.mxu0 %vm5544_vm0, %v5543_v1  ;;  %5199 = vmatpush3.msra.mxu0 %v4060_v12 }
0x2add   :  { %5200 = vmatprep.subr.mxu0 %v5543_v1 }
0x2ade   :  { %5201 = vmatpush3.msra.mxu0 %v4059_v31 }
0x2b9b   :  { %v3969_v18 = vpop.f32.mrf.mxu0 }
0x2b9c   :  { %v3970_v23 = vadd.f32 %v4297_v16, %v3969_v18 }
0x2b9d   :  { %v5186_v24 = vpop.f32.mrf.mxu0 }
0x2b9e   :  { %v3973_v36 = vmax.f32 %v3970_v23, 0.0 }
0x2ba0   :  { %5196 = vmatmul.mubr.msk.f32.vlgmr.msra.gmra.mxu1 %vm579_vm3, %v3973_v36 }
0x2c60   :  { %v4054_v51 = vpop.f32.mrf.mxu1 }
0x2c61   :  { %v4055_v21 = vadd.f32 %v4299_v58, %v4054_v51 }
0x2c62   :  { %v5197_v28 = vpop.f32.mrf.mxu1 }
0x2c63   :  { %v4058_v50 = vmax.f32 %v4055_v21, 0.0 }
0x2c65   :  { %5203 = vmatmul.mubr.msk.f32.vlgmr.msra.gmra.mxu0 %vm3801_vm6, %v4058_v50 }
0x2d25   :  { %v4137_v48 = vpop.f32.mrf.mxu0 }
0x2d26   :  { %v4138_v57 = vadd.f32 %v4301_v39, %v4137_v48 }
0x2d27   :  { %v5204_v9 = vpop.f32.mrf.mxu0 }
0x2d28   :  { %4142 = vst.msk [vmem:[%s7151_s22] sm:$0x3] %vm4141_vm8, %v4138_v57 }
0x2d29   :  { %4151 = vsyncpa [#allocation4], 1 }
0x2d2a   :  { %4152 = vsyncpa [#allocation6], 1 }
0x2d2b   :  { %4153 = vsyncpa [#allocation9], 1 }

</bundles_post_ra>
